<compile_context>
chip_gen: v6e
topology: v6e:2x2x1
jax: 0.10.0
libtpu: 0.0.40
codegen_flags: <defaults>
</compile_context>

<pallas_src>
import functools

import numpy as np
import jax
import jax.numpy as jnp
from jax import lax
from jax.experimental import pallas as pl
from jax.experimental.pallas import tpu as pltpu

CLUSTER_NUM = 4
IN_CH = 2048          # fixed by the module (Conv2d(2048, attn_emb_dim, 1))
EMB = 64              # attn_emb_dim == clinical_emb_dim
ATTN_HID = 32
CLIN_DIM = 27
CLIN_PAD = 128        # zero-pad clinical dim to a lane-friendly width (result identical)
FC_HID = 32
NEG_FILL = -1000000000.0      # masked_fill constant from the PyTorch module
PAD_FILL = -2000000000.0      # strictly more negative: ragged-tail rows never win the softmax


def _round_up(n, m):
    return (n + m - 1) // m * m


# --------------------------------------------------------------------------------------
# Kernel 1: streamed patch embedding + attention logits + flash-style online masked
# softmax pooling.  Grid = (num_cores [parallel], tiles_per_core [arbitrary]).
# Per-core partial (m, l, acc) live directly in the per-core output blocks.
# --------------------------------------------------------------------------------------
def _pool_kernel(x_ref, keep_ref,
                 emb_w_ref, emb_b_ref, a_w1_ref, a_b1_ref, a_w2_ref, a_b2_ref,
                 m_ref, l_ref, acc_ref,
                 *, total_b, tile_b, tiles_per_core):
    c = pl.program_id(0)
    i = pl.program_id(1)

    @pl.when(i == 0)
    def _init():
        m_ref[0] = jnp.full((1, 1), -jnp.inf, jnp.float32)
        l_ref[0] = jnp.zeros((1, 1), jnp.float32)
        acc_ref[0] = jnp.zeros((1, EMB), jnp.float32)

    # Intended (unclamped) global tile index.  The BlockSpec index_map clamps the DMA
    # in-bounds for duplicate tail tiles; rows >= total_b are neutralized below.
    row0 = (c * tiles_per_core + i) * tile_b
    valid_col = lax.broadcasted_iota(jnp.int32, (tile_b, 1), 0) + row0 < total_b
    valid_row = lax.broadcasted_iota(jnp.int32, (1, tile_b), 1) + row0 < total_b

    # embedding_net: 1x1 conv == channel matmul (bf16 in, f32 acc); ReLU; pooling = identity.
    h = jnp.dot(x_ref[...], emb_w_ref[...],
                preferred_element_type=jnp.float32) + emb_b_ref[...]
    h = jnp.maximum(h, 0.0)
    # OOB tail rows contain arbitrary bf16 bits (possibly NaN/Inf): zero them so the
    # p @ h accumulate stays clean even when p underflows to exactly 0.
    h = jnp.where(valid_col, h, 0.0)                                          # (TB, 64)

    # attention MLP; final (32 -> 1) done as a last-dim-contracting dot so the per-patch
    # logits come out lane-dense as a (1, TB) row (no column relayout needed).
    z = jnp.tanh(jnp.dot(h, a_w1_ref[...],
                         preferred_element_type=jnp.float32) + a_b1_ref[...])  # (TB, 32)
    logits = lax.dot_general(a_w2_ref[...], z, (((1,), (1,)), ((), ())),
                             preferred_element_type=jnp.float32) + a_b2_ref[...]  # (1, TB)

    # masked_fill semantics (set, not add): masked real patches -> NEG_FILL,
    # ragged-tail / duplicate rows -> PAD_FILL (strictly more negative).
    logits = jnp.where(keep_ref[...] > 0.5, logits, NEG_FILL)
    logits = jnp.where(valid_row, logits, PAD_FILL)

    # flash-style online masked softmax + attention pooling.
    m_old = m_ref[0]
    m_new = jnp.maximum(m_old, jnp.max(logits, axis=-1, keepdims=True))
    alpha = jnp.exp(m_old - m_new)
    p = jnp.exp(logits - m_new)                                               # (1, TB)
    l_ref[0] = alpha * l_ref[0] + jnp.sum(p, axis=-1, keepdims=True)
    acc_ref[0] = alpha * acc_ref[0] + jnp.dot(p, h, preferred_element_type=jnp.float32)
    m_ref[0] = m_new


# --------------------------------------------------------------------------------------
# Kernel 2: merge per-core softmax partials + clinical MLP + folded cross-attn/fc6 tail.
# Everything is tiny; single invocation, whole arrays in VMEM.
# --------------------------------------------------------------------------------------
def _tail_kernel(pm_ref, pls_ref, pacc_ref, clin_ref,
                 c_w1_ref, c_b1_ref, c_w2_ref, c_b2_ref,
                 cef_w_ref, cef_b_ref, f_w2_ref, f_b2_ref,
                 y_ref, m_out_ref):
    # Combine per-core flash-softmax partials (exact divide; no approx reciprocal).
    pm = pm_ref[...]                                             # (C, 1)
    mg = jnp.max(pm, axis=0, keepdims=True)                      # (1, 1)
    scale = jnp.exp(pm - mg)                                     # (C, 1)
    l = jnp.sum(pls_ref[...] * scale, axis=0, keepdims=True)     # (1, 1)
    acc = jnp.sum(pacc_ref[...] * scale, axis=0, keepdims=True)  # (1, 64)
    M = acc / l
    m_out_ref[...] = M

    # clinical MLP (input zero-padded to 128 lanes; pad rows of c_w1 are zero).
    c1 = jnp.maximum(
        jnp.dot(clin_ref[...], c_w1_ref[...],
                preferred_element_type=jnp.float32) + c_b1_ref[...], 0.0)
    ce = jnp.maximum(
        jnp.dot(c1, c_w2_ref[...],
                preferred_element_type=jnp.float32) + c_b2_ref[...], 0.0)     # (1, 64)

    # Single-key cross-attention (softmax over one key == 1, true of the original module
    # too): out_proj(v_proj(ce)) and fc6's first linear are pre-folded into cef_w/cef_b.
    f1 = jnp.maximum(
        jnp.dot(ce, cef_w_ref[...],
                preferred_element_type=jnp.float32) + cef_b_ref[...], 0.0)    # (1, 32)

    # fc6 final (32 -> 1) on the VPU.  Dropout(p=0.5) is identity in eval mode.
    # TODO(synk): training-mode dropout not implemented (eval-mode identity).
    y_ref[...] = jnp.sum(f1 * f_w2_ref[...], axis=-1, keepdims=True) + f_b2_ref[...]


# --------------------------------------------------------------------------------------
# Parameters
# --------------------------------------------------------------------------------------
def init_params(key):
    """Module-shaped parameters (all f32, linears stored transposed as (in, out))."""
    ks = jax.random.split(key, 24)

    def w(k, shape, scale=0.05):
        return scale * jax.random.normal(k, shape, dtype=jnp.float32)

    emb_w = w(ks[0], (IN_CH, EMB))            # Conv2d weight (64,2048,1,1) -> (2048,64)
    emb_b = w(ks[1], (1, EMB))
    a_w1 = w(ks[2], (EMB, ATTN_HID)); a_b1 = w(ks[3], (1, ATTN_HID))
    a_w2 = w(ks[4], (ATTN_HID, 1));   a_b2 = w(ks[5], (1, 1))
    c_w1 = w(ks[6], (CLIN_DIM, EMB)); c_b1 = w(ks[7], (1, EMB))
    c_w2 = w(ks[8], (EMB, EMB));      c_b2 = w(ks[9], (1, EMB))
    q_w = w(ks[10], (EMB, EMB)); q_b = w(ks[11], (1, EMB))
    k_w = w(ks[12], (EMB, EMB)); k_b = w(ks[13], (1, EMB))
    v_w = w(ks[14], (EMB, EMB)); v_b = w(ks[15], (1, EMB))
    o_w = w(ks[16], (EMB, EMB)); o_b = w(ks[17], (1, EMB))
    f_w1 = w(ks[18], (EMB, FC_HID)); f_b1 = w(ks[19], (1, FC_HID))
    f_w2 = w(ks[20], (FC_HID, 1));   f_b2 = w(ks[21], (1, 1))
    return (emb_w, emb_b, a_w1, a_b1, a_w2, a_b2,
            c_w1, c_b1, c_w2, c_b2,
            q_w, q_b, k_w, k_b, v_w, v_b, o_w, o_b,
            f_w1, f_b1, f_w2, f_b2)


def prepare_kernel_params(params):
    """Fold / pad / recast module params into (pool_params, tail_params).

    q/k projections of the single-key cross-attention are dead (softmax over one key == 1);
    value-proj -> out-proj -> fc6 first linear are folded exactly in f32.
    """
    (emb_w, emb_b, a_w1, a_b1, a_w2, a_b2,
     c_w1, c_b1, c_w2, c_b2,
     _q_w, _q_b, _k_w, _k_b, v_w, v_b, o_w, o_b,
     f_w1, f_b1, f_w2, f_b2) = params

    cef_w = (v_w @ o_w) @ f_w1                       # (64, 32)
    cef_b = ((v_b @ o_w + o_b) @ f_w1) + f_b1        # (1, 32)
    c_w1_pad = jnp.zeros((CLIN_PAD, EMB), jnp.float32).at[:CLIN_DIM].set(c_w1)

    pool_params = (emb_w.astype(jnp.bfloat16), emb_b,
                   a_w1, a_b1, a_w2.reshape(1, ATTN_HID), a_b2)
    tail_params = (c_w1_pad, c_b1, c_w2, c_b2,
                   cef_w, cef_b, f_w2.reshape(1, FC_HID), f_b2)
    return pool_params, tail_params


# --------------------------------------------------------------------------------------
# Forward wrappers
# --------------------------------------------------------------------------------------
def deep_attn_mil_forward_flat(x_flat, mask_patch, clinical, kparams, *,
                               tb=2048, num_cores=2):
    """x_flat: (B, 2048) patch features (pass bf16 to avoid a cast pass);
    mask_patch: (B,) {0,1} keep-flags; clinical: (1, 27)."""
    pool_params, tail_params = kparams
    B = int(x_flat.shape[0])
    assert x_flat.shape[1] == IN_CH
    if x_flat.dtype != jnp.bfloat16:
        # Production callers should feed bf16 directly; this is an extra HBM pass.
        x_flat = x_flat.astype(jnp.bfloat16)

    tb = _round_up(max(128, min(int(tb), _round_up(B, 128))), 128)
    n_tiles = pl.cdiv(B, tb)
    num_cores = max(1, min(int(num_cores), n_tiles))
    tiles_per_core = pl.cdiv(n_tiles, num_cores)

    # Lane-dense (1, B) keep-mask: ~4 bytes/patch streamed instead of the ~512 bytes/row
    # a (B, 1) f32 column costs in (8,128)-tiled HBM layout.
    keep = mask_patch.reshape(1, B).astype(jnp.float32)

    def x_map(c, i):     # clamp duplicate tail tiles in-bounds; masked out in-kernel
        return (jnp.minimum(c * tiles_per_core + i, n_tiles - 1), 0)

    def keep_map(c, i):
        return (0, jnp.minimum(c * tiles_per_core + i, n_tiles - 1))

    def resident(a):     # small weights: constant block index -> DMA'd once, VMEM-resident
        return pl.BlockSpec(a.shape, lambda c, i: (0, 0))

    kernel = functools.partial(_pool_kernel, total_b=B, tile_b=tb,
                               tiles_per_core=tiles_per_core)

    pm, pls, pacc = pl.pallas_call(
        kernel,
        out_shape=(jax.ShapeDtypeStruct((num_cores, 1, 1), jnp.float32),
                   jax.ShapeDtypeStruct((num_cores, 1, 1), jnp.float32),
                   jax.ShapeDtypeStruct((num_cores, 1, EMB), jnp.float32)),
        grid=(num_cores, tiles_per_core),
        in_specs=[pl.BlockSpec((tb, IN_CH), x_map),      # streamed patch tile (bf16)
                  pl.BlockSpec((1, tb), keep_map)]       # streamed lane-dense keep-mask
                 + [resident(p) for p in pool_params],
        out_specs=(pl.BlockSpec((1, 1, 1), lambda c, i: (c, 0, 0)),
                   pl.BlockSpec((1, 1, 1), lambda c, i: (c, 0, 0)),
                   pl.BlockSpec((1, 1, EMB), lambda c, i: (c, 0, 0))),
        compiler_params=pltpu.CompilerParams(
            dimension_semantics=("parallel", "arbitrary"),   # cores x reduction tiles
            vmem_limit_bytes=40 * 1024 * 1024),
    )(x_flat, keep, *pool_params)

    clin_p = jnp.zeros((1, CLIN_PAD), jnp.float32).at[:, :CLIN_DIM].set(
        clinical.reshape(1, -1).astype(jnp.float32))

    y, M = pl.pallas_call(
        _tail_kernel,
        out_shape=(jax.ShapeDtypeStruct((1, 1), jnp.float32),
                   jax.ShapeDtypeStruct((1, EMB), jnp.float32)),
    )(pm.reshape(num_cores, 1), pls.reshape(num_cores, 1),
      pacc.reshape(num_cores, EMB), clin_p, *tail_params)
    return y, M


def deep_attn_mil_forward(x_list, mask_cluster, clinical, kparams, *, tb=2048, num_cores=2):
    # Convenience wrapper matching the module signature; for large bags pass a
    # pre-concatenated bf16 (B, 2048) buffer to deep_attn_mil_forward_flat directly.
    x_flat = jnp.concatenate([xi.reshape(xi.shape[0], -1) for xi in x_list], axis=0)
    counts = [int(xi.shape[0]) for xi in x_list]
    idx = np.repeat(np.arange(len(counts)), counts)
    mask_patch = jnp.asarray(mask_cluster, jnp.float32)[idx]
    return deep_attn_mil_forward_flat(x_flat, mask_patch, clinical, kparams,
                                      tb=tb, num_cores=num_cores)


def reference_forward(x_list, mask_cluster, clinical, params):
    """Pure-JAX reference (unfused tail, same bf16 cast on the big matmul)."""
    (emb_w, emb_b, a_w1, a_b1, a_w2, a_b2,
     c_w1, c_b1, c_w2, c_b2,
     _q_w, _q_b, _k_w, _k_b, v_w, v_b, o_w, o_b,
     f_w1, f_b1, f_w2, f_b2) = params
    x_cat = jnp.concatenate([xi.reshape(xi.shape[0], -1) for xi in x_list], axis=0)
    counts = [int(xi.shape[0]) for xi in x_list]
    idx = np.repeat(np.arange(len(counts)), counts)
    mask_patch = jnp.asarray(mask_cluster, jnp.float32)[idx]

    h = jnp.maximum(
        jnp.dot(x_cat.astype(jnp.bfloat16), emb_w.astype(jnp.bfloat16),
                preferred_element_type=jnp.float32) + emb_b, 0.0)
    logits = (jnp.tanh(h @ a_w1 + a_b1) @ a_w2 + a_b2)[:, 0]
    logits = jnp.where(mask_patch > 0.5, logits, NEG_FILL)
    A = jax.nn.softmax(logits)
    M = (A[:, None] * h).sum(axis=0, keepdims=True)

    c1 = jnp.maximum(clinical.reshape(1, -1) @ c_w1 + c_b1, 0.0)
    ce = jnp.maximum(c1 @ c_w2 + c_b2, 0.0)
    # single key => cross-attn softmax weight is exactly 1: out = out_proj(v_proj(ce))
    v = ce @ v_w + v_b
    fused = v @ o_w + o_b
    f1 = jnp.maximum(fused @ f_w1 + f_b1, 0.0)
    y = f1 @ f_w2 + f_b2
    return y, M


if __name__ == "__main__":
    key = jax.random.PRNGKey(0)
    k_params, k_x, k_clin = jax.random.split(key, 3)
    params = init_params(k_params)
    kparams = prepare_kernel_params(params)

    # Synthetic bag: 4 clusters with [70, 90, 50, 123] patches -> 333 total.
    # With tb=128 that is 3 patch tiles split across num_cores=2 (core 1 gets a clamped
    # duplicate tail tile), exercising tiling, ragged-tail masking and the dual-core path.
    patch_counts = [70, 90, 50, 123]
    xks = jax.random.split(k_x, CLUSTER_NUM)
    x_list = [jax.random.normal(xks[i], (n, IN_CH, 1, 1), dtype=jnp.float32)
              .astype(jnp.bfloat16)                      # features arrive as bf16 (no cast pass)
              for i, n in enumerate(patch_counts)]
    mask_cluster = jnp.array([1.0, 1.0, 0.0, 1.0], dtype=jnp.float32)   # cluster-level mask
    clinical = jax.random.normal(k_clin, (1, CLIN_DIM), dtype=jnp.float32)

    y, M = deep_attn_mil_forward(x_list, mask_cluster, clinical, kparams,
                                 tb=128, num_cores=2)
    y = jax.block_until_ready(y)
    M = jax.block_until_ready(M)

    y_ref, M_ref = reference_forward(x_list, mask_cluster, clinical, params)
    assert y.shape == (1, 1)
    assert jnp.allclose(y, y_ref, atol=1e-4, rtol=1e-4), (y, y_ref)
    assert jnp.allclose(M, M_ref, atol=2e-2, rtol=2e-2), (M, M_ref)
    print("KERNEL_OK")
</pallas_src>

<mosaic_0001>
module attributes {stable_mosaic.version = 11 : i64} {
  func.func @_pool_kernel(%arg0: i32, %arg1: i32, %arg2: memref<128x2048xbf16, #tpu.memory_space<vmem>>, %arg3: memref<1x128xf32, #tpu.memory_space<vmem>>, %arg4: memref<2048x64xbf16, #tpu.memory_space<vmem>>, %arg5: memref<1x64xf32, #tpu.memory_space<vmem>>, %arg6: memref<64x32xf32, #tpu.memory_space<vmem>>, %arg7: memref<1x32xf32, #tpu.memory_space<vmem>>, %arg8: memref<1x32xf32, #tpu.memory_space<vmem>>, %arg9: memref<1x1xf32, #tpu.memory_space<vmem>>, %arg10: memref<1x1x1xf32, #tpu.memory_space<vmem>>, %arg11: memref<1x1x1xf32, #tpu.memory_space<vmem>>, %arg12: memref<1x1x64xf32, #tpu.memory_space<vmem>>) attributes {dimension_semantics = [#tpu.dimension_semantics<parallel>, #tpu.dimension_semantics<arbitrary>], iteration_bounds = array<i64: 2, 2>, scalar_prefetch = 0 : i64, scratch_operands = 0 : i64, tpu.core_type = #tpu.core_type<tc>, window_params = [{transform_indices = @transform_0, window_bounds = array<i64: 128, 2048>}, {transform_indices = @transform_1, window_bounds = array<i64: 1, 128>}, {pipeline_mode = #tpu.pipeline_mode<synchronous>, transform_indices = @transform_2, window_bounds = array<i64: 2048, 64>}, {pipeline_mode = #tpu.pipeline_mode<synchronous>, transform_indices = @transform_3, window_bounds = array<i64: 1, 64>}, {pipeline_mode = #tpu.pipeline_mode<synchronous>, transform_indices = @transform_4, window_bounds = array<i64: 64, 32>}, {pipeline_mode = #tpu.pipeline_mode<synchronous>, transform_indices = @transform_5, window_bounds = array<i64: 1, 32>}, {pipeline_mode = #tpu.pipeline_mode<synchronous>, transform_indices = @transform_6, window_bounds = array<i64: 1, 32>}, {pipeline_mode = #tpu.pipeline_mode<synchronous>, transform_indices = @transform_7, window_bounds = array<i64: 1, 1>}, {transform_indices = @transform_8, window_bounds = array<i64: 1, 1, 1>}, {transform_indices = @transform_9, window_bounds = array<i64: 1, 1, 1>}, {transform_indices = @transform_10, window_bounds = array<i64: 1, 1, 64>}]} {
    %c0_i32 = arith.constant 0 : i32
    %0 = arith.cmpi eq, %arg1, %c0_i32 : i32
    %1 = arith.extui %0 : i1 to i32
    %c0_i32_0 = arith.constant 0 : i32
    %2 = arith.cmpi ne, %1, %c0_i32_0 : i32
    scf.if %2 {
      %cst_45 = arith.constant 0xFF800000 : f32
      %77 = vector.broadcast %cst_45 : f32 to vector<1x1xf32>
      %c0_46 = arith.constant 0 : index
      %c0_47 = arith.constant 0 : index
      %c0_48 = arith.constant 0 : index
      %78 = vector.load %arg10[%c0_46, %c0_47, %c0_48] : memref<1x1x1xf32, #tpu.memory_space<vmem>>, vector<1x1x1xf32>
      %79 = vector.shape_cast %78 : vector<1x1x1xf32> to vector<1x1xf32>
      %80 = vector.shape_cast %77 : vector<1x1xf32> to vector<1x1x1xf32>
      tpu.vector_store %arg10[%c0_46, %c0_47, %c0_48], %80 {strides = array<i32>} : memref<1x1x1xf32, #tpu.memory_space<vmem>>, vector<1x1x1xf32>,
      %cst_49 = arith.constant 0.000000e+00 : f32
      %81 = vector.broadcast %cst_49 : f32 to vector<1x1xf32>
      %c0_50 = arith.constant 0 : index
      %c0_51 = arith.constant 0 : index
      %c0_52 = arith.constant 0 : index
      %82 = vector.load %arg11[%c0_50, %c0_51, %c0_52] : memref<1x1x1xf32, #tpu.memory_space<vmem>>, vector<1x1x1xf32>
      %83 = vector.shape_cast %82 : vector<1x1x1xf32> to vector<1x1xf32>
      %84 = vector.shape_cast %81 : vector<1x1xf32> to vector<1x1x1xf32>
      tpu.vector_store %arg11[%c0_50, %c0_51, %c0_52], %84 {strides = array<i32>} : memref<1x1x1xf32, #tpu.memory_space<vmem>>, vector<1x1x1xf32>,
      %cst_53 = arith.constant 0.000000e+00 : f32
      %85 = vector.broadcast %cst_53 : f32 to vector<1x64xf32>
      %c0_54 = arith.constant 0 : index
      %c0_55 = arith.constant 0 : index
      %c0_56 = arith.constant 0 : index
      %86 = vector.load %arg12[%c0_54, %c0_55, %c0_56] : memref<1x1x64xf32, #tpu.memory_space<vmem>>, vector<1x1x64xf32>
      %87 = vector.shape_cast %86 : vector<1x1x64xf32> to vector<1x64xf32>
      %88 = vector.shape_cast %85 : vector<1x64xf32> to vector<1x1x64xf32>
      tpu.vector_store %arg12[%c0_54, %c0_55, %c0_56], %88 {strides = array<i32>} : memref<1x1x64xf32, #tpu.memory_space<vmem>>, vector<1x1x64xf32>,
    } else {
    }
    %c2_i32 = arith.constant 2 : i32
    %3 = arith.muli %arg0, %c2_i32 : i32
    %4 = arith.addi %3, %arg1 : i32
    %c128_i32 = arith.constant 128 : i32
    %5 = arith.muli %4, %c128_i32 : i32
    %6 = tpu.iota {dimensions = array<i32: 0>} : vector<128x1xi32>
    %7 = vector.broadcast %5 : i32 to vector<128x1xi32>
    %8 = arith.addi %6, %7 : vector<128x1xi32>
    %c333_i32 = arith.constant 333 : i32
    %9 = vector.broadcast %c333_i32 : i32 to vector<128x1xi32>
    %10 = arith.cmpi slt, %8, %9 : vector<128x1xi32>
    %11 = tpu.iota {dimensions = array<i32: 1>} : vector<1x128xi32>
    %12 = vector.broadcast %5 : i32 to vector<1x128xi32>
    %13 = arith.addi %11, %12 : vector<1x128xi32>
    %c333_i32_1 = arith.constant 333 : i32
    %14 = vector.broadcast %c333_i32_1 : i32 to vector<1x128xi32>
    %15 = arith.cmpi slt, %13, %14 : vector<1x128xi32>
    %c0 = arith.constant 0 : index
    %c0_2 = arith.constant 0 : index
    %16 = vector.load %arg2[%c0, %c0_2] : memref<128x2048xbf16, #tpu.memory_space<vmem>>, vector<128x2048xbf16>
    %c0_3 = arith.constant 0 : index
    %c0_4 = arith.constant 0 : index
    %17 = vector.load %arg4[%c0_3, %c0_4] : memref<2048x64xbf16, #tpu.memory_space<vmem>>, vector<2048x64xbf16>
    %cst = arith.constant dense<0.000000e+00> : vector<128x64xf32>
    %18 = tpu.matmul %16, %17, %cst {dimension_numbers = #tpu.dot_dimension_numbers<[1], [0], [0], [1], [0, 0, 1, 1], [], []>} : vector<128x2048xbf16>, vector<2048x64xbf16>, vector<128x64xf32> -> vector<128x64xf32>
    %c0_5 = arith.constant 0 : index
    %c0_6 = arith.constant 0 : index
    %19 = vector.load %arg5[%c0_5, %c0_6] : memref<1x64xf32, #tpu.memory_space<vmem>>, vector<1x64xf32>
    %20 = vector.broadcast %19 : vector<1x64xf32> to vector<128x64xf32>
    %21 = arith.addf %18, %20 : vector<128x64xf32>
    %cst_7 = arith.constant 0.000000e+00 : f32
    %22 = vector.broadcast %cst_7 : f32 to vector<128x64xf32>
    %23 = arith.maximumf %21, %22 : vector<128x64xf32>
    %cst_8 = arith.constant 0.000000e+00 : f32
    %24 = vector.shape_cast %10 : vector<128x1xi1> to vector<128x1xi1>
    %25 = vector.broadcast %24 : vector<128x1xi1> to vector<128x64xi1>
    %26 = vector.broadcast %cst_8 : f32 to vector<128x64xf32>
    %27 = arith.select %25, %23, %26 : vector<128x64xi1>, vector<128x64xf32>
    %c0_9 = arith.constant 0 : index
    %c0_10 = arith.constant 0 : index
    %28 = vector.load %arg6[%c0_9, %c0_10] : memref<64x32xf32, #tpu.memory_space<vmem>>, vector<64x32xf32>
    %cst_11 = arith.constant dense<0.000000e+00> : vector<128x32xf32>
    %29 = tpu.matmul %27, %28, %cst_11 {dimension_numbers = #tpu.dot_dimension_numbers<[1], [0], [0], [1], [0, 0, 1, 1], [], []>} : vector<128x64xf32>, vector<64x32xf32>, vector<128x32xf32> -> vector<128x32xf32>
    %c0_12 = arith.constant 0 : index
    %c0_13 = arith.constant 0 : index
    %30 = vector.load %arg7[%c0_12, %c0_13] : memref<1x32xf32, #tpu.memory_space<vmem>>, vector<1x32xf32>
    %31 = vector.broadcast %30 : vector<1x32xf32> to vector<128x32xf32>
    %32 = arith.addf %29, %31 : vector<128x32xf32>
    %33 = math.tanh %32 : vector<128x32xf32>
    %c0_14 = arith.constant 0 : index
    %c0_15 = arith.constant 0 : index
    %34 = vector.load %arg8[%c0_14, %c0_15] : memref<1x32xf32, #tpu.memory_space<vmem>>, vector<1x32xf32>
    %cst_16 = arith.constant dense<0.000000e+00> : vector<1x128xf32>
    %35 = tpu.matmul %34, %33, %cst_16 {dimension_numbers = #tpu.dot_dimension_numbers<[1], [1], [0], [0], [0, 0, 1, 0], [], []>} : vector<1x32xf32>, vector<128x32xf32>, vector<1x128xf32> -> vector<1x128xf32>
    %c0_17 = arith.constant 0 : index
    %c0_18 = arith.constant 0 : index
    %36 = vector.load %arg9[%c0_17, %c0_18] : memref<1x1xf32, #tpu.memory_space<vmem>>, vector<1x1xf32>
    %37 = vector.broadcast %36 : vector<1x1xf32> to vector<1x128xf32>
    %38 = arith.addf %35, %37 : vector<1x128xf32>
    %c0_19 = arith.constant 0 : index
    %c0_20 = arith.constant 0 : index
    %39 = vector.load %arg3[%c0_19, %c0_20] : memref<1x128xf32, #tpu.memory_space<vmem>>, vector<1x128xf32>
    %cst_21 = arith.constant 5.000000e-01 : f32
    %40 = vector.broadcast %cst_21 : f32 to vector<1x128xf32>
    %41 = arith.cmpf ogt, %39, %40 : vector<1x128xf32>
    %cst_22 = arith.constant -1.000000e+09 : f32
    %42 = vector.broadcast %cst_22 : f32 to vector<1x128xf32>
    %43 = arith.select %41, %38, %42 : vector<1x128xi1>, vector<1x128xf32>
    %cst_23 = arith.constant -2.000000e+09 : f32
    %44 = vector.broadcast %cst_23 : f32 to vector<1x128xf32>
    %45 = arith.select %15, %43, %44 : vector<1x128xi1>, vector<1x128xf32>
    %c0_24 = arith.constant 0 : index
    %c0_25 = arith.constant 0 : index
    %c0_26 = arith.constant 0 : index
    %46 = vector.load %arg10[%c0_24, %c0_25, %c0_26] : memref<1x1x1xf32, #tpu.memory_space<vmem>>, vector<1x1x1xf32>
    %47 = vector.shape_cast %46 : vector<1x1x1xf32> to vector<1x1xf32>
    %cst_27 = arith.constant dense<0xFF800000> : vector<1xf32>
    %48 = vector.multi_reduction <maximumf>, %45, %cst_27 [1] : vector<1x128xf32> to vector<1xf32>
    %49 = vector.shape_cast %48 : vector<1xf32> to vector<1x1xf32>
    %50 = arith.maximumf %47, %49 : vector<1x1xf32>
    %51 = arith.subf %47, %50 : vector<1x1xf32>
    %52 = math.exp %51 : vector<1x1xf32>
    %53 = vector.broadcast %50 : vector<1x1xf32> to vector<1x128xf32>
    %54 = arith.subf %45, %53 : vector<1x128xf32>
    %55 = math.exp %54 : vector<1x128xf32>
    %c0_28 = arith.constant 0 : index
    %c0_29 = arith.constant 0 : index
    %c0_30 = arith.constant 0 : index
    %56 = vector.load %arg11[%c0_28, %c0_29, %c0_30] : memref<1x1x1xf32, #tpu.memory_space<vmem>>, vector<1x1x1xf32>
    %57 = vector.shape_cast %56 : vector<1x1x1xf32> to vector<1x1xf32>
    %58 = arith.mulf %52, %57 : vector<1x1xf32>
    %cst_31 = arith.constant dense<0.000000e+00> : vector<1xf32>
    %59 = vector.multi_reduction <add>, %55, %cst_31 [1] : vector<1x128xf32> to vector<1xf32>
    %60 = vector.shape_cast %59 : vector<1xf32> to vector<1x1xf32>
    %61 = arith.addf %58, %60 : vector<1x1xf32>
    %c0_32 = arith.constant 0 : index
    %c0_33 = arith.constant 0 : index
    %c0_34 = arith.constant 0 : index
    %62 = vector.load %arg11[%c0_32, %c0_33, %c0_34] : memref<1x1x1xf32, #tpu.memory_space<vmem>>, vector<1x1x1xf32>
    %63 = vector.shape_cast %62 : vector<1x1x1xf32> to vector<1x1xf32>
    %64 = vector.shape_cast %61 : vector<1x1xf32> to vector<1x1x1xf32>
    tpu.vector_store %arg11[%c0_32, %c0_33, %c0_34], %64 {strides = array<i32>} : memref<1x1x1xf32, #tpu.memory_space<vmem>>, vector<1x1x1xf32>,
    %c0_35 = arith.constant 0 : index
    %c0_36 = arith.constant 0 : index
    %c0_37 = arith.constant 0 : index
    %65 = vector.load %arg12[%c0_35, %c0_36, %c0_37] : memref<1x1x64xf32, #tpu.memory_space<vmem>>, vector<1x1x64xf32>
    %66 = vector.shape_cast %65 : vector<1x1x64xf32> to vector<1x64xf32>
    %67 = vector.broadcast %52 : vector<1x1xf32> to vector<1x64xf32>
    %68 = arith.mulf %67, %66 : vector<1x64xf32>
    %cst_38 = arith.constant dense<0.000000e+00> : vector<1x64xf32>
    %69 = tpu.matmul %55, %27, %cst_38 {dimension_numbers = #tpu.dot_dimension_numbers<[1], [0], [0], [1], [0, 0, 1, 1], [], []>} : vector<1x128xf32>, vector<128x64xf32>, vector<1x64xf32> -> vector<1x64xf32>
    %70 = arith.addf %68, %69 : vector<1x64xf32>
    %c0_39 = arith.constant 0 : index
    %c0_40 = arith.constant 0 : index
    %c0_41 = arith.constant 0 : index
    %71 = vector.load %arg12[%c0_39, %c0_40, %c0_41] : memref<1x1x64xf32, #tpu.memory_space<vmem>>, vector<1x1x64xf32>
    %72 = vector.shape_cast %71 : vector<1x1x64xf32> to vector<1x64xf32>
    %73 = vector.shape_cast %70 : vector<1x64xf32> to vector<1x1x64xf32>
    tpu.vector_store %arg12[%c0_39, %c0_40, %c0_41], %73 {strides = array<i32>} : memref<1x1x64xf32, #tpu.memory_space<vmem>>, vector<1x1x64xf32>,
    %c0_42 = arith.constant 0 : index
    %c0_43 = arith.constant 0 : index
    %c0_44 = arith.constant 0 : index
    %74 = vector.load %arg10[%c0_42, %c0_43, %c0_44] : memref<1x1x1xf32, #tpu.memory_space<vmem>>, vector<1x1x1xf32>
    %75 = vector.shape_cast %74 : vector<1x1x1xf32> to vector<1x1xf32>
    %76 = vector.shape_cast %50 : vector<1x1xf32> to vector<1x1x1xf32>
    tpu.vector_store %arg10[%c0_42, %c0_43, %c0_44], %76 {strides = array<i32>} : memref<1x1x1xf32, #tpu.memory_space<vmem>>, vector<1x1x1xf32>,
    return
  }
  func.func @transform_0(%arg0: i32, %arg1: i32) -> (i32, i32) {
    %c2_i32 = arith.constant 2 : i32
    %0 = arith.muli %arg0, %c2_i32 : i32
    %1 = arith.addi %0, %arg1 : i32
    %c2_i32_0 = arith.constant 2 : i32
    %2 = arith.minsi %1, %c2_i32_0 : i32
    %c0_i32 = arith.constant 0 : i32
    %c0_i32_1 = arith.constant 0 : i32
    return %2, %c0_i32 : i32, i32
  }
  func.func @transform_1(%arg0: i32, %arg1: i32) -> (i32, i32) {
    %c2_i32 = arith.constant 2 : i32
    %0 = arith.muli %arg0, %c2_i32 : i32
    %1 = arith.addi %0, %arg1 : i32
    %c2_i32_0 = arith.constant 2 : i32
    %2 = arith.minsi %1, %c2_i32_0 : i32
    %c0_i32 = arith.constant 0 : i32
    %c0_i32_1 = arith.constant 0 : i32
    return %c0_i32, %2 : i32, i32
  }
  func.func @transform_2(%arg0: i32, %arg1: i32) -> (i32, i32) {
    %c0_i32 = arith.constant 0 : i32
    %c0_i32_0 = arith.constant 0 : i32
    %c0_i32_1 = arith.constant 0 : i32
    return %c0_i32, %c0_i32_0 : i32, i32
  }
  func.func @transform_3(%arg0: i32, %arg1: i32) -> (i32, i32) {
    %c0_i32 = arith.constant 0 : i32
    %c0_i32_0 = arith.constant 0 : i32
    %c0_i32_1 = arith.constant 0 : i32
    return %c0_i32, %c0_i32_0 : i32, i32
  }
  func.func @transform_4(%arg0: i32, %arg1: i32) -> (i32, i32) {
    %c0_i32 = arith.constant 0 : i32
    %c0_i32_0 = arith.constant 0 : i32
    %c0_i32_1 = arith.constant 0 : i32
    return %c0_i32, %c0_i32_0 : i32, i32
  }
  func.func @transform_5(%arg0: i32, %arg1: i32) -> (i32, i32) {
    %c0_i32 = arith.constant 0 : i32
    %c0_i32_0 = arith.constant 0 : i32
    %c0_i32_1 = arith.constant 0 : i32
    return %c0_i32, %c0_i32_0 : i32, i32
  }
  func.func @transform_6(%arg0: i32, %arg1: i32) -> (i32, i32) {
    %c0_i32 = arith.constant 0 : i32
    %c0_i32_0 = arith.constant 0 : i32
    %c0_i32_1 = arith.constant 0 : i32
    return %c0_i32, %c0_i32_0 : i32, i32
  }
  func.func @transform_7(%arg0: i32, %arg1: i32) -> (i32, i32) {
    %c0_i32 = arith.constant 0 : i32
    %c0_i32_0 = arith.constant 0 : i32
    %c0_i32_1 = arith.constant 0 : i32
    return %c0_i32, %c0_i32_0 : i32, i32
  }
  func.func @transform_8(%arg0: i32, %arg1: i32) -> (i32, i32, i32) {
    %c0_i32 = arith.constant 0 : i32
    %c0_i32_0 = arith.constant 0 : i32
    %c0_i32_1 = arith.constant 0 : i32
    return %arg0, %c0_i32, %c0_i32_0 : i32, i32, i32
  }
  func.func @transform_9(%arg0: i32, %arg1: i32) -> (i32, i32, i32) {
    %c0_i32 = arith.constant 0 : i32
    %c0_i32_0 = arith.constant 0 : i32
    %c0_i32_1 = arith.constant 0 : i32
    return %arg0, %c0_i32, %c0_i32_0 : i32, i32, i32
  }
  func.func @transform_10(%arg0: i32, %arg1: i32) -> (i32, i32, i32) {
    %c0_i32 = arith.constant 0 : i32
    %c0_i32_0 = arith.constant 0 : i32
    %c0_i32_1 = arith.constant 0 : i32
    return %arg0, %c0_i32, %c0_i32_0 : i32, i32, i32
  }
}

</mosaic_0001>

<bundles_post_ra>
// kernel: tpu_custom_call.1
= control target key start
LH: loop header
LB: loop body
LE: loop exit
PB: predicated region body
PF: predicated region fallthrough
CT: control target
= control target key end

     0   :  { %s7037_s0 = inlined_call_operand.hbm [shape: bf16[333,2048], index: 0, kind: input, shape index: {}]   ;;  %s7038_s1 = inlined_call_operand.hbm [shape: f32[1,333], index: 1, kind: input, shape index: {}]   ;;  %s7039_s2 = inlined_call_operand.vmem [shape: bf16[2048,64], index: 2, kind: input, shape index: {}]   ;;  %s7040_s3 = inlined_call_operand.hbm [shape: f32[1,64], index: 3, kind: input, shape index: {}]   ;;  %s7041_s4 = inlined_call_operand.vmem [shape: f32[64,32], index: 4, kind: input, shape index: {}]   ;;  %s7042_s5 = inlined_call_operand.hbm [shape: f32[1,32], index: 5, kind: input, shape index: {}]   ;;  %s7043_s6 = inlined_call_operand.hbm [shape: f32[1,32], index: 6, kind: input, shape index: {}]   ;;  %s7044_s7 = inlined_call_operand.<no memory space> [shape: f32[1,1], index: 7, kind: input, shape index: {}]   ;;  %s7045_s8 = inlined_call_operand.vmem [shape: f32[2,1,1], index: 8, kind: output, shape index: {0}]   ;;  %s7046_s9 = inlined_call_operand.vmem [shape: f32[2,1,1], index: 9, kind: output, shape index: {1}]   ;;  %s7047_s10 = inlined_call_operand.hbm [shape: f32[2,1,64], index: 10, kind: output, shape index: {2}]  }
   0x1   :  { %7070 = sst [smem:[#allocation58_spill]] %s7037_s0  ;;  %v16_v0 = vstv %s7044_s7 }
   0x2   :  { %7071 = sst [smem:[#allocation59_spill]] %s7040_s3  ;;  %17 = vst [vmem:[#allocation2] sm:$0x1] %v16_v0 }
   0x3   :  { %7072 = sst [smem:[#allocation60_spill]] %s7041_s4 }
   0x4   :  { %7073 = sst [smem:[#allocation61_spill]] %s7042_s5 }
   0x5   :  { %7074 = sst [smem:[#allocation62_spill]] %s7043_s6 }
   0x6   :  { %7075 = sst [smem:[#allocation63_spill]] %s7047_s10 }
   0x7   :  { %18 = vsyncpa [#allocation4], 0 }
   0x8   :  { %20 = vsyncpa [#allocation4 + $0x1], 0 }
   0x9   :  { %21 = vsyncpa [#allocation7], 0 }
   0xa   :  { %23 = vsyncpa [#allocation7 + $0x1], 0 }
   0xb   :  { %24 = vsyncpa [#allocation10], 0 }
   0xc   :  { %25 = vsyncpa [#allocation5], 0 }
   0xd   :  { %27 = vsyncpa [#allocation5 + $0x1], 0  ;;  %s5556_s15 = smov 0   ;;  %s5558_s16 = smov 0  }
   0xe   :  { %s5560_s17 = smov 0   ;;  %s5562_s18 = smov 0  }
   0xf   :  { %s5564_s19 = smov 0   ;;  %s5566_s20 = smov 0  }
  0x10   :  { %s5568_s7 = smov 0   ;;  %s5570_s21 = smov 0  }
  0x11   :  { %s5572_s22 = smov 0   ;;  %s5574_s23 = smov 0  }
  0x12   :  { %s5576_s24 = smov 0  }
  0x13 LB: > { %7076 = sst [smem:[#allocation18_spill]] %s5443_s15  ;;  %s5612_s25 = sadd.s32 4294967295, %s5483_s24   ;;  %s5483_s24 = sphi %s5576_s24, %s33_s24   ;;  %s5479_s23 = sphi %s5574_s23, %s7184_s23   ;;  %s5475_s22 = sphi %s5572_s22, %s7183_s22   ;;  %s5471_s21 = sphi %s5570_s21, %s7182_s21   ;;  %s5467_s7 = sphi %s5568_s7, %s7190_s7   ;;  %s5463_s20 = sphi %s5566_s20, %s7189_s20   ;;  %s5459_s19 = sphi %s5564_s19, %s7188_s19   ;;  %s5455_s18 = sphi %s5562_s18, %s7187_s18   ;;  %s5451_s17 = sphi %s5560_s17, %s7179_s17   ;;  %s5447_s16 = sphi %s5558_s16, %s7186_s16   ;;  %s5443_s15 = sphi %s5556_s15, %s7185_s15  }
  0x14   : > { %7077 = sst [smem:[#allocation19_spill]] %s5451_s17  ;;  %s42_s27 = sadd.s32 1, %s5475_s22 }
  0x15   : > { %7078 = sst [smem:[#allocation20_spill]] %s5475_s22  ;;  %s45_s28 = sadd.s32 1, %s5479_s23 }
  0x16   : > { %7079 = sst [smem:[#allocation21_spill]] %s5479_s23  ;;  %p43_p0 = scmp.ge.s32.totalorder %s42_s27, 2 }
  0x17   : > { %s3897_s29 = sshll.u32 %s5479_s23, 1  ;;  %s60_s11 = sadd.s32 1, %s5463_s20 }
  0x18   : > { %s50_s30 = sadd.s32 %s5475_s22, %s3897_s29  ;;  %s7192_s27 = smov (%p43_p0, %s42_s27), 0 }
  0x19   : > { %7080 = sst [smem:[#allocation22_spill]] %s7192_s27  ;;  %s7194_s28 = smov (!%p43_p0, %s45_s28), %s5479_s23 }
  0x1a   : > { %p51_p1 = scmp.lt.s32.totalorder %s50_s30, 2  ;;  %p67_p2 = scmp.ne.s32.totalorder %s5463_s20, %s5459_s19 }
  0x1b   : > { %p47_p3 = scmp.ge.s32.totalorder %s7194_s28, 2  ;;  %p68_p4 = scmp.eq.s32.totalorder %s5483_s24, 0 }
  0x1c   : > { %s7196_s30 = smov (!%p51_p1, %s50_s30), 2  ;;  %p73_p6 = scmp.ne.s32.totalorder %s5459_s19, %s5455_s18 }
  0x1d   : > { %s7198_s28 = smov (%p47_p3, %s7194_s28), 0  ;;  %p5630_p5 = por %p68_p4, %p67_p2 }
  0x1e   : > { %7081 = sst [smem:[#allocation23_spill]] %s7198_s28  ;;  %s3898_s13 = sshll.u32 %s7198_s28, 1 }
  0x1f   : > { %p7053_p7 = scmp.eq.s32.totalorder %s5612_s25, 0  ;;  %s54_s14 = sadd.s32 %s3898_s13, %s7192_s27 }
  0x20   : > { %s295_s29 = ssub.s32 %s5479_s23, %s7198_s28  ;;  %p55_p8 = scmp.lt.s32.totalorder %s54_s14, 2 }
  0x21   : > { %p5643_p9 = por %p7053_p7, %p73_p6  ;;  %p296_p10 = scmp.eq.s32.totalorder %s295_s29, 0 }
  0x22   : > { %s298_s22 = sadd.s32 1, %s5451_s17  ;;  %s7200_s14 = smov (!%p55_p8, %s54_s14), 2 }
  0x23   : > { %s7083_s26 = scalar_select %p5643_p9, 1, 0 }
  0x24   : > { %s5649_s10 = scalar_select %p296_p10, %s5451_s17, %s298_s22  }
  0x25   : > { %s57_s18 = ssub.s32 %s7196_s30, %s7200_s14  ;;  %p308_p11 = scmp.ne.s32.totalorder %s5451_s17, %s5447_s16 }
  0x26   : > { %7084 = sst [smem:[#allocation24_spill]] %s5649_s10  ;;  %p58_p12 = scmp.eq.s32.totalorder %s57_s18, 0 }
  0x27   : > { %p309_p13 = scmp.eq.s32.totalorder %s5612_s25, 3  ;;  %p314_p0 = scmp.ne.s32.totalorder %s5447_s16, %s5443_s15 }
  0x28   : > { %s7085_s13 = sadd.s32 4294967294, %s5483_s24   ;;  %p3901_p4 = scmp.ge.s32.totalorder %s5483_s24, 1 }
  0x29   : > { %p315_p1 = scmp.eq.s32.totalorder %s7085_s13, 3  ;;  %p5662_p2 = por %p309_p13, %p308_p11 }
  0x2a   : > { %s5660_s28 = scalar_select %p58_p12, %s5463_s20, %s60_s11  }
  0x2b   : > { %s7087_s27 = scalar_select %p5662_p2, 1, 0 }
  0x2c   : > { %7086 = sst [smem:[#allocation25_spill]] %s5660_s28  ;;  %p5666_p3 = por %p315_p1, %p314_p0 }
  0x2d   : > { %7088 = sst [smem:[#allocation26_spill]] %s7087_s27  ;;  %p322_p6 = scmp.lt.s32.totalorder %s5483_s24, 5 }
  0x2e   : > { %s7089_s29 = scalar_select %p5666_p3, 1, 0 }
  0x2f   : > { %p5672_p8 = pnand %p3901_p4, %p322_p6  ;;  %s5485_s14 = smov [#allocation9]  }
  0x30   : > { %7090 = sst [smem:[#allocation27_spill]] %s7089_s29  ;;  %s352_s18 = sshll.u32 %s5485_s14, 4  ;;  %s353_s18 = int_to_ptr.vmem [resolvable:$true] %s352_s18 }
  0x31   : > { %s7091_s22 = scalar_select %p5672_p8, 1, 0 }
  0x32   : > { %p4936_p10 = pneg %p5672_p8  ;;  %s5486_s13 = smov [#allocation8]  }
  0x33   : > { %s338_s23 = sshll.u32 %s5486_s13, 4  ;;  %s5232_s28 = scalar_lea.vmem %s353_s18, 16  ;;  %s339_s23 = int_to_ptr.vmem [resolvable:$true] %s338_s23 }
  0x34   : > { %p5680_p11 = pnand %p4936_p10, %p7053_p7  ;;  %p5233_p13 = scmp.ne.s32.totalorder %s353_s18, %s5232_s28 }
  0x35   : > { %s5239_s14 = scalar_lea.vmem %s353_s18, 32  ;;  %p5240_p4 = scmp.lt.s32.totalorder %s353_s18, %s353_s18 }
  0x36   : > { %p5223_p12 = pneg %p5680_p11  ;;  %p5241_p6 = scmp.lt.s32.totalorder %s5239_s14, %s5232_s28 }
  0x38   : > { %p5235_p0 = pnand %p5233_p13, %p5223_p12  ;;  %p5242_p10 = por %p5241_p6, %p5240_p4 }
  0x3a   : > { %p5236_p1 = pneg %p5235_p0 }
  0x3c   : > { %p5243_p7 = pnand %p5242_p10, %p5236_p1 }
  0x3e   : > { %5246 = shalt.err (!%p5243_p7)
}
  0x3f   : > { %s7093_s5 = sld [smem:[#allocation61_spill]]  ;;  %s5258_s13 = scalar_lea.vmem %s339_s23, 16 }
  0x40   : > { %p5259_p3 = scmp.ne.s32.totalorder %s339_s23, %s5258_s13  ;;  %s5265_s29 = scalar_lea.vmem %s339_s23, 32 }
  0x41   : > { %p5266_p0 = scmp.lt.s32.totalorder %s339_s23, %s339_s23  ;;  %p5267_p9 = scmp.lt.s32.totalorder %s5265_s29, %s5258_s13 }
  0x42   : > { %p5261_p2 = pnand %p5259_p3, %p5223_p12 }
  0x43   : > { %p5268_p8 = por %p5267_p9, %p5266_p0 }
  0x44   : > { %p5262_p13 = pneg %p5261_p2 }
  0x45   : > { %4942 = dma.hbm_to_vmem [thread:$0]  (!%p5680_p11), %s7093_s5, 16, %s353_s18, [#allocation10]  }
  0x46   : > { %p5269_p4 = pnand %p5268_p8, %p5262_p13 }
  0x48   : > { %5272 = shalt.err (!%p5269_p4)
}
  0x49   : > { %s7094_s3 = sld [smem:[#allocation59_spill]]  ;;  %s5487_s10 = smov [#allocation11]  }
  0x4a   : > { %s363_s17 = sshll.u32 %s5487_s10, 4  ;;  %s364_s17 = int_to_ptr.vmem [resolvable:$true] %s363_s17 }
  0x4b   : > { %s5284_s18 = scalar_lea.vmem %s364_s17, 16  ;;  %s5291_s29 = scalar_lea.vmem %s364_s17, 32 }
  0x4c   : > { %p5285_p7 = scmp.ne.s32.totalorder %s364_s17, %s5284_s18  ;;  %p5292_p9 = scmp.lt.s32.totalorder %s364_s17, %s364_s17 }
  0x4d   : > { %p5293_p8 = scmp.lt.s32.totalorder %s5291_s29, %s5284_s18 }
  0x4e   : > { %p5287_p2 = pnand %p5285_p7, %p5223_p12 }
  0x4f   : > { %4939 = dma.hbm_to_vmem [thread:$0]  (!%p5680_p11), %s7094_s3, 16, %s339_s23, [#allocation7]  }
  0x50   : > { %p5288_p3 = pneg %p5287_p2  ;;  %p5294_p1 = por %p5293_p8, %p5292_p9 }
  0x52   : > { %p5295_p6 = pnand %p5294_p1, %p5288_p3 }
  0x54   : > { %5298 = shalt.err (!%p5295_p6)
}
  0x55   : > { %s7095_s6 = sld [smem:[#allocation62_spill]]  ;;  %p3905_p10 = scmp.ge.s32.totalorder %s5483_s24, 4 }
  0x57   : > { %373 = sbr.rel (%p3905_p10) target bundleno = 145 (0x91), region = 40 }
  0x5b   : > { %4945 = dma.hbm_to_vmem [thread:$0]  (!%p5680_p11), %s7095_s6, 16, %s364_s17, [#allocation10]  }
  0x5c   : > { %376 = sbr.rel (!%p5630_p5) target bundleno = 130 (0x82), region = 44  ;;  %s377_s23 = sand.u32 (%p5630_p5), 1, %s5463_s20  }
  0x5d   : > { %s3908_s14 = sshll.u32 (%p5630_p5), %s7196_s30, 4  ;;  %s3906_s10 = sshll.u32 (%p5630_p5), %s377_s23, 10 }
  0x5e   : > { %s387_s18 = ssub.s32 (%p5630_p5), 42, %s3908_s14  ;;  %s5718_s13 = scalar_lea.sflag (%p5630_p5), [#allocation4], %s377_s23 }
  0x5f   : > { %p388_p12 = scmp.lt.s32.totalorder (%p5630_p5), %s387_s18, 16  ;;  %s381_s17 = scalar_lea.vmem (%p5630_p5), [#allocation3], %s3906_s10 }
  0x61   : > { %s7202_s18 = smov (!%p388_p12, %s387_s18), 16 }
  0x62   : > { %s5715_s29 = sshll.u32 %s7202_s18, 10 }
  0x63   : > { %s393_s11 = ssub.s32 16384, %s5715_s29 }
  0x64   : > { %394 = vsyncadd %s5718_s13, %s393_s11  ;;  %p3911_p11 = scmp.ne.s32.totalorder %s5715_s29, 0  ;;  %s4238_s28 = sshll.u32 %s7196_s30, 14 }
  0x65   : > { %s7096_s0 = sld [smem:[#allocation58_spill]]  ;;  %s400_s18 = sshll.u32 %s381_s17, 4  ;;  %s5728_s18 = int_to_ptr.vmem [resolvable:$true] %s400_s18 }
  0x6b   : > { %s5726_s14 = scalar_lea.hbm %s7096_s0, %s4238_s28  ;;  %s5303_s6 = scalar_lea.hbm %s7096_s0, 43008 }
  0x6c   : > { %s5299_s23 = scalar_lea.hbm %s5726_s14, %s5715_s29 }
  0x6d   : > { %p5300_p13 = scmp.ne.s32.totalorder %s5726_s14, %s5299_s23  ;;  %p5305_p7 = scmp.lt.s32.totalorder %s5303_s6, %s5299_s23 }
  0x6f   : > { %p5301_p0 = pnand %p5300_p13, %p3911_p11 }
  0x71   : > { %p5302_p4 = pneg %p5301_p0 }
  0x73   : > { %p5307_p2 = pnand %p5305_p7, %p5302_p4 }
  0x75   : > { %5310 = shalt.err (!%p5307_p2)
}
  0x76   : > { %s5311_s3 = scalar_lea.vmem %s5728_s18, %s5715_s29  ;;  %s5488_s5 = smov [#allocation3]  }
  0x77   : > { %p5312_p3 = scmp.ne.s32.totalorder %s5728_s18, %s5311_s3  ;;  %s5315_s17 = sshll.u32 %s5488_s5, 4  ;;  %s5316_s17 = int_to_ptr.vmem [resolvable:$false] %s5315_s17 }
  0x78   : > { %s5317_s28 = scalar_lea.vmem %s5316_s17, 32768  ;;  %p5318_p1 = scmp.lt.s32.totalorder %s5728_s18, %s5316_s17 }
  0x79   : > { %p5313_p9 = pnand %p5312_p3, %p3911_p11  ;;  %p5319_p6 = scmp.lt.s32.totalorder %s5317_s28, %s5311_s3 }
  0x7b   : > { %p5314_p8 = pneg %p5313_p9  ;;  %p5320_p10 = por %p5319_p6, %p5318_p1 }
  0x7d   : > { %p5321_p12 = pnand %p5320_p10, %p5314_p8 }
  0x7f   : > { %5324 = shalt.err (!%p5321_p12)
}
  0x80   : > { %s5489_s6 = smov 1024   ;;  %s5490_s23 = smov 64  }
  0x81   : > { %406 = dma.hbm_to_vmem [thread:$0]  (%p3911_p11), %s5726_s14, %s5715_s29, %s5728_s18, %s5718_s13, %s5489_s6, %s5489_s6, %s5490_s23  }
  0x82 PF: > { %s410_s10 = sand.u32 1, %s5483_s24   ;;  %s412_s11 = sand.u32 1, %s5463_s20  }
  0x83   : > { %s3917_s3 = sshll.u32 %s7196_s30, 4  ;;  %s413_s5 = scalar_lea.vmem [#allocation6], %s412_s11 }
  0x84   : > { %s424_s17 = sshll.u32 %s413_s5, 4  ;;  %s422_s15 = scalar_lea.hbm %s7038_s1, %s3917_s3  ;;  %s425_s17 = int_to_ptr.vmem [resolvable:$true] %s424_s17 }
  0x85   : > { %s411_s27 = scalar_lea.sflag [#allocation7], %s410_s10  ;;  %s5337_s4 = scalar_lea.vmem %s425_s17, 16 }
  0x86   : > { %p5338_p13 = scmp.ne.s32.totalorder %s425_s17, %s5337_s4  ;;  %s5491_s29 = smov [#allocation6]  }
  0x87   : > { %s5341_s13 = sshll.u32 %s5491_s29, 4  ;;  %s5342_s13 = int_to_ptr.vmem [resolvable:$false] %s5341_s13 }
  0x88   : > { %p5339_p11 = pnand %p5338_p13, %p5630_p5  ;;  %s5343_s14 = scalar_lea.vmem %s5342_s13, 32 }
  0x89   : > { %p5344_p4 = scmp.lt.s32.totalorder %s425_s17, %s5342_s13  ;;  %p5345_p7 = scmp.lt.s32.totalorder %s5343_s14, %s5337_s4 }
  0x8a   : > { %p5340_p0 = pneg %p5339_p11 }
  0x8b   : > { %p5346_p2 = por %p5345_p7, %p5344_p4 }
  0x8d   : > { %p5347_p3 = pnand %p5346_p2, %p5340_p0 }
  0x8f   : > { %5350 = shalt.err (!%p5347_p3)
}
  0x90   : > { %4925 = dma.hbm_to_vmem [thread:$0]  (%p5630_p5), %s422_s15, 16, %s425_s17, %s411_s27  }
  0x91 PF: > { %p7097_p9 = scmp.ne.s32.totalorder %s7091_s22, 0 }
  0x93   : > { %433 = sbr.rel (%p7097_p9) target bundleno = 1629 (0x65d), region = 52 }
  0x98   : > { %s5763_s0 = sand.u32 1, %s5459_s19   ;;  %p7098_p8 = scmp.ne.s32.totalorder %s7083_s26, 0 }
  0x99   : > { %s3919_s30 = sshll.u32 %s5763_s0, 10  ;;  %s436_s18 = scalar_lea.sflag [#allocation4], %s5763_s0 }
  0x9a   : > { %s5767_s6 = scalar_lea.vmem [#allocation3], %s3919_s30 }
  0x9b   : > { %5422 = dma.done.wait (%p7098_p8), %s436_s18, 16384  }
  0x9c   : > { %5424 = vsyncadd (%p7098_p8), %s436_s18, 4294950912  ;;  %s444_s4 = sand.u32 1, %s5612_s25   ;;  %s447_s27 = scalar_lea.vmem [#allocation6], %s5763_s0 }
  0x9d   : > { %s445_s15 = scalar_lea.sflag [#allocation7], %s444_s4 }
  0x9e   : > { %5426 = dma.done.wait (%p7098_p8), %s445_s15, 16  }
  0x9f   : > { %5428 = vsyncadd (%p7098_p8), %s445_s15, 4294967280  ;;  %p7099_p5 = scmp.eq.s32.totalorder %s5612_s25, 0 }
  0xa1   : > { %5430 = dma.done.wait (%p7099_p5), [#allocation7], 16   ;;  %p7100_p1 = pmov %p7099_p5 }
  0xa3   : > { %5432 = vsyncadd (%p7100_p1), [#allocation7], 4294967280  ;;  %p7101_p6 = pmov %p7100_p1 }
  0xa4   : > { %p7102_p10 = pmov %p7100_p1 }
  0xa5   : > { %5434 = dma.done.wait (%p7101_p6), [#allocation10], 32  }
  0xa6   : > { %5436 = vsyncadd (%p7102_p10), [#allocation10], 4294967264  ;;  %s503_s12 = sand.u32 1, %s5447_s16   ;;  %p519_p12 = scmp.lt.s32.totalorder %s5471_s21, 1 }
  0xa7   : > { %s5802_s25 = scalar_lea.vmem [#allocation12], %s503_s12  ;;  %p3923_p13 = scmp.ne.s32.totalorder %s5467_s7, 0 }
  0xa8   : > { %s520_s26 = scalar_select %p519_p12, %s5471_s21, 1 }
  0xa9   : > { %529 = sbr.rel (%p3923_p13) target bundleno = 177 (0xb1), region = 76 }
  0xaa   : > { %s5793_s10 = scalar_lea.vmem %s7045_s8, %s520_s26  ;;  %s5798_s5 = scalar_lea.vmem %s7046_s9, %s520_s26 }
  0xae   : > { %vm530_vm0 = vcmask 0   ;;  %vm533_vm1 = vcmask 516096   ;;  %v5492_v1 = vmov -inf   ;;  %v5493_v2 = vmov 0.0  }
  0xaf   : > { %531 = vst.msk [vmem:[%s5793_s10] sm:$0x1] %vm530_vm0, %v5492_v1  ;;  %532 = vst.msk [vmem:[%s5798_s5] sm:$0x1] %vm530_vm0, %v5493_v2 }
  0xb0   : > { %534 = vst.msk [vmem:[%s5802_s25] sm:$0x1] %vm533_vm1, %v5493_v2 }
  0xb1 PF: > { %v5057_v3 = vld [vmem:[%s7039_s2 + $0x78] sm:$0xff]   ;;  %v5061_v7 = vld [vmem:[%s7039_s2 + $0x70] sm:$0xff]   ;;  %v5065_v11 = vld [vmem:[%s7039_s2 + $0x68] sm:$0xff]   ;;  %s7103_s18 = sld [smem:[#allocation60_spill]]  ;;  %vm3246_vm3 = vcmask 523264   ;;  %s4233_s0 = sshll.u32 %s5471_s21, 4 }
  0xb2   : > { %v5058_v4 = vld [vmem:[%s7039_s2 + $0xf8] sm:$0xff]   ;;  %4239 = vmatprep.subr.bf16.mxu0 %v5057_v3  ;;  %v5062_v8 = vld [vmem:[%s7039_s2 + $0xf0] sm:$0xff]   ;;  %v5066_v12 = vld [vmem:[%s7039_s2 + $0xe8] sm:$0xff]   ;;  %s7172_s23 = sld [smem:[#allocation63_spill]] }
  0xb3   : > { %v5059_v5 = vld [vmem:[%s7039_s2 + $0x38] sm:$0xff]   ;;  %4303 = vmatprep.subr.bf16.mxu1 %v5058_v4  ;;  %v5063_v9 = vld [vmem:[%s7039_s2 + $0x30] sm:$0xff]   ;;  %v5067_v13 = vld [vmem:[%s7039_s2 + $0x28] sm:$0xff]  }
  0xb4   : > { %v5060_v6 = vld [vmem:[%s7039_s2 + $0xb8] sm:$0xff]   ;;  %4240 = vmatpush3.bf16.msra.mxu0 %v5059_v5  ;;  %v5064_v10 = vld [vmem:[%s7039_s2 + $0xb0] sm:$0xff]   ;;  %v5068_v14 = vld [vmem:[%s7039_s2 + $0xa8] sm:$0xff]  }
  0xb5   : > { %4304 = vmatpush3.bf16.msra.mxu1 %v5060_v6  ;;  %4241 = vmatprep.subr.bf16.mxu0 %v5061_v7  ;;  %v5069_v15 = vld [vmem:[%s7039_s2 + $0x60] sm:$0xff]   ;;  %v5073_v19 = vld [vmem:[%s7039_s2 + $0x58] sm:$0xff]   ;;  %v5077_v23 = vld [vmem:[%s7039_s2 + $0x50] sm:$0xff]  }
  0xb6   : > { %4305 = vmatprep.subr.bf16.mxu1 %v5062_v8  ;;  %v5070_v16 = vld [vmem:[%s7039_s2 + $0xe0] sm:$0xff]   ;;  %v5074_v20 = vld [vmem:[%s7039_s2 + $0xd8] sm:$0xff]   ;;  %v5078_v24 = vld [vmem:[%s7039_s2 + $0xd0] sm:$0xff]  }
  0xb7   : > { %v5071_v17 = vld [vmem:[%s7039_s2 + $0x20] sm:$0xff]   ;;  %v5075_v21 = vld [vmem:[%s7039_s2 + $0x18] sm:$0xff]   ;;  %v5079_v25 = vld [vmem:[%s7039_s2 + $0x10] sm:$0xff]   ;;  %s7104_s4 = smov %s7103_s18 }
  0xb8   : > { %4242 = vmatpush3.bf16.msra.mxu0 %v5063_v9  ;;  %v5072_v18 = vld [vmem:[%s7039_s2 + $0xa0] sm:$0xff]   ;;  %v5076_v22 = vld [vmem:[%s7039_s2 + $0x98] sm:$0xff]   ;;  %v5080_v26 = vld [vmem:[%s7039_s2 + $0x90] sm:$0xff]   ;;  %s7173_s11 = smov %s7172_s23  ;;  %s6979_s3 = scalar_lea.hbm %s7172_s23, %s4233_s0 }
  0xb9   : > { %4306 = vmatpush3.bf16.msra.mxu1 %v5064_v10  ;;  %4243 = vmatprep.subr.bf16.mxu0 %v5065_v11  ;;  %v5081_v27 = vld [vmem:[%s7039_s2 + $0x48] sm:$0xff]   ;;  %v5085_v31 = vld [vmem:[%s7039_s2 + $0x40] sm:$0xff]   ;;  %v5089_v43 = vld [vmem:[%s7039_s2 + $0x178] sm:$0xff]  }
  0xba   : > { %4307 = vmatprep.subr.bf16.mxu1 %v5066_v12  ;;  %v5082_v28 = vld [vmem:[%s7039_s2 + $0xc8] sm:$0xff]   ;;  %v5086_v32 = vld [vmem:[%s7039_s2 + $0xc0] sm:$0xff]   ;;  %v5090_v44 = vld [vmem:[%s7039_s2 + $0x138] sm:$0xff]  }
  0xbb   : > { %v5083_v29 = vld [vmem:[%s7039_s2 + $0x8] sm:$0xff]   ;;  %v5087_v33 = vld [vmem:[%s7039_s2] sm:$0xff]   ;;  %v5091_v45 = vld [vmem:[%s7039_s2 + $0x1f8] sm:$0xff]  }
  0xbc   : > { %4244 = vmatpush3.bf16.msra.mxu0 %v5067_v13  ;;  %v5084_v30 = vld [vmem:[%s7039_s2 + $0x88] sm:$0xff]   ;;  %v5088_v34 = vld [vmem:[%s7039_s2 + $0x80] sm:$0xff]   ;;  %v5092_v46 = vld [vmem:[%s7039_s2 + $0x1b8] sm:$0xff]  }
  0xbd   : > { %4308 = vmatpush3.bf16.msra.mxu1 %v5068_v14  ;;  %4245 = vmatprep.subr.bf16.mxu0 %v5069_v15  ;;  %v592_v35 = vld [vmem:[%s5767_s6] sm:$0xff]  ;;  %v593_v37 = vld [vmem:[%s5767_s6 + $0x8] sm:$0xff] }
  0xbe   : > { %4309 = vmatprep.subr.bf16.mxu1 %v5070_v16  ;;  %v600_v36 = vld [vmem:[%s5767_s6 + $0x40] sm:$0xff]  ;;  %v601_v40 = vld [vmem:[%s5767_s6 + $0x48] sm:$0xff] }
  0xbf   : > { %v3927_v38 = vcombine.low %v592_v35, %v600_v36  ;;  %v3928_v39 = vcombine.high %v592_v35, %v600_v36  ;;  %v3929_v41 = vcombine.low %v593_v37, %v601_v40  ;;  %v3930_v42 = vcombine.high %v593_v37, %v601_v40  ;;  %v608_v47 = vld [vmem:[%s5767_s6 + $0x80] sm:$0xff]  ;;  %v609_v50 = vld [vmem:[%s5767_s6 + $0x88] sm:$0xff] }
  0xc0   : > { %4246 = vmatpush3.bf16.msra.mxu0 %v5071_v17  ;;  %v616_v48 = vld [vmem:[%s5767_s6 + $0xc0] sm:$0xff]  ;;  %v617_v51 = vld [vmem:[%s5767_s6 + $0xc8] sm:$0xff] }
  0xc1   : > { %4310 = vmatpush3.bf16.msra.mxu1 %v5072_v18  ;;  %4247 = vmatprep.subr.bf16.mxu0 %v5073_v19  ;;  %v3944_v49 = vcombine.high %v608_v47, %v616_v48  ;;  %v3946_v52 = vcombine.high %v609_v50, %v617_v51  ;;  %v5093_v53 = vld [vmem:[%s7039_s2 + $0x170] sm:$0xff]   ;;  %v3943_v54 = vcombine.low %v608_v47, %v616_v48  ;;  %v624_v59 = vld [vmem:[%s5767_s6 + $0x100] sm:$0xff] }
  0xc2   : > { %4311 = vmatprep.subr.bf16.mxu1 %v5074_v20  ;;  %2423 = vmatprep.mubr.bf16.mxu0 %v3928_v39  ;;  %v5094_v55 = vld [vmem:[%s7039_s2 + $0x130] sm:$0xff]   ;;  %v3945_v56 = vcombine.low %v609_v50, %v617_v51  ;;  %v632_v60 = vld [vmem:[%s5767_s6 + $0x140] sm:$0xff] }
  0xc3   : > { %2520 = vmatprep.mubr.bf16.mxu1 %v3930_v42  ;;  %v5095_v57 = vld [vmem:[%s7039_s2 + $0x1f0] sm:$0xff]   ;;  %v3960_v63 = vcombine.high %v624_v59, %v632_v60  ;;  %v5097_v1 = vld [vmem:[%s7039_s2 + $0x168] sm:$0xff]   ;;  %v3959_v5 = vcombine.low %v624_v59, %v632_v60  ;;  %v5101_v13 = vld [vmem:[%s7039_s2 + $0x160] sm:$0xff]  }
  0xc4   : > { %4248 = vmatpush3.bf16.msra.mxu0 %v5075_v21  ;;  %v5096_v58 = vld [vmem:[%s7039_s2 + $0x1b0] sm:$0xff]   ;;  %v5098_v2 = vld [vmem:[%s7039_s2 + $0x128] sm:$0xff]   ;;  %v5102_v14 = vld [vmem:[%s7039_s2 + $0x120] sm:$0xff]  }
  0xc5   : > { %4312 = vmatpush3.bf16.msra.mxu1 %v5076_v22  ;;  %4249 = vmatprep.subr.bf16.mxu0 %v5077_v23  ;;  %v625_v61 = vld [vmem:[%s5767_s6 + $0x108] sm:$0xff]  ;;  %v640_v6 = vld [vmem:[%s5767_s6 + $0x180] sm:$0xff]  ;;  %v5105_v21 = vld [vmem:[%s7039_s2 + $0x158] sm:$0xff]  }
  0xc6   : > { %4313 = vmatprep.subr.bf16.mxu1 %v5078_v24  ;;  %v633_v62 = vld [vmem:[%s5767_s6 + $0x148] sm:$0xff]  ;;  %v648_v7 = vld [vmem:[%s5767_s6 + $0x1c0] sm:$0xff]  ;;  %v5106_v23 = vld [vmem:[%s7039_s2 + $0x118] sm:$0xff]  }
  0xc7   : > { %v3962_v0 = vcombine.high %v625_v61, %v633_v62  ;;  %v5099_v3 = vld [vmem:[%s7039_s2 + $0x1e8] sm:$0xff]   ;;  %v3961_v9 = vcombine.low %v625_v61, %v633_v62  ;;  %v3976_v10 = vcombine.high %v640_v6, %v648_v7  ;;  %v5103_v15 = vld [vmem:[%s7039_s2 + $0x1e0] sm:$0xff]   ;;  %v3975_v22 = vcombine.low %v640_v6, %v648_v7  ;;  %v5111_v35 = vld [vmem:[%s7039_s2 + $0x1d0] sm:$0xff]  }
  0xc8   : > { %4250 = vmatpush3.bf16.msra.mxu0 %v5079_v25  ;;  %v5100_v4 = vld [vmem:[%s7039_s2 + $0x1a8] sm:$0xff]   ;;  %v5104_v16 = vld [vmem:[%s7039_s2 + $0x1a0] sm:$0xff]   ;;  %v5112_v36 = vld [vmem:[%s7039_s2 + $0x190] sm:$0xff]  }
  0xc9   : > { %4314 = vmatpush3.bf16.msra.mxu1 %v5080_v26  ;;  %4251 = vmatprep.subr.bf16.mxu0 %v5081_v27  ;;  %v641_v8 = vld [vmem:[%s5767_s6 + $0x188] sm:$0xff]  ;;  %v656_v17 = vld [vmem:[%s5767_s6 + $0x200] sm:$0xff]  ;;  %v5107_v26 = vld [vmem:[%s7039_s2 + $0x1d8] sm:$0xff]  }
  0xca   : > { %4315 = vmatprep.subr.bf16.mxu1 %v5082_v28  ;;  %v649_v11 = vld [vmem:[%s5767_s6 + $0x1c8] sm:$0xff]  ;;  %v664_v18 = vld [vmem:[%s5767_s6 + $0x240] sm:$0xff]  ;;  %v5108_v28 = vld [vmem:[%s7039_s2 + $0x198] sm:$0xff]  }
  0xcb   : > { %v3978_v12 = vcombine.high %v641_v8, %v649_v11  ;;  %v657_v19 = vld [vmem:[%s5767_s6 + $0x208] sm:$0xff]  ;;  %v3977_v24 = vcombine.low %v641_v8, %v649_v11  ;;  %v3992_v25 = vcombine.high %v656_v17, %v664_v18  ;;  %v3991_v37 = vcombine.low %v656_v17, %v664_v18  ;;  %v5118_v51 = vld [vmem:[%s7039_s2 + $0x100] sm:$0xff]   ;;  %v5121_v59 = vld [vmem:[%s7039_s2 + $0x278] sm:$0xff]  }
  0xcc   : > { %4252 = vmatpush3.bf16.msra.mxu0 %v5083_v29  ;;  %v665_v20 = vld [vmem:[%s5767_s6 + $0x248] sm:$0xff]  ;;  %v672_v29 = vld [vmem:[%s5767_s6 + $0x280] sm:$0xff]  ;;  %v5123_v61 = vld [vmem:[%s7039_s2 + $0x2f8] sm:$0xff]  }
  0xcd   : > { %4316 = vmatpush3.bf16.msra.mxu1 %v5084_v30  ;;  %4253 = vmatprep.subr.bf16.mxu0 %v5085_v31  ;;  %v3994_v27 = vcombine.high %v657_v19, %v665_v20  ;;  %v680_v30 = vld [vmem:[%s5767_s6 + $0x2c0] sm:$0xff]  ;;  %v5109_v31 = vld [vmem:[%s7039_s2 + $0x150] sm:$0xff]   ;;  %v603_v6 = vld [vmem:[%s5767_s6 + $0x58] sm:$0xff] }
  0xce   : > { %4317 = vmatprep.subr.bf16.mxu1 %v5086_v32  ;;  %v673_v32 = vld [vmem:[%s5767_s6 + $0x288] sm:$0xff]  ;;  %v4008_v39 = vcombine.high %v672_v29, %v680_v30  ;;  %v4007_v50 = vcombine.low %v672_v29, %v680_v30  ;;  %v610_v11 = vld [vmem:[%s5767_s6 + $0x90] sm:$0xff] }
  0xcf   : > { %v5114_v42 = vld [vmem:[%s7039_s2 + $0x108] sm:$0xff]   ;;  %v5124_v18 = vld [vmem:[%s7039_s2 + $0x2b8] sm:$0xff]  }
  0xd0   : > { %4254 = vmatpush3.bf16.msra.mxu0 %v5087_v33  ;;  %v681_v33 = vld [vmem:[%s5767_s6 + $0x2c8] sm:$0xff] }
  0xd1   : > { %4318 = vmatpush3.bf16.msra.mxu1 %v5088_v34  ;;  %4367 = vmatprep.subr.bf16.mxu0 %v5089_v43  ;;  %v5110_v34 = vld [vmem:[%s7039_s2 + $0x110] sm:$0xff]   ;;  %v4010_v40 = vcombine.high %v673_v32, %v681_v33  ;;  %v5115_v43 = vld [vmem:[%s7039_s2 + $0x1c8] sm:$0xff]  }
  0xd2   : > { %4431 = vmatprep.subr.bf16.mxu1 %v5091_v45  ;;  %v696_v45 = vld [vmem:[%s5767_s6 + $0x340] sm:$0xff]  ;;  %v689_v47 = vld [vmem:[%s5767_s6 + $0x308] sm:$0xff] }
  0xd3   : > { %2424 = vmatmul.mubr.bf16.vlgmr.msra.gmra.mxu0 %v3927_v38  ;;  %v3993_v38 = vcombine.low %v657_v19, %v665_v20  ;;  %v697_v48 = vld [vmem:[%s5767_s6 + $0x348] sm:$0xff] }
  0xd4   : > { %2521 = vmatmul.mubr.bf16.vlgmr.msra.gmra.mxu1 %v3929_v41  ;;  %4368 = vmatpush3.bf16.msra.mxu0 %v5090_v44  ;;  %v5113_v41 = vld [vmem:[%s7039_s2 + $0x148] sm:$0xff]   ;;  %v5125_v20 = vld [vmem:[%s7039_s2 + $0x270] sm:$0xff]  }
  0xd5   : > { %4432 = vmatpush3.bf16.msra.mxu1 %v5092_v46  ;;  %2431 = vmatprep.mubr.bf16.mxu0 %v3944_v49  ;;  %v688_v44 = vld [vmem:[%s5767_s6 + $0x300] sm:$0xff]  ;;  %v705_v60 = vld [vmem:[%s5767_s6 + $0x388] sm:$0xff] }
  0xd6   : > { %2528 = vmatprep.mubr.bf16.mxu1 %v3946_v52  ;;  %4369 = vmatprep.subr.bf16.mxu0 %v5093_v53  ;;  %v5116_v46 = vld [vmem:[%s7039_s2 + $0x188] sm:$0xff]   ;;  %v5117_v49 = vld [vmem:[%s7039_s2 + $0x140] sm:$0xff]   ;;  %v4009_v52 = vcombine.low %v673_v32, %v681_v33  ;;  %v4024_v53 = vcombine.high %v688_v44, %v696_v45 }
  0xd7   : > { %4433 = vmatprep.subr.bf16.mxu1 %v5095_v57  ;;  %v704_v57 = vld [vmem:[%s5767_s6 + $0x380] sm:$0xff]  ;;  %v713_v62 = vld [vmem:[%s5767_s6 + $0x3c8] sm:$0xff] }
  0xd8   : > { %4370 = vmatpush3.bf16.msra.mxu0 %v5094_v55  ;;  %v4026_v55 = vcombine.high %v689_v47, %v697_v48  ;;  %v4041_v8 = vcombine.low %v705_v60, %v713_v62  ;;  %v5129_v29 = vld [vmem:[%s7039_s2 + $0x268] sm:$0xff]  }
  0xd9   : > { %4434 = vmatpush3.bf16.msra.mxu1 %v5096_v58  ;;  %4371 = vmatprep.subr.bf16.mxu0 %v5097_v1  ;;  %v712_v58 = vld [vmem:[%s5767_s6 + $0x3c0] sm:$0xff] }
  0xda   : > { %4435 = vmatprep.subr.bf16.mxu1 %v5099_v3  ;;  %v4040_v1 = vcombine.high %v704_v57, %v712_v58  ;;  %v594_v3 = vld [vmem:[%s5767_s6 + $0x10] sm:$0xff]  ;;  %v4039_v7 = vcombine.low %v704_v57, %v712_v58  ;;  %v5131_v30 = vld [vmem:[%s7039_s2 + $0x2e8] sm:$0xff]   ;;  %v659_v57 = vld [vmem:[%s5767_s6 + $0x218] sm:$0xff] }
  0xdb   : > { %2432 = vmatmul.mubr.bf16.gmra.mxu0 %v3943_v54  ;;  %v5119_v54 = vld [vmem:[%s7039_s2 + $0x1c0] sm:$0xff]  }
  0xdc   : > { %2529 = vmatmul.mubr.bf16.gmra.mxu1 %v3945_v56  ;;  %2439 = vmatprep.mubr.bf16.mxu0 %v3960_v63  ;;  %v5120_v56 = vld [vmem:[%s7039_s2 + $0x180] sm:$0xff]   ;;  %v4023_v63 = vcombine.low %v688_v44, %v696_v45  ;;  %v5137_v45 = vld [vmem:[%s7039_s2 + $0x258] sm:$0xff]  }
  0xdd   : > { %2536 = vmatprep.mubr.bf16.mxu1 %v3962_v0  ;;  %4372 = vmatpush3.bf16.msra.mxu0 %v5098_v2  ;;  %v4025_v0 = vcombine.low %v689_v47, %v697_v48  ;;  %v4042_v2 = vcombine.high %v705_v60, %v713_v62  ;;  %v5136_v44 = vld [vmem:[%s7039_s2 + $0x2a0] sm:$0xff]   ;;  %v5139_v47 = vld [vmem:[%s7039_s2 + $0x2d8] sm:$0xff]   ;;  %v5144_v60 = vld [vmem:[%s7039_s2 + $0x290] sm:$0xff]  }
  0xde   : > { %4436 = vmatpush3.bf16.msra.mxu1 %v5100_v4  ;;  %4373 = vmatprep.subr.bf16.mxu0 %v5101_v13  ;;  %v602_v4 = vld [vmem:[%s5767_s6 + $0x50] sm:$0xff]  ;;  %v667_v58 = vld [vmem:[%s5767_s6 + $0x258] sm:$0xff] }
  0xdf   : > { %4437 = vmatprep.subr.bf16.mxu1 %v5103_v15  ;;  %v3931_v13 = vcombine.low %v594_v3, %v602_v4  ;;  %v611_v15 = vld [vmem:[%s5767_s6 + $0x98] sm:$0xff] }
  0xe1   : > { %4374 = vmatpush3.bf16.msra.mxu0 %v5102_v14  ;;  %v5122_v14 = vld [vmem:[%s7039_s2 + $0x238] sm:$0xff]  }
  0xe2   : > { %4438 = vmatpush3.bf16.msra.mxu1 %v5104_v16  ;;  %4375 = vmatprep.subr.bf16.mxu0 %v5105_v21  ;;  %v619_v16 = vld [vmem:[%s5767_s6 + $0xd8] sm:$0xff] }
  0xe3   : > { %2440 = vmatmul.mubr.bf16.gmra.mxu0 %v3959_v5  ;;  %4439 = vmatprep.subr.bf16.mxu1 %v5107_v26  ;;  %v595_v5 = vld [vmem:[%s5767_s6 + $0x18] sm:$0xff]  ;;  %v3950_v21 = vcombine.high %v611_v15, %v619_v16  ;;  %v634_v26 = vld [vmem:[%s5767_s6 + $0x150] sm:$0xff]  ;;  %v3949_v32 = vcombine.low %v611_v15, %v619_v16  ;;  %v3997_v16 = vcombine.low %v659_v57, %v667_v58 }
  0xe4   : > { %2537 = vmatmul.mubr.bf16.gmra.mxu1 %v3961_v9  ;;  %2447 = vmatprep.mubr.bf16.mxu0 %v3976_v10  ;;  %v3932_v9 = vcombine.high %v594_v3, %v602_v4  ;;  %v3934_v10 = vcombine.high %v595_v5, %v603_v6  ;;  %v3933_v17 = vcombine.low %v595_v5, %v603_v6  ;;  %v5146_v3 = vld [vmem:[%s7039_s2 + $0x208] sm:$0xff]   ;;  %v5149_v5 = vld [vmem:[%s7039_s2 + $0x240] sm:$0xff]   ;;  %v674_v6 = vld [vmem:[%s5767_s6 + $0x290] sm:$0xff] }
  0xe5   : > { %2544 = vmatprep.mubr.bf16.mxu1 %v3978_v12  ;;  %4376 = vmatpush3.bf16.msra.mxu0 %v5106_v23  ;;  %v618_v12 = vld [vmem:[%s5767_s6 + $0xd0] sm:$0xff]  ;;  %v5148_v4 = vld [vmem:[%s7039_s2 + $0x288] sm:$0xff]  }
  0xe6   : > { %4440 = vmatpush3.bf16.msra.mxu1 %v5108_v28  ;;  %4377 = vmatprep.subr.bf16.mxu0 %v5109_v31  ;;  %v3948_v19 = vcombine.high %v610_v11, %v618_v12  ;;  %v5127_v23 = vld [vmem:[%s7039_s2 + $0x2f0] sm:$0xff]   ;;  %v635_v28 = vld [vmem:[%s5767_s6 + $0x158] sm:$0xff]  ;;  %v3947_v31 = vcombine.low %v610_v11, %v618_v12 }
  0xe7   : > { %4441 = vmatprep.subr.bf16.mxu1 %v5111_v35  ;;  %v5130_v35 = vld [vmem:[%s7039_s2 + $0x228] sm:$0xff]   ;;  %v5150_v11 = vld [vmem:[%s7039_s2 + $0x200] sm:$0xff]   ;;  %v5155_v15 = vld [vmem:[%s7039_s2 + $0x3f8] sm:$0xff]  }
  0xe8   : > { %v5152_v12 = vld [vmem:[%s7039_s2 + $0x280] sm:$0xff]  }
  0xe9   : > { %4378 = vmatpush3.bf16.msra.mxu0 %v5110_v34 }
  0xea   : > { %4442 = vmatpush3.bf16.msra.mxu1 %v5112_v36  ;;  %4379 = vmatprep.subr.bf16.mxu0 %v5113_v41  ;;  %v5132_v36 = vld [vmem:[%s7039_s2 + $0x2a8] sm:$0xff]   ;;  %v643_v41 = vld [vmem:[%s5767_s6 + $0x198] sm:$0xff] }
  0xeb   : > { %2448 = vmatmul.mubr.bf16.gmra.mxu0 %v3975_v22  ;;  %4443 = vmatprep.subr.bf16.mxu1 %v5115_v43  ;;  %v5126_v22 = vld [vmem:[%s7039_s2 + $0x230] sm:$0xff]   ;;  %v5134_v43 = vld [vmem:[%s7039_s2 + $0x220] sm:$0xff]  }
  0xec   : > { %2545 = vmatmul.mubr.bf16.gmra.mxu1 %v3977_v24  ;;  %2455 = vmatprep.mubr.bf16.mxu0 %v3992_v25  ;;  %v5128_v24 = vld [vmem:[%s7039_s2 + $0x2b0] sm:$0xff]  }
  0xed   : > { %2552 = vmatprep.mubr.bf16.mxu1 %v3994_v27  ;;  %4380 = vmatpush3.bf16.msra.mxu0 %v5114_v42  ;;  %v626_v25 = vld [vmem:[%s5767_s6 + $0x110] sm:$0xff]  ;;  %v627_v27 = vld [vmem:[%s5767_s6 + $0x118] sm:$0xff] }
  0xee   : > { %4444 = vmatpush3.bf16.msra.mxu1 %v5116_v46  ;;  %4381 = vmatprep.subr.bf16.mxu0 %v5117_v49  ;;  %v3964_v33 = vcombine.high %v626_v25, %v634_v26  ;;  %v3966_v34 = vcombine.high %v627_v27, %v635_v28  ;;  %v651_v42 = vld [vmem:[%s5767_s6 + $0x1d8] sm:$0xff]  ;;  %v3963_v46 = vcombine.low %v626_v25, %v634_v26 }
  0xef   : > { %4445 = vmatprep.subr.bf16.mxu1 %v5119_v54  ;;  %v3965_v48 = vcombine.low %v627_v27, %v635_v28  ;;  %v658_v54 = vld [vmem:[%s5767_s6 + $0x210] sm:$0xff] }
  0xf0   : > { %v706_v27 = vld [vmem:[%s5767_s6 + $0x390] sm:$0xff] }
  0xf1   : > { %4382 = vmatpush3.bf16.msra.mxu0 %v5118_v51  ;;  %v3982_v51 = vcombine.high %v643_v41, %v651_v42  ;;  %v714_v28 = vld [vmem:[%s5767_s6 + $0x3d0] sm:$0xff] }
  0xf2   : > { %4446 = vmatpush3.bf16.msra.mxu1 %v5120_v56  ;;  %4495 = vmatprep.subr.bf16.mxu0 %v5121_v59  ;;  %v666_v56 = vld [vmem:[%s5767_s6 + $0x250] sm:$0xff] }
  0xf3   : > { %2456 = vmatmul.mubr.bf16.gmra.mxu0 %v3991_v37  ;;  %4559 = vmatprep.subr.bf16.mxu1 %v5123_v61  ;;  %v5133_v37 = vld [vmem:[%s7039_s2 + $0x260] sm:$0xff]   ;;  %v5142_v59 = vld [vmem:[%s7039_s2 + $0x210] sm:$0xff]   ;;  %v5145_v61 = vld [vmem:[%s7039_s2 + $0x248] sm:$0xff]  }
  0xf4   : > { %2553 = vmatmul.mubr.bf16.gmra.mxu1 %v3993_v38  ;;  %2463 = vmatprep.mubr.bf16.mxu0 %v4008_v39  ;;  %v642_v38 = vld [vmem:[%s5767_s6 + $0x190] sm:$0xff] }
  0xf5   : > { %2560 = vmatprep.mubr.bf16.mxu1 %v4010_v40  ;;  %v650_v39 = vld [vmem:[%s5767_s6 + $0x1d0] sm:$0xff]  ;;  %v5135_v40 = vld [vmem:[%s7039_s2 + $0x2e0] sm:$0xff]  }
  0xf6   : > { %v3980_v49 = vcombine.high %v642_v38, %v650_v39  ;;  %v3979_v62 = vcombine.low %v642_v38, %v650_v39  ;;  %v605_v38 = vld [vmem:[%s5767_s6 + $0x68] sm:$0xff]  ;;  %v4043_v39 = vcombine.low %v706_v27, %v714_v28 }
  0xfb   : > { %2464 = vmatmul.mubr.bf16.gmra.mxu0 %v4007_v50  ;;  %v5138_v50 = vld [vmem:[%s7039_s2 + $0x218] sm:$0xff]  }
  0xfc   : > { %2561 = vmatmul.mubr.bf16.gmra.mxu1 %v4009_v52  ;;  %2471 = vmatprep.mubr.bf16.mxu0 %v4024_v53  ;;  %v5140_v52 = vld [vmem:[%s7039_s2 + $0x298] sm:$0xff]   ;;  %v5141_v53 = vld [vmem:[%s7039_s2 + $0x250] sm:$0xff]  }
  0xfd   : > { %2568 = vmatprep.mubr.bf16.mxu1 %v4026_v55  ;;  %v5143_v55 = vld [vmem:[%s7039_s2 + $0x2d0] sm:$0xff]  }
 0x103   : > { %2472 = vmatmul.mubr.bf16.gmra.mxu0 %v4023_v63  ;;  %v5147_v63 = vld [vmem:[%s7039_s2 + $0x2c8] sm:$0xff]  }
 0x104   : > { %2569 = vmatmul.mubr.bf16.gmra.mxu1 %v4025_v0  ;;  %2479 = vmatprep.mubr.bf16.mxu0 %v4040_v1  ;;  %v3981_v0 = vcombine.low %v643_v41, %v651_v42  ;;  %v3996_v1 = vcombine.high %v658_v54, %v666_v56 }
 0x105   : > { %2576 = vmatprep.mubr.bf16.mxu1 %v4042_v2  ;;  %v3998_v2 = vcombine.high %v659_v57, %v667_v58  ;;  %v628_v57 = vld [vmem:[%s5767_s6 + $0x120] sm:$0xff] }
 0x106   : > { %v636_v58 = vld [vmem:[%s5767_s6 + $0x160] sm:$0xff] }
 0x10b   : > { %2480 = vmatmul.mubr.bf16.gmra.mxu0 %v4039_v7  ;;  %v682_v7 = vld [vmem:[%s5767_s6 + $0x2d0] sm:$0xff] }
 0x10c   : > { %2577 = vmatmul.mubr.bf16.gmra.mxu1 %v4041_v8  ;;  %2617 = vmatprep.mubr.bf16.mxu0 %v3932_v9  ;;  %v5151_v8 = vld [vmem:[%s7039_s2 + $0x2c0] sm:$0xff]  }
 0x10d   : > { %2714 = vmatprep.mubr.bf16.mxu1 %v3934_v10  ;;  %v675_v9 = vld [vmem:[%s5767_s6 + $0x298] sm:$0xff] }
 0x10e   : > { %v683_v10 = vld [vmem:[%s5767_s6 + $0x2d8] sm:$0xff] }
 0x113   : > { %2618 = vmatmul.mubr.bf16.vlgmr.msra.gmra.mxu0 %v3931_v13  ;;  %v5153_v13 = vld [vmem:[%s7039_s2 + $0x378] sm:$0xff]  }
 0x114   : > { %2715 = vmatmul.mubr.bf16.vlgmr.msra.gmra.mxu1 %v3933_v17  ;;  %4496 = vmatpush3.bf16.msra.mxu0 %v5122_v14  ;;  %v3995_v14 = vcombine.low %v658_v54, %v666_v56  ;;  %v4012_v17 = vcombine.high %v674_v6, %v682_v7  ;;  %v5159_v54 = vld [vmem:[%s7039_s2 + $0x3f0] sm:$0xff]  }
 0x115   : > { %4560 = vmatpush3.bf16.msra.mxu1 %v5124_v18  ;;  %2625 = vmatprep.mubr.bf16.mxu0 %v3948_v19  ;;  %v4014_v18 = vcombine.high %v675_v9, %v683_v10  ;;  %v690_v19 = vld [vmem:[%s5767_s6 + $0x310] sm:$0xff] }
 0x116   : > { %2722 = vmatprep.mubr.bf16.mxu1 %v3950_v21  ;;  %4497 = vmatprep.subr.bf16.mxu0 %v5125_v20  ;;  %v698_v20 = vld [vmem:[%s5767_s6 + $0x350] sm:$0xff]  ;;  %v691_v21 = vld [vmem:[%s5767_s6 + $0x318] sm:$0xff] }
 0x117   : > { %4561 = vmatprep.subr.bf16.mxu1 %v5127_v23  ;;  %v4011_v23 = vcombine.low %v674_v6, %v682_v7  ;;  %v4028_v25 = vcombine.high %v690_v19, %v698_v20  ;;  %v5160_v56 = vld [vmem:[%s7039_s2 + $0x3b0] sm:$0xff]   ;;  %v5167_v6 = vld [vmem:[%s7039_s2 + $0x3e0] sm:$0xff]  }
 0x118   : > { %4498 = vmatpush3.bf16.msra.mxu0 %v5126_v22  ;;  %v699_v22 = vld [vmem:[%s5767_s6 + $0x358] sm:$0xff]  ;;  %v644_v7 = vld [vmem:[%s5767_s6 + $0x1a0] sm:$0xff] }
 0x119   : > { %4562 = vmatpush3.bf16.msra.mxu1 %v5128_v24  ;;  %4499 = vmatprep.subr.bf16.mxu0 %v5129_v29  ;;  %v4013_v24 = vcombine.low %v675_v9, %v683_v10  ;;  %v4030_v26 = vcombine.high %v691_v21, %v699_v22  ;;  %v707_v29 = vld [vmem:[%s5767_s6 + $0x398] sm:$0xff]  ;;  %v645_v9 = vld [vmem:[%s5767_s6 + $0x1a8] sm:$0xff] }
 0x11a   : > { %4563 = vmatprep.subr.bf16.mxu1 %v5131_v30  ;;  %v715_v30 = vld [vmem:[%s5767_s6 + $0x3d8] sm:$0xff] }
 0x11b   : > { %2626 = vmatmul.mubr.bf16.gmra.mxu0 %v3947_v31  ;;  %v4027_v31 = vcombine.low %v690_v19, %v698_v20  ;;  %v5166_v10 = vld [vmem:[%s7039_s2 + $0x320] sm:$0xff]   ;;  %v5170_v19 = vld [vmem:[%s7039_s2 + $0x318] sm:$0xff]  }
 0x11c   : > { %2723 = vmatmul.mubr.bf16.gmra.mxu1 %v3949_v32  ;;  %2633 = vmatprep.mubr.bf16.mxu0 %v3964_v33  ;;  %v4029_v32 = vcombine.low %v691_v21, %v699_v22  ;;  %v4044_v33 = vcombine.high %v706_v27, %v714_v28  ;;  %v5172_v20 = vld [vmem:[%s7039_s2 + $0x398] sm:$0xff]   ;;  %v5173_v21 = vld [vmem:[%s7039_s2 + $0x350] sm:$0xff]  }
 0x11d   : > { %2730 = vmatprep.mubr.bf16.mxu1 %v3966_v34  ;;  %4500 = vmatpush3.bf16.msra.mxu0 %v5130_v35  ;;  %v4046_v34 = vcombine.high %v707_v29, %v715_v30  ;;  %v596_v35 = vld [vmem:[%s5767_s6 + $0x20] sm:$0xff]  ;;  %v5175_v22 = vld [vmem:[%s7039_s2 + $0x3d0] sm:$0xff]  }
 0x11e   : > { %4564 = vmatpush3.bf16.msra.mxu1 %v5132_v36  ;;  %4501 = vmatprep.subr.bf16.mxu0 %v5133_v37  ;;  %v604_v36 = vld [vmem:[%s5767_s6 + $0x60] sm:$0xff]  ;;  %v597_v37 = vld [vmem:[%s5767_s6 + $0x28] sm:$0xff] }
 0x11f   : > { %4565 = vmatprep.subr.bf16.mxu1 %v5135_v40  ;;  %v4045_v40 = vcombine.low %v707_v29, %v715_v30  ;;  %v3936_v41 = vcombine.high %v596_v35, %v604_v36  ;;  %v3938_v42 = vcombine.high %v597_v37, %v605_v38  ;;  %v669_v27 = vld [vmem:[%s5767_s6 + $0x268] sm:$0xff] }
 0x120   : > { %v5176_v28 = vld [vmem:[%s7039_s2 + $0x390] sm:$0xff]   ;;  %v5177_v29 = vld [vmem:[%s7039_s2 + $0x348] sm:$0xff]  }
 0x121   : > { %4502 = vmatpush3.bf16.msra.mxu0 %v5134_v43  ;;  %v612_v43 = vld [vmem:[%s5767_s6 + $0xa0] sm:$0xff] }
 0x122   : > { %4566 = vmatpush3.bf16.msra.mxu1 %v5136_v44  ;;  %4503 = vmatprep.subr.bf16.mxu0 %v5137_v45  ;;  %v620_v44 = vld [vmem:[%s5767_s6 + $0xe0] sm:$0xff]  ;;  %v3935_v45 = vcombine.low %v596_v35, %v604_v36 }
 0x123   : > { %2634 = vmatmul.mubr.bf16.gmra.mxu0 %v3963_v46  ;;  %4567 = vmatprep.subr.bf16.mxu1 %v5139_v47  ;;  %v613_v46 = vld [vmem:[%s5767_s6 + $0xa8] sm:$0xff] }
 0x124   : > { %2731 = vmatmul.mubr.bf16.gmra.mxu1 %v3965_v48  ;;  %2641 = vmatprep.mubr.bf16.mxu0 %v3980_v49  ;;  %v621_v47 = vld [vmem:[%s5767_s6 + $0xe8] sm:$0xff]  ;;  %v3937_v48 = vcombine.low %v597_v37, %v605_v38  ;;  %v5154_v49 = vld [vmem:[%s7039_s2 + $0x338] sm:$0xff]   ;;  %v5181_v37 = vld [vmem:[%s7039_s2 + $0x340] sm:$0xff]  }
 0x125   : > { %2738 = vmatprep.mubr.bf16.mxu1 %v3982_v51  ;;  %4504 = vmatpush3.bf16.msra.mxu0 %v5138_v50  ;;  %v5156_v50 = vld [vmem:[%s7039_s2 + $0x3b8] sm:$0xff]   ;;  %v3952_v51 = vcombine.high %v612_v43, %v620_v44  ;;  %v5178_v35 = vld [vmem:[%s7039_s2 + $0x308] sm:$0xff]   ;;  %v5183_v38 = vld [vmem:[%s7039_s2 + $0x3c0] sm:$0xff]  }
 0x126   : > { %4568 = vmatpush3.bf16.msra.mxu1 %v5140_v52  ;;  %4505 = vmatprep.subr.bf16.mxu0 %v5141_v53  ;;  %v3954_v52 = vcombine.high %v613_v46, %v621_v47  ;;  %v5157_v53 = vld [vmem:[%s7039_s2 + $0x370] sm:$0xff]   ;;  %v5180_v36 = vld [vmem:[%s7039_s2 + $0x388] sm:$0xff]  }
 0x127   : > { %4569 = vmatprep.subr.bf16.mxu1 %v5143_v55  ;;  %v5158_v55 = vld [vmem:[%s7039_s2 + $0x330] sm:$0xff]  }
 0x129   : > { %4506 = vmatpush3.bf16.msra.mxu0 %v5142_v59  ;;  %v5161_v59 = vld [vmem:[%s7039_s2 + $0x368] sm:$0xff]  }
 0x12a   : > { %4570 = vmatpush3.bf16.msra.mxu1 %v5144_v60  ;;  %4507 = vmatprep.subr.bf16.mxu0 %v5145_v61  ;;  %v629_v60 = vld [vmem:[%s5767_s6 + $0x128] sm:$0xff] }
 0x12b   : > { %2642 = vmatmul.mubr.bf16.gmra.mxu0 %v3979_v62  ;;  %4571 = vmatprep.subr.bf16.mxu1 %v5147_v63  ;;  %v637_v61 = vld [vmem:[%s5767_s6 + $0x168] sm:$0xff]  ;;  %v3951_v63 = vcombine.low %v612_v43, %v620_v44  ;;  %v5184_v44 = vld [vmem:[%s7039_s2 + $0x380] sm:$0xff]  }
 0x12c   : > { %2739 = vmatmul.mubr.bf16.gmra.mxu1 %v3981_v0  ;;  %2649 = vmatprep.mubr.bf16.mxu0 %v3996_v1  ;;  %v5163_v62 = vld [vmem:[%s7039_s2 + $0x3e8] sm:$0xff]   ;;  %v3953_v0 = vcombine.low %v613_v46, %v621_v47  ;;  %v3968_v1 = vcombine.high %v628_v57, %v636_v58 }
 0x12d   : > { %2746 = vmatprep.mubr.bf16.mxu1 %v3998_v2  ;;  %4508 = vmatpush3.bf16.msra.mxu0 %v5146_v3  ;;  %v3970_v2 = vcombine.high %v629_v60, %v637_v61  ;;  %v5162_v3 = vld [vmem:[%s7039_s2 + $0x328] sm:$0xff]  }
 0x12e   : > { %4572 = vmatpush3.bf16.msra.mxu1 %v5148_v4  ;;  %4509 = vmatprep.subr.bf16.mxu0 %v5149_v5  ;;  %v5164_v4 = vld [vmem:[%s7039_s2 + $0x3a8] sm:$0xff]   ;;  %v5165_v5 = vld [vmem:[%s7039_s2 + $0x360] sm:$0xff]  }
 0x12f   : > { %4573 = vmatprep.subr.bf16.mxu1 %v5151_v8  ;;  %v652_v8 = vld [vmem:[%s5767_s6 + $0x1e0] sm:$0xff]  ;;  %v685_v43 = vld [vmem:[%s5767_s6 + $0x2e8] sm:$0xff] }
 0x130   : > { %v3983_v30 = vcombine.low %v644_v7, %v652_v8 }
 0x131   : > { %4510 = vmatpush3.bf16.msra.mxu0 %v5150_v11  ;;  %v653_v11 = vld [vmem:[%s5767_s6 + $0x1e8] sm:$0xff] }
 0x132   : > { %4574 = vmatpush3.bf16.msra.mxu1 %v5152_v12  ;;  %4623 = vmatprep.subr.bf16.mxu0 %v5153_v13  ;;  %v5168_v12 = vld [vmem:[%s7039_s2 + $0x3a0] sm:$0xff]   ;;  %v5169_v13 = vld [vmem:[%s7039_s2 + $0x358] sm:$0xff]  }
 0x133   : > { %2650 = vmatmul.mubr.bf16.gmra.mxu0 %v3995_v14  ;;  %4687 = vmatprep.subr.bf16.mxu1 %v5155_v15  ;;  %v3967_v14 = vcombine.low %v628_v57, %v636_v58  ;;  %v5171_v15 = vld [vmem:[%s7039_s2 + $0x3d8] sm:$0xff]   ;;  %v708_v57 = vld [vmem:[%s5767_s6 + $0x3a0] sm:$0xff] }
 0x134   : > { %2747 = vmatmul.mubr.bf16.gmra.mxu1 %v3997_v16  ;;  %2657 = vmatprep.mubr.bf16.mxu0 %v4012_v17  ;;  %v3969_v16 = vcombine.low %v629_v60, %v637_v61  ;;  %v3984_v17 = vcombine.high %v644_v7, %v652_v8  ;;  %v716_v58 = vld [vmem:[%s5767_s6 + $0x3e0] sm:$0xff]  ;;  %v717_v60 = vld [vmem:[%s5767_s6 + $0x3e8] sm:$0xff] }
 0x135   : > { %2754 = vmatprep.mubr.bf16.mxu1 %v4014_v18  ;;  %v3986_v18 = vcombine.high %v645_v9, %v653_v11 }
 0x13b   : > { %2658 = vmatmul.mubr.bf16.gmra.mxu0 %v4011_v23  ;;  %v660_v23 = vld [vmem:[%s5767_s6 + $0x220] sm:$0xff] }
 0x13c   : > { %2755 = vmatmul.mubr.bf16.gmra.mxu1 %v4013_v24  ;;  %2665 = vmatprep.mubr.bf16.mxu0 %v4028_v25  ;;  %v668_v24 = vld [vmem:[%s5767_s6 + $0x260] sm:$0xff]  ;;  %v661_v25 = vld [vmem:[%s5767_s6 + $0x228] sm:$0xff] }
 0x13d   : > { %2762 = vmatprep.mubr.bf16.mxu1 %v4030_v26  ;;  %v5174_v26 = vld [vmem:[%s7039_s2 + $0x310] sm:$0xff]   ;;  %v4001_v46 = vcombine.low %v661_v25, %v669_v27 }
 0x143   : > { %2666 = vmatmul.mubr.bf16.gmra.mxu0 %v4027_v31  ;;  %v5179_v31 = vld [vmem:[%s7039_s2 + $0x3c8] sm:$0xff]  }
 0x144   : > { %2763 = vmatmul.mubr.bf16.gmra.mxu1 %v4029_v32  ;;  %2673 = vmatprep.mubr.bf16.mxu0 %v4044_v33  ;;  %v3985_v32 = vcombine.low %v645_v9, %v653_v11  ;;  %v4000_v33 = vcombine.high %v660_v23, %v668_v24  ;;  %v614_v9 = vld [vmem:[%s5767_s6 + $0xb0] sm:$0xff]  ;;  %v615_v11 = vld [vmem:[%s5767_s6 + $0xb8] sm:$0xff] }
 0x145   : > { %2770 = vmatprep.mubr.bf16.mxu1 %v4046_v34  ;;  %v4002_v34 = vcombine.high %v661_v25, %v669_v27  ;;  %v631_v25 = vld [vmem:[%s5767_s6 + $0x138] sm:$0xff] }
 0x14b   : > { %2674 = vmatmul.mubr.bf16.gmra.mxu0 %v4043_v39  ;;  %v676_v39 = vld [vmem:[%s5767_s6 + $0x2a0] sm:$0xff] }
 0x14c   : > { %2771 = vmatmul.mubr.bf16.gmra.mxu1 %v4045_v40  ;;  %2811 = vmatprep.mubr.bf16.mxu0 %v3936_v41  ;;  %v684_v40 = vld [vmem:[%s5767_s6 + $0x2e0] sm:$0xff] }
 0x14d   : > { %2908 = vmatprep.mubr.bf16.mxu1 %v3938_v42  ;;  %v5182_v41 = vld [vmem:[%s7039_s2 + $0x300] sm:$0xff]   ;;  %v677_v42 = vld [vmem:[%s5767_s6 + $0x2a8] sm:$0xff]  ;;  %v4016_v47 = vcombine.high %v676_v39, %v684_v40 }
 0x153   : > { %2812 = vmatmul.mubr.bf16.vlgmr.msra.gmra.mxu0 %v3935_v45  ;;  %v3999_v45 = vcombine.low %v660_v23, %v668_v24 }
 0x154   : > { %2909 = vmatmul.mubr.bf16.vlgmr.msra.gmra.mxu1 %v3937_v48  ;;  %4624 = vmatpush3.bf16.msra.mxu0 %v5154_v49  ;;  %v4018_v48 = vcombine.high %v677_v42, %v685_v43  ;;  %v692_v49 = vld [vmem:[%s5767_s6 + $0x320] sm:$0xff] }
 0x155   : > { %4688 = vmatpush3.bf16.msra.mxu1 %v5156_v50  ;;  %2819 = vmatprep.mubr.bf16.mxu0 %v3952_v51  ;;  %v700_v50 = vld [vmem:[%s5767_s6 + $0x360] sm:$0xff]  ;;  %v693_v51 = vld [vmem:[%s5767_s6 + $0x328] sm:$0xff] }
 0x156   : > { %2916 = vmatprep.mubr.bf16.mxu1 %v3954_v52  ;;  %4625 = vmatprep.subr.bf16.mxu0 %v5157_v53  ;;  %v701_v52 = vld [vmem:[%s5767_s6 + $0x368] sm:$0xff]  ;;  %v4015_v53 = vcombine.low %v676_v39, %v684_v40  ;;  %v4031_v61 = vcombine.low %v692_v49, %v700_v50 }
 0x157   : > { %4689 = vmatprep.subr.bf16.mxu1 %v5159_v54  ;;  %v4017_v54 = vcombine.low %v677_v42, %v685_v43 }
 0x158   : > { %4626 = vmatpush3.bf16.msra.mxu0 %v5158_v55  ;;  %v4032_v55 = vcombine.high %v692_v49, %v700_v50  ;;  %v647_v49 = vld [vmem:[%s5767_s6 + $0x1b8] sm:$0xff] }
 0x159   : > { %4690 = vmatpush3.bf16.msra.mxu1 %v5160_v56  ;;  %4627 = vmatprep.subr.bf16.mxu0 %v5161_v59  ;;  %v4034_v56 = vcombine.high %v693_v51, %v701_v52  ;;  %v709_v59 = vld [vmem:[%s5767_s6 + $0x3a8] sm:$0xff]  ;;  %v655_v50 = vld [vmem:[%s5767_s6 + $0x1f8] sm:$0xff] }
 0x15a   : > { %4691 = vmatprep.subr.bf16.mxu1 %v5163_v62  ;;  %v4033_v62 = vcombine.low %v693_v51, %v701_v52 }
 0x15b   : > { %2820 = vmatmul.mubr.bf16.gmra.mxu0 %v3951_v63  ;;  %v4048_v63 = vcombine.high %v708_v57, %v716_v58 }
 0x15c   : > { %2917 = vmatmul.mubr.bf16.gmra.mxu1 %v3953_v0  ;;  %2827 = vmatprep.mubr.bf16.mxu0 %v3968_v1  ;;  %v4050_v0 = vcombine.high %v709_v59, %v717_v60  ;;  %v598_v1 = vld [vmem:[%s5767_s6 + $0x30] sm:$0xff] }
 0x15d   : > { %2924 = vmatprep.mubr.bf16.mxu1 %v3970_v2  ;;  %4628 = vmatpush3.bf16.msra.mxu0 %v5162_v3  ;;  %v606_v2 = vld [vmem:[%s5767_s6 + $0x70] sm:$0xff]  ;;  %v599_v3 = vld [vmem:[%s5767_s6 + $0x38] sm:$0xff] }
 0x15e   : > { %4692 = vmatpush3.bf16.msra.mxu1 %v5164_v4  ;;  %4629 = vmatprep.subr.bf16.mxu0 %v5165_v5  ;;  %v607_v4 = vld [vmem:[%s5767_s6 + $0x78] sm:$0xff]  ;;  %v4047_v5 = vcombine.low %v708_v57, %v716_v58  ;;  %v3940_v7 = vcombine.high %v598_v1, %v606_v2 }
 0x15f   : > { %4693 = vmatprep.subr.bf16.mxu1 %v5167_v6  ;;  %v4049_v6 = vcombine.low %v709_v59, %v717_v60  ;;  %v3942_v8 = vcombine.high %v599_v3, %v607_v4  ;;  %v3990_v59 = vcombine.high %v647_v49, %v655_v50 }
 0x161   : > { %4630 = vmatpush3.bf16.msra.mxu0 %v5166_v10  ;;  %v622_v10 = vld [vmem:[%s5767_s6 + $0xf0] sm:$0xff] }
 0x162   : > { %4694 = vmatpush3.bf16.msra.mxu1 %v5168_v12  ;;  %4631 = vmatprep.subr.bf16.mxu0 %v5169_v13  ;;  %v623_v12 = vld [vmem:[%s5767_s6 + $0xf8] sm:$0xff]  ;;  %v3939_v13 = vcombine.low %v598_v1, %v606_v2 }
 0x163   : > { %2828 = vmatmul.mubr.bf16.gmra.mxu0 %v3967_v14  ;;  %4695 = vmatprep.subr.bf16.mxu1 %v5171_v15  ;;  %v3941_v14 = vcombine.low %v599_v3, %v607_v4  ;;  %v3956_v15 = vcombine.high %v614_v9, %v622_v10  ;;  %v662_v4 = vld [vmem:[%s5767_s6 + $0x230] sm:$0xff] }
 0x164   : > { %2925 = vmatmul.mubr.bf16.gmra.mxu1 %v3969_v16  ;;  %2835 = vmatprep.mubr.bf16.mxu0 %v3984_v17  ;;  %v3958_v16 = vcombine.high %v615_v11, %v623_v12 }
 0x165   : > { %2932 = vmatprep.mubr.bf16.mxu1 %v3986_v18  ;;  %4632 = vmatpush3.bf16.msra.mxu0 %v5170_v19  ;;  %v6296_v19 = vld [vmem:[#allocation8] ss:$0 sm:$0xff] }
 0x166   : > { %4696 = vmatpush3.bf16.msra.mxu1 %v5172_v20  ;;  %4633 = vmatprep.subr.bf16.mxu0 %v5173_v21  ;;  %v630_v21 = vld [vmem:[%s5767_s6 + $0x130] sm:$0xff] }
 0x167   : > { %4697 = vmatprep.subr.bf16.mxu1 %v5175_v22  ;;  %v638_v22 = vld [vmem:[%s5767_s6 + $0x170] sm:$0xff] }
 0x169   : > { %4634 = vmatpush3.bf16.msra.mxu0 %v5174_v26  ;;  %v639_v26 = vld [vmem:[%s5767_s6 + $0x178] sm:$0xff] }
 0x16a   : > { %4698 = vmatpush3.bf16.msra.mxu1 %v5176_v28  ;;  %4635 = vmatprep.subr.bf16.mxu0 %v5177_v29  ;;  %v3955_v29 = vcombine.low %v614_v9, %v622_v10  ;;  %v663_v9 = vld [vmem:[%s5767_s6 + $0x238] sm:$0xff] }
 0x16b   : > { %2836 = vmatmul.mubr.bf16.gmra.mxu0 %v3983_v30  ;;  %4699 = vmatprep.subr.bf16.mxu1 %v5179_v31  ;;  %v671_v10 = vld [vmem:[%s5767_s6 + $0x278] sm:$0xff] }
 0x16c   : > { %2933 = vmatmul.mubr.bf16.gmra.mxu1 %v3985_v32  ;;  %2843 = vmatprep.mubr.bf16.mxu0 %v4000_v33  ;;  %v3957_v32 = vcombine.low %v615_v11, %v623_v12  ;;  %v3972_v33 = vcombine.high %v630_v21, %v638_v22 }
 0x16d   : > { %2940 = vmatprep.mubr.bf16.mxu1 %v4002_v34  ;;  %4636 = vmatpush3.bf16.msra.mxu0 %v5178_v35  ;;  %v3974_v35 = vcombine.high %v631_v25, %v639_v26 }
 0x16e   : > { %4700 = vmatpush3.bf16.msra.mxu1 %v5180_v36  ;;  %4637 = vmatprep.subr.bf16.mxu0 %v5181_v37 }
 0x16f   : > { %4701 = vmatprep.subr.bf16.mxu1 %v5183_v38 }
 0x171   : > { %4638 = vmatpush3.bf16.msra.mxu0 %v5182_v41 }
 0x172   : > { %4702 = vmatpush3.bf16.msra.mxu1 %v5184_v44  ;;  %v646_v44 = vld [vmem:[%s5767_s6 + $0x1b0] sm:$0xff] }
 0x173   : > { %2844 = vmatmul.mubr.bf16.gmra.mxu0 %v3999_v45  ;;  %v654_v45 = vld [vmem:[%s5767_s6 + $0x1f0] sm:$0xff] }
 0x174   : > { %2941 = vmatmul.mubr.bf16.gmra.mxu1 %v4001_v46  ;;  %2851 = vmatprep.mubr.bf16.mxu0 %v4016_v47  ;;  %v3988_v57 = vcombine.high %v646_v44, %v654_v45 }
 0x175   : > { %2948 = vmatprep.mubr.bf16.mxu1 %v4018_v48 }
 0x17b   : > { %2852 = vmatmul.mubr.bf16.gmra.mxu0 %v4015_v53  ;;  %v3971_v53 = vcombine.low %v630_v21, %v638_v22 }
 0x17c   : > { %2949 = vmatmul.mubr.bf16.gmra.mxu1 %v4017_v54  ;;  %2859 = vmatprep.mubr.bf16.mxu0 %v4032_v55 }
 0x17d   : > { %2956 = vmatprep.mubr.bf16.mxu1 %v4034_v56  ;;  %v3973_v56 = vcombine.low %v631_v25, %v639_v26 }
 0x183   : > { %2860 = vmatmul.mubr.bf16.gmra.mxu0 %v4031_v61 }
 0x184   : > { %2957 = vmatmul.mubr.bf16.gmra.mxu1 %v4033_v62  ;;  %2867 = vmatprep.mubr.bf16.mxu0 %v4048_v63 }
 0x185   : > { %2964 = vmatprep.mubr.bf16.mxu1 %v4050_v0 }
 0x18b   : > { %2868 = vmatmul.mubr.bf16.gmra.mxu0 %v4047_v5  ;;  %v670_v5 = vld [vmem:[%s5767_s6 + $0x270] sm:$0xff] }
 0x18c   : > { %2965 = vmatmul.mubr.bf16.gmra.mxu1 %v4049_v6  ;;  %3005 = vmatprep.mubr.bf16.mxu0 %v3940_v7 }
 0x18d   : > { %3102 = vmatprep.mubr.bf16.mxu1 %v3942_v8 }
 0x193   : > { %v4255_v17 = vpop.f32.mrf.mxu0  ;;  %3006 = vmatmul.mubr.bf16.vlgmr.msra.gmra.mxu0 %v3939_v13  ;;  %v3987_v13 = vcombine.low %v646_v44, %v654_v45 }
 0x194   : > { %v4319_v18 = vpop.f32.mrf.mxu1  ;;  %3103 = vmatmul.mubr.bf16.vlgmr.msra.gmra.mxu1 %v3941_v14  ;;  %3013 = vmatprep.mubr.bf16.mxu0 %v3956_v15 }
 0x195   : > { %v4256_v20 = vpop.f32.mrf.mxu0  ;;  %3110 = vmatprep.mubr.bf16.mxu1 %v3958_v16  ;;  %v3989_v16 = vcombine.low %v647_v49, %v655_v50 }
 0x196   : > { %v4257_v23 = vadd.f32 %v4256_v20, %v4255_v17  ;;  %v4320_v24 = vpop.f32.mrf.mxu1  ;;  %v4004_v17 = vcombine.high %v662_v4, %v670_v5  ;;  %v4006_v20 = vcombine.high %v663_v9, %v671_v10 }
 0x197   : > { %v4321_v27 = vadd.f32 %v4320_v24, %v4319_v18  ;;  %v4258_v28 = vpop.f32.mrf.mxu0 }
 0x198   : > { %v2426_v30 = vadd.f32 %v4257_v23, %v6296_v19  ;;  %v4322_v31 = vpop.f32.mrf.mxu1 }
 0x199   : > { %v4259_v34 = vpop.f32.mrf.mxu0 }
 0x19a   : > { %v6303_v36 = vadd.f32 %v4321_v27, %v2426_v30  ;;  %v4260_v37 = vadd.f32 %v4259_v34, %v4258_v28  ;;  %v4323_v38 = vpop.f32.mrf.mxu1  ;;  %v686_v30 = vld [vmem:[%s5767_s6 + $0x2f0] sm:$0xff]  ;;  %v679_v34 = vld [vmem:[%s5767_s6 + $0x2b8] sm:$0xff] }
 0x19b   : > { %v4324_v39 = vadd.f32 %v4323_v38, %v4322_v31  ;;  %v4261_v40 = vpop.f32.mrf.mxu0  ;;  %3014 = vmatmul.mubr.bf16.gmra.mxu0 %v3955_v29  ;;  %v678_v29 = vld [vmem:[%s5767_s6 + $0x2b0] sm:$0xff] }
 0x19c   : > { %v2429_v41 = vadd.f32 %v4260_v37, %v6296_v19  ;;  %v4325_v42 = vpop.f32.mrf.mxu1  ;;  %3111 = vmatmul.mubr.bf16.gmra.mxu1 %v3957_v32  ;;  %3021 = vmatprep.mubr.bf16.mxu0 %v3972_v33 }
 0x19d   : > { %v4262_v43 = vpop.f32.mrf.mxu0  ;;  %3118 = vmatprep.mubr.bf16.mxu1 %v3974_v35  ;;  %v687_v35 = vld [vmem:[%s5767_s6 + $0x2f8] sm:$0xff] }
 0x19e   : > { %v6308_v46 = vadd.f32 %v4324_v39, %v2429_v41  ;;  %v4263_v47 = vadd.f32 %v4262_v43, %v4261_v40  ;;  %v4326_v48 = vpop.f32.mrf.mxu1  ;;  %v4003_v39 = vcombine.low %v662_v4, %v670_v5  ;;  %v4020_v43 = vcombine.high %v678_v29, %v686_v30 }
 0x19f   : > { %v4327_v51 = vadd.f32 %v4326_v48, %v4325_v42  ;;  %v4264_v52 = vpop.f32.mrf.mxu0  ;;  %v4005_v42 = vcombine.low %v663_v9, %v671_v10  ;;  %v4022_v45 = vcombine.high %v679_v34, %v687_v35  ;;  %v4021_v4 = vcombine.low %v679_v34, %v687_v35 }
 0x1a0   : > { %v2434_v54 = vadd.f32 %v4263_v47, %v6296_v19  ;;  %v4328_v55 = vpop.f32.mrf.mxu1 }
 0x1a1   : > { %v4265_v58 = vpop.f32.mrf.mxu0 }
 0x1a2   : > { %v6313_v60 = vadd.f32 %v4327_v51, %v2434_v54  ;;  %v4266_v61 = vadd.f32 %v4265_v58, %v4264_v52  ;;  %v4329_v62 = vpop.f32.mrf.mxu1 }
 0x1a3   : > { %v4330_v63 = vadd.f32 %v4329_v62, %v4328_v55  ;;  %v4267_v0 = vpop.f32.mrf.mxu0  ;;  %3022 = vmatmul.mubr.bf16.gmra.mxu0 %v3971_v53  ;;  %v694_v55 = vld [vmem:[%s5767_s6 + $0x330] sm:$0xff]  ;;  %v703_v62 = vld [vmem:[%s5767_s6 + $0x378] sm:$0xff] }
 0x1a4   : > { %v2437_v1 = vadd.f32 %v4266_v61, %v6296_v19  ;;  %v4331_v2 = vpop.f32.mrf.mxu1  ;;  %3119 = vmatmul.mubr.bf16.gmra.mxu1 %v3973_v56  ;;  %3029 = vmatprep.mubr.bf16.mxu0 %v3988_v57  ;;  %v702_v56 = vld [vmem:[%s5767_s6 + $0x370] sm:$0xff]  ;;  %v695_v61 = vld [vmem:[%s5767_s6 + $0x338] sm:$0xff] }
 0x1a5   : > { %v4268_v3 = vpop.f32.mrf.mxu0  ;;  %3126 = vmatprep.mubr.bf16.mxu1 %v3990_v59  ;;  %v4036_v5 = vcombine.high %v694_v55, %v702_v56 }
 0x1a6   : > { %v6318_v6 = vadd.f32 %v4330_v63, %v2437_v1  ;;  %v4269_v7 = vadd.f32 %v4268_v3, %v4267_v0  ;;  %v4332_v8 = vpop.f32.mrf.mxu1  ;;  %v4019_v0 = vcombine.low %v678_v29, %v686_v30 }
 0x1a7   : > { %v4333_v11 = vadd.f32 %v4332_v8, %v4331_v2  ;;  %v4270_v12 = vpop.f32.mrf.mxu0  ;;  %v4038_v8 = vcombine.high %v695_v61, %v703_v62 }
 0x1a8   : > { %v2442_v14 = vadd.f32 %v4269_v7, %v6296_v19  ;;  %v4334_v15 = vpop.f32.mrf.mxu1 }
 0x1a9   : > { %v4271_v18 = vpop.f32.mrf.mxu0 }
 0x1aa   : > { %v6323_v21 = vadd.f32 %v4333_v11, %v2442_v14  ;;  %v4272_v22 = vadd.f32 %v4271_v18, %v4270_v12  ;;  %v4335_v23 = vpop.f32.mrf.mxu1  ;;  %v718_v18 = vld [vmem:[%s5767_s6 + $0x3f0] sm:$0xff] }
 0x1ab   : > { %v4336_v24 = vadd.f32 %v4335_v23, %v4334_v15  ;;  %v4273_v25 = vpop.f32.mrf.mxu0  ;;  %3030 = vmatmul.mubr.bf16.gmra.mxu0 %v3987_v13 }
 0x1ac   : > { %v2445_v26 = vadd.f32 %v4272_v22, %v6296_v19  ;;  %v4337_v27 = vpop.f32.mrf.mxu1  ;;  %3127 = vmatmul.mubr.bf16.gmra.mxu1 %v3989_v16  ;;  %3037 = vmatprep.mubr.bf16.mxu0 %v4004_v17  ;;  %v710_v17 = vld [vmem:[%s5767_s6 + $0x3b0] sm:$0xff] }
 0x1ad   : > { %v4274_v28 = vpop.f32.mrf.mxu0  ;;  %3134 = vmatprep.mubr.bf16.mxu1 %v4006_v20 }
 0x1ae   : > { %v6328_v31 = vadd.f32 %v4336_v24, %v2445_v26  ;;  %v4275_v32 = vadd.f32 %v4274_v28, %v4273_v25  ;;  %v4338_v33 = vpop.f32.mrf.mxu1  ;;  %v711_v24 = vld [vmem:[%s5767_s6 + $0x3b8] sm:$0xff]  ;;  %v4035_v28 = vcombine.low %v694_v55, %v702_v56 }
 0x1af   : > { %v4339_v37 = vadd.f32 %v4338_v33, %v4337_v27  ;;  %v4276_v38 = vpop.f32.mrf.mxu0  ;;  %v719_v25 = vld [vmem:[%s5767_s6 + $0x3f8] sm:$0xff]  ;;  %v4052_v33 = vcombine.high %v710_v17, %v718_v18  ;;  %s3924_s6 = sshll.u32 %s5471_s21, 1  ;;  %s5497_s21 = smov [#allocation12]  }
 0x1b0   : > { %v2450_v40 = vadd.f32 %v4275_v32, %v6296_v19  ;;  %v4340_v41 = vpop.f32.mrf.mxu1  ;;  %v4037_v32 = vcombine.low %v695_v61, %v703_v62  ;;  %v4054_v35 = vcombine.high %v711_v24, %v719_v25  ;;  %v4053_v56 = vcombine.low %v711_v24, %v719_v25  ;;  %s536_s15 = sadd.s32 %s5467_s7, %s3924_s6  ;;  %s7171_s7 = sld [smem:[#allocation26_spill]] }
 0x1b1   : > { %v4277_v44 = vpop.f32.mrf.mxu0  ;;  %s3925_s26 = sshll.u32 %s536_s15, 7  ;;  %s5355_s28 = sshll.u32 %s5497_s21, 4  ;;  %s5356_s28 = int_to_ptr.vmem [resolvable:$false] %s5355_s28 }
 0x1b2   : > { %v6333_v47 = vadd.f32 %v4339_v37, %v2450_v40  ;;  %v4278_v48 = vadd.f32 %v4277_v44, %v4276_v38  ;;  %v4341_v49 = vpop.f32.mrf.mxu1  ;;  %v3238_v40 = vld [vmem:[%s7103_s18 + $0x38] sm:$0xff]  ;;  %s5357_s29 = scalar_lea.vmem %s5356_s28, 32 }
 0x1b3   : > { %v4342_v50 = vadd.f32 %v4341_v49, %v4340_v41  ;;  %v4279_v51 = vpop.f32.mrf.mxu0  ;;  %3038 = vmatmul.mubr.bf16.gmra.mxu0 %v4003_v39  ;;  %4809 = vmatprep.subr.mxu0 %v3238_v40 }
 0x1b4   : > { %v2453_v52 = vadd.f32 %v4278_v48, %v6296_v19  ;;  %v4343_v53 = vpop.f32.mrf.mxu1  ;;  %3135 = vmatmul.mubr.bf16.gmra.mxu1 %v4005_v42  ;;  %3045 = vmatprep.mubr.bf16.mxu0 %v4020_v43 }
 0x1b5   : > { %v4280_v54 = vpop.f32.mrf.mxu0  ;;  %3142 = vmatprep.mubr.bf16.mxu1 %v4022_v45  ;;  %4810 = vmatpush3.msra.mxu0 %v3238_v40 }
 0x1b6   : > { %v6338_v57 = vadd.f32 %v4342_v50, %v2453_v52  ;;  %v4281_v58 = vadd.f32 %v4280_v54, %v4279_v51  ;;  %v4344_v59 = vpop.f32.mrf.mxu1  ;;  %p7174_p0 = scmp.ne.s32.totalorder %s7171_s7, 0 }
 0x1b7   : > { %v4282_v63 = vpop.f32.mrf.mxu0  ;;  %v4345_v2 = vadd.f32 %v4344_v59, %v4343_v53  ;;  %v4051_v53 = vcombine.low %v710_v17, %v718_v18  ;;  %v3236_v18 = vld [vmem:[%s7104_s4 + $0x28] sm:$0xff] }
 0x1b8   : > { %v2458_v1 = vadd.f32 %v4281_v58, %v6296_v19  ;;  %v4346_v3 = vpop.f32.mrf.mxu1 }
 0x1b9   : > { %v4283_v7 = vpop.f32.mrf.mxu0 }
 0x1ba   : > { %v6343_v9 = vadd.f32 %v4345_v2, %v2458_v1  ;;  %v4284_v10 = vadd.f32 %v4283_v7, %v4282_v63  ;;  %v4347_v11 = vpop.f32.mrf.mxu1  ;;  %v3237_v63 = vld [vmem:[%s7104_s4 + $0x30] sm:$0xff] }
 0x1bb   : > { %v4348_v12 = vadd.f32 %v4347_v11, %v4346_v3  ;;  %v4285_v13 = vpop.f32.mrf.mxu0  ;;  %3046 = vmatmul.mubr.bf16.gmra.mxu0 %v4019_v0  ;;  %4811 = vmatprep.subr.mxu0 %v3237_v63 }
 0x1bc   : > { %v2461_v14 = vadd.f32 %v4284_v10, %v6296_v19  ;;  %v4349_v15 = vpop.f32.mrf.mxu1  ;;  %3143 = vmatmul.mubr.bf16.gmra.mxu1 %v4021_v4  ;;  %3053 = vmatprep.mubr.bf16.mxu0 %v4036_v5 }
 0x1bd   : > { %v4286_v16 = vpop.f32.mrf.mxu0  ;;  %3150 = vmatprep.mubr.bf16.mxu1 %v4038_v8  ;;  %4812 = vmatpush3.msra.mxu0 %v3237_v63 }
 0x1be   : > { %v6348_v20 = vadd.f32 %v4348_v12, %v2461_v14  ;;  %v4287_v22 = vadd.f32 %v4286_v16, %v4285_v13  ;;  %v4350_v23 = vpop.f32.mrf.mxu1  ;;  %4813 = vmatprep.subr.mxu0 %v3236_v18 }
 0x1bf   : > { %v4351_v26 = vadd.f32 %v4350_v23, %v4349_v15  ;;  %v4288_v27 = vpop.f32.mrf.mxu0  ;;  %4814 = vmatpush3.msra.mxu0 %v3236_v18 }
 0x1c0   : > { %v2466_v29 = vadd.f32 %v4287_v22, %v6296_v19  ;;  %v4352_v30 = vpop.f32.mrf.mxu1 }
 0x1c1   : > { %v4289_v34 = vpop.f32.mrf.mxu0 }
 0x1c2   : > { %v6353_v37 = vadd.f32 %v4351_v26, %v2466_v29  ;;  %v4290_v38 = vadd.f32 %v4289_v34, %v4288_v27  ;;  %v4353_v39 = vpop.f32.mrf.mxu1 }
 0x1c3   : > { %v4354_v41 = vadd.f32 %v4353_v39, %v4352_v30  ;;  %v4291_v42 = vpop.f32.mrf.mxu0  ;;  %3054 = vmatmul.mubr.bf16.gmra.mxu0 %v4035_v28 }
 0x1c4   : > { %v2469_v43 = vadd.f32 %v4290_v38, %v6296_v19  ;;  %v4355_v44 = vpop.f32.mrf.mxu1  ;;  %3151 = vmatmul.mubr.bf16.gmra.mxu1 %v4037_v32  ;;  %3061 = vmatprep.mubr.bf16.mxu0 %v4052_v33  ;;  %v3235_v38 = vld [vmem:[%s7104_s4 + $0x20] sm:$0xff] }
 0x1c5   : > { %v4292_v45 = vpop.f32.mrf.mxu0  ;;  %3158 = vmatprep.mubr.bf16.mxu1 %v4054_v35  ;;  %4815 = vmatprep.subr.mxu0 %v3235_v38 }
 0x1c6   : > { %v6359_v48 = vadd.f32 %v4354_v41, %v2469_v43  ;;  %v4293_v49 = vadd.f32 %v4292_v45, %v4291_v42  ;;  %v4356_v50 = vpop.f32.mrf.mxu1  ;;  %4816 = vmatpush3.msra.mxu0 %v3235_v38  ;;  %v3234_v43 = vld [vmem:[%s7104_s4 + $0x18] sm:$0xff] }
 0x1c7   : > { %v4357_v51 = vadd.f32 %v4356_v50, %v4355_v44  ;;  %v4294_v52 = vpop.f32.mrf.mxu0  ;;  %4817 = vmatprep.subr.mxu0 %v3234_v43 }
 0x1c8   : > { %v2474_v54 = vadd.f32 %v4293_v49, %v6296_v19  ;;  %v4358_v55 = vpop.f32.mrf.mxu1  ;;  %4818 = vmatpush3.msra.mxu0 %v3234_v43  ;;  %v3233_v49 = vld [vmem:[%s7104_s4 + $0x10] sm:$0xff] }
 0x1c9   : > { %v4295_v58 = vpop.f32.mrf.mxu0  ;;  %4819 = vmatprep.subr.mxu0 %v3233_v49 }
 0x1ca   : > { %v6362_v59 = vadd.f32 %v4357_v51, %v2474_v54  ;;  %v4296_v61 = vadd.f32 %v4295_v58, %v4294_v52  ;;  %v4359_v62 = vpop.f32.mrf.mxu1  ;;  %4820 = vmatpush3.msra.mxu0 %v3233_v49 }
 0x1cb   : > { %v4360_v0 = vadd.f32 %v4359_v62, %v4358_v55  ;;  %v4297_v1 = vpop.f32.mrf.mxu0  ;;  %3062 = vmatmul.mubr.bf16.gmra.mxu0 %v4051_v53 }
 0x1cc   : > { %v2477_v2 = vadd.f32 %v4296_v61, %v6296_v19  ;;  %v4361_v3 = vpop.f32.mrf.mxu1  ;;  %3159 = vmatmul.mubr.bf16.gmra.mxu1 %v4053_v56  ;;  %v3231_v61 = vld [vmem:[%s7104_s4] sm:$0xff] }
 0x1cd   : > { %v4298_v4 = vpop.f32.mrf.mxu0 }
 0x1ce   : > { %v6368_v5 = vadd.f32 %v4360_v0, %v2477_v2  ;;  %v4299_v7 = vadd.f32 %v4298_v4, %v4297_v1  ;;  %v4362_v8 = vpop.f32.mrf.mxu1 }
 0x1cf   : > { %v4363_v10 = vadd.f32 %v4362_v8, %v4361_v3  ;;  %v4300_v11 = vpop.f32.mrf.mxu0 }
 0x1d0   : > { %v2482_v12 = vadd.f32 %v4299_v7, %v6296_v19  ;;  %v4364_v13 = vpop.f32.mrf.mxu1 }
 0x1d1   : > { %v4301_v14 = vpop.f32.mrf.mxu0 }
 0x1d2   : > { %v6371_v15 = vadd.f32 %v4363_v10, %v2482_v12  ;;  %v4302_v16 = vadd.f32 %v4301_v14, %v4300_v11  ;;  %v4365_v17 = vpop.f32.mrf.mxu1 }
 0x1d3   : > { %v4366_v22 = vadd.f32 %v4365_v17, %v4364_v13  ;;  %v4383_v23 = vpop.f32.mrf.mxu0 }
 0x1d4   : > { %v2485_v24 = vadd.f32 %v4302_v16, %v6296_v19  ;;  %v4447_v25 = vpop.f32.mrf.mxu1 }
 0x1d5   : > { %v4384_v26 = vpop.f32.mrf.mxu0 }
 0x1d6   : > { %v6377_v27 = vadd.f32 %v4366_v22, %v2485_v24  ;;  %v4385_v28 = vadd.f32 %v4384_v26, %v4383_v23  ;;  %v4448_v29 = vpop.f32.mrf.mxu1 }
 0x1d7   : > { %v4449_v30 = vadd.f32 %v4448_v29, %v4447_v25  ;;  %v4386_v32 = vpop.f32.mrf.mxu0 }
 0x1d8   : > { %v2620_v33 = vadd.f32 %v4385_v28, %v6303_v36  ;;  %v4450_v34 = vpop.f32.mrf.mxu1 }
 0x1d9   : > { %v4387_v35 = vpop.f32.mrf.mxu0 }
 0x1da   : > { %v6383_v39 = vadd.f32 %v4449_v30, %v2620_v33  ;;  %v4388_v19 = vadd.f32 %v4387_v35, %v4386_v32  ;;  %v4451_v40 = vpop.f32.mrf.mxu1 }
 0x1db   : > { %v4452_v41 = vadd.f32 %v4451_v40, %v4450_v34  ;;  %v4389_v42 = vpop.f32.mrf.mxu0 }
 0x1dc   : > { %v2623_v36 = vadd.f32 %v4388_v19, %v6308_v46  ;;  %v4453_v44 = vpop.f32.mrf.mxu1  ;;  %v3232_v46 = vld [vmem:[%s7104_s4 + $0x8] sm:$0xff] }
 0x1dd   : > { %v4390_v45 = vpop.f32.mrf.mxu0  ;;  %4821 = vmatprep.subr.mxu0 %v3232_v46 }
 0x1de   : > { %v6392_v50 = vadd.f32 %v4452_v41, %v2623_v36  ;;  %v4391_v51 = vadd.f32 %v4390_v45, %v4389_v42  ;;  %v4454_v52 = vpop.f32.mrf.mxu1  ;;  %4822 = vmatpush3.msra.mxu0 %v3232_v46 }
 0x1df   : > { %v4455_v53 = vadd.f32 %v4454_v52, %v4453_v44  ;;  %v4392_v54 = vpop.f32.mrf.mxu0  ;;  %4823 = vmatprep.subr.mxu0 %v3231_v61 }
 0x1e0   : > { %v2628_v55 = vadd.f32 %v4391_v51, %v6313_v60  ;;  %v4456_v56 = vpop.f32.mrf.mxu1  ;;  %4824 = vmatpush3.msra.mxu0 %v3231_v61 }
 0x1e1   : > { %v4393_v58 = vpop.f32.mrf.mxu0 }
 0x1e2   : > { %v6401_v62 = vadd.f32 %v4455_v53, %v2628_v55  ;;  %v4394_v63 = vadd.f32 %v4393_v58, %v4392_v54  ;;  %v4457_v0 = vpop.f32.mrf.mxu1 }
 0x1e3   : > { %v4458_v1 = vadd.f32 %v4457_v0, %v4456_v56  ;;  %v4395_v2 = vpop.f32.mrf.mxu0 }
 0x1e4   : > { %v2631_v3 = vadd.f32 %v4394_v63, %v6318_v6  ;;  %v4459_v4 = vpop.f32.mrf.mxu1 }
 0x1e5   : > { %v4396_v60 = vpop.f32.mrf.mxu0 }
 0x1e6   : > { %v6404_v7 = vadd.f32 %v4458_v1, %v2631_v3  ;;  %v4397_v8 = vadd.f32 %v4396_v60, %v4395_v2  ;;  %v4460_v10 = vpop.f32.mrf.mxu1 }
 0x1e7   : > { %v4461_v11 = vadd.f32 %v4460_v10, %v4459_v4  ;;  %v4398_v12 = vpop.f32.mrf.mxu0 }
 0x1e8   : > { %v2636_v13 = vadd.f32 %v4397_v8, %v6323_v21  ;;  %v4462_v14 = vpop.f32.mrf.mxu1 }
 0x1e9   : > { %v4399_v16 = vpop.f32.mrf.mxu0 }
 0x1ea   : > { %v6407_v17 = vadd.f32 %v4461_v11, %v2636_v13  ;;  %v4400_v18 = vadd.f32 %v4399_v16, %v4398_v12  ;;  %v4463_v22 = vpop.f32.mrf.mxu1 }
 0x1eb   : > { %v4464_v23 = vadd.f32 %v4463_v22, %v4462_v14  ;;  %v4401_v24 = vpop.f32.mrf.mxu0 }
 0x1ec   : > { %v2639_v6 = vadd.f32 %v4400_v18, %v6328_v31  ;;  %v4465_v25 = vpop.f32.mrf.mxu1 }
 0x1ed   : > { %v4402_v26 = vpop.f32.mrf.mxu0 }
 0x1ee   : > { %v6410_v28 = vadd.f32 %v4464_v23, %v2639_v6  ;;  %v4403_v29 = vadd.f32 %v4402_v26, %v4401_v24  ;;  %v4466_v30 = vpop.f32.mrf.mxu1 }
 0x1ef   : > { %v4467_v32 = vadd.f32 %v4466_v30, %v4465_v25  ;;  %v4404_v33 = vpop.f32.mrf.mxu0 }
 0x1f0   : > { %v2644_v21 = vadd.f32 %v4403_v29, %v6333_v47  ;;  %v4468_v34 = vpop.f32.mrf.mxu1 }
 0x1f1   : > { %v4405_v35 = vpop.f32.mrf.mxu0 }
 0x1f2   : > { %v6413_v38 = vadd.f32 %v4467_v32, %v2644_v21  ;;  %v4406_v19 = vadd.f32 %v4405_v35, %v4404_v33  ;;  %v4469_v40 = vpop.f32.mrf.mxu1 }
 0x1f3   : > { %v4470_v41 = vadd.f32 %v4469_v40, %v4468_v34  ;;  %v4407_v42 = vpop.f32.mrf.mxu0 }
 0x1f4   : > { %v2647_v31 = vadd.f32 %v4406_v19, %v6338_v57  ;;  %v4471_v43 = vpop.f32.mrf.mxu1 }
 0x1f5   : > { %v4408_v36 = vpop.f32.mrf.mxu0 }
 0x1f6   : > { %v6416_v44 = vadd.f32 %v4470_v41, %v2647_v31  ;;  %v4409_v45 = vadd.f32 %v4408_v36, %v4407_v42  ;;  %v4472_v49 = vpop.f32.mrf.mxu1 }
 0x1f7   : > { %v4473_v51 = vadd.f32 %v4472_v49, %v4471_v43  ;;  %v4410_v52 = vpop.f32.mrf.mxu0 }
 0x1f8   : > { %v2652_v47 = vadd.f32 %v4409_v45, %v6343_v9  ;;  %v4474_v53 = vpop.f32.mrf.mxu1 }
 0x1f9   : > { %v4411_v54 = vpop.f32.mrf.mxu0 }
 0x1fa   : > { %v6419_v46 = vadd.f32 %v4473_v51, %v2652_v47  ;;  %v4412_v55 = vadd.f32 %v4411_v54, %v4410_v52  ;;  %v4475_v56 = vpop.f32.mrf.mxu1 }
 0x1fb   : > { %v4476_v58 = vadd.f32 %v4475_v56, %v4474_v53  ;;  %v4413_v61 = vpop.f32.mrf.mxu0 }
 0x1fc   : > { %v2655_v57 = vadd.f32 %v4412_v55, %v6348_v20  ;;  %v4477_v63 = vpop.f32.mrf.mxu1 }
 0x1fd   : > { %v4414_v0 = vpop.f32.mrf.mxu0 }
 0x1fe   : > { %v6422_v1 = vadd.f32 %v4476_v58, %v2655_v57  ;;  %v4415_v2 = vadd.f32 %v4414_v0, %v4413_v61  ;;  %v4478_v3 = vpop.f32.mrf.mxu1 }
 0x1ff   : > { %v4479_v4 = vadd.f32 %v4478_v3, %v4477_v63  ;;  %v4416_v60 = vpop.f32.mrf.mxu0 }
 0x200   : > { %v2660_v9 = vadd.f32 %v4415_v2, %v6353_v37  ;;  %v4480_v8 = vpop.f32.mrf.mxu1  ;;  %v7063_v2 = vmov 0.0  }
 0x201   : > { %v4417_v10 = vpop.f32.mrf.mxu0  ;;  %4884 = vmatprep.subr.mxu0 %v7063_v2  ;;  %4849 = vmatprep.subr.mxu1 %v7063_v2 }
 0x202   : > { %v6425_v11 = vadd.f32 %v4479_v4, %v2660_v9  ;;  %v4418_v12 = vadd.f32 %v4417_v10, %v4416_v60  ;;  %v4481_v13 = vpop.f32.mrf.mxu1 }
 0x203   : > { %v4482_v14 = vadd.f32 %v4481_v13, %v4480_v8  ;;  %v4419_v16 = vpop.f32.mrf.mxu0 }
 0x204   : > { %7105 = vst [vmem:[#allocation28_spill] sm:$0xff] %v6425_v11  ;;  %v2663_v20 = vadd.f32 %v4418_v12, %v6359_v48  ;;  %v4483_v18 = vpop.f32.mrf.mxu1 }
 0x205   : > { %v4420_v22 = vpop.f32.mrf.mxu0 }
 0x206   : > { %v6428_v23 = vadd.f32 %v4482_v14, %v2663_v20  ;;  %v4421_v24 = vadd.f32 %v4420_v22, %v4419_v16  ;;  %v4484_v6 = vpop.f32.mrf.mxu1 }
 0x207   : > { %v4485_v25 = vadd.f32 %v4484_v6, %v4483_v18  ;;  %v4422_v26 = vpop.f32.mrf.mxu0 }
 0x208   : > { %7106 = vst [vmem:[#allocation29_spill] sm:$0xff] %v6428_v23  ;;  %v2668_v37 = vadd.f32 %v4421_v24, %v6362_v59  ;;  %v4486_v29 = vpop.f32.mrf.mxu1 }
 0x209   : > { %v4423_v30 = vpop.f32.mrf.mxu0 }
 0x20a   : > { %v6431_v32 = vadd.f32 %v4485_v25, %v2668_v37  ;;  %v4424_v33 = vadd.f32 %v4423_v30, %v4422_v26  ;;  %v4487_v21 = vpop.f32.mrf.mxu1 }
 0x20b   : > { %v4488_v34 = vadd.f32 %v4487_v21, %v4486_v29  ;;  %v4425_v35 = vpop.f32.mrf.mxu0 }
 0x20c   : > { %7107 = vst [vmem:[#allocation30_spill] sm:$0xff] %v6431_v32  ;;  %v2671_v48 = vadd.f32 %v4424_v33, %v6368_v5  ;;  %v4489_v19 = vpop.f32.mrf.mxu1 }
 0x20d   : > { %v4426_v40 = vpop.f32.mrf.mxu0 }
 0x20e   : > { %v6434_v41 = vadd.f32 %v4488_v34, %v2671_v48  ;;  %v4427_v42 = vadd.f32 %v4426_v40, %v4425_v35  ;;  %v4490_v31 = vpop.f32.mrf.mxu1 }
 0x20f   : > { %v4491_v43 = vadd.f32 %v4490_v31, %v4489_v19  ;;  %v4428_v36 = vpop.f32.mrf.mxu0 }
 0x210   : > { %7108 = vst [vmem:[#allocation31_spill] sm:$0xff] %v6434_v41  ;;  %v2676_v59 = vadd.f32 %v4427_v42, %v6371_v15  ;;  %v4492_v45 = vpop.f32.mrf.mxu1 }
 0x211   : > { %v4429_v49 = vpop.f32.mrf.mxu0 }
 0x212   : > { %v6437_v51 = vadd.f32 %v4491_v43, %v2676_v59  ;;  %v4430_v52 = vadd.f32 %v4429_v49, %v4428_v36  ;;  %v4493_v47 = vpop.f32.mrf.mxu1 }
 0x213   : > { %v4494_v53 = vadd.f32 %v4493_v47, %v4492_v45  ;;  %v6439_v54 = vpop.f32.mrf.mxu0 }
 0x214   : > { %7109 = vst [vmem:[#allocation32_spill] sm:$0xff] %v6437_v51  ;;  %v2679_v5 = vadd.f32 %v4430_v52, %v6377_v27  ;;  %v6442_v55 = vpop.f32.mrf.mxu1 }
 0x215   : > { %v4512_v56 = vpop.f32.mrf.mxu0 }
 0x216   : > { %v6444_v58 = vadd.f32 %v4494_v53, %v2679_v5  ;;  %v6446_v61 = vpop.f32.mrf.mxu1 }
 0x217   : > { %v6448_v57 = vpop.f32.mrf.mxu0 }
 0x218   : > { %7110 = vst [vmem:[#allocation33_spill] sm:$0xff] %v6444_v58  ;;  %v6450_v15 = vpop.f32.mrf.mxu1 }
 0x219   : > { %v6452_v63 = vpop.f32.mrf.mxu0 }
 0x21a   : > { %v6454_v0 = vpop.f32.mrf.mxu1 }
 0x21b   : > { %v6458_v27 = vpop.f32.mrf.mxu0 }
 0x21c   : > { %v6460_v3 = vpop.f32.mrf.mxu1 }
 0x21d   : > { %v6462_v4 = vpop.f32.mrf.mxu0 }
 0x21e   : > { %v6464_v60 = vpop.f32.mrf.mxu1 }
 0x21f   : > { %v6466_v9 = vpop.f32.mrf.mxu0 }
 0x220   : > { %v6468_v8 = vpop.f32.mrf.mxu1 }
 0x221   : > { %v6470_v10 = vpop.f32.mrf.mxu0 }
 0x222   : > { %v6472_v12 = vpop.f32.mrf.mxu1 }
 0x223   : > { %v6474_v13 = vpop.f32.mrf.mxu0 }
 0x224   : > { %v6476_v14 = vpop.f32.mrf.mxu1 }
 0x225   : > { %v6478_v16 = vpop.f32.mrf.mxu0 }
 0x226   : > { %v6480_v20 = vpop.f32.mrf.mxu1 }
 0x227   : > { %v6482_v18 = vpop.f32.mrf.mxu0 }
 0x228   : > { %v6484_v22 = vpop.f32.mrf.mxu1 }
 0x229   : > { %v6486_v24 = vpop.f32.mrf.mxu0 }
 0x22a   : > { %v6488_v6 = vpop.f32.mrf.mxu1 }
 0x22b   : > { %v6490_v25 = vpop.f32.mrf.mxu0 }
 0x22c   : > { %v6492_v26 = vpop.f32.mrf.mxu1 }
 0x22d   : > { %v6494_v37 = vpop.f32.mrf.mxu0 }
 0x22e   : > { %v6496_v29 = vpop.f32.mrf.mxu1 }
 0x22f   : > { %v6498_v30 = vpop.f32.mrf.mxu0 }
 0x230   : > { %v6500_v33 = vpop.f32.mrf.mxu1 }
 0x231   : > { %v6502_v21 = vpop.f32.mrf.mxu0 }
 0x232   : > { %v6504_v34 = vpop.f32.mrf.mxu1 }
 0x233   : > { %v6506_v35 = vpop.f32.mrf.mxu0 }
 0x234   : > { %v6508_v48 = vpop.f32.mrf.mxu1 }
 0x235   : > { %v6510_v19 = vpop.f32.mrf.mxu0 }
 0x236   : > { %v6512_v40 = vpop.f32.mrf.mxu1 }
 0x237   : > { %v6514_v42 = vpop.f32.mrf.mxu0 }
 0x238   : > { %v6516_v31 = vpop.f32.mrf.mxu1 }
 0x239   : > { %7111 = vst [vmem:[#allocation34_spill] sm:$0xff] %v6516_v31  ;;  %v6518_v43 = vpop.f32.mrf.mxu0 }
 0x23a   : > { %v6520_v36 = vpop.f32.mrf.mxu1 }
 0x23b   : > { %7112 = vst [vmem:[#allocation35_spill] sm:$0xff] %v6520_v36  ;;  %v6522_v59 = vpop.f32.mrf.mxu0 }
 0x23c   : > { %v6524_v45 = vpop.f32.mrf.mxu1 }
 0x23d   : > { %7113 = vst [vmem:[#allocation36_spill] sm:$0xff] %v6524_v45  ;;  %v6526_v49 = vpop.f32.mrf.mxu0 }
 0x23e   : > { %v6528_v52 = vpop.f32.mrf.mxu1 }
 0x23f   : > { %7114 = vst [vmem:[#allocation37_spill] sm:$0xff] %v6528_v52  ;;  %v6530_v47 = vpop.f32.mrf.mxu0 }
 0x240   : > { %7115 = vst [vmem:[#allocation38_spill] sm:$0xff] %v6530_v47  ;;  %v6532_v53 = vpop.f32.mrf.mxu1 }
 0x241   : > { %7116 = vst [vmem:[#allocation39_spill] sm:$0xff] %v6532_v53  ;;  %v6534_v5 = vpop.f32.mrf.mxu0 }
 0x242   : > { %7117 = vst [vmem:[#allocation40_spill] sm:$0xff] %v6534_v5  ;;  %v6536_v2 = vpop.f32.mrf.mxu1 }
 0x243   : > { %7118 = vst [vmem:[#allocation41_spill] sm:$0xff] %v6536_v2  ;;  %v6538_v58 = vpop.f32.mrf.mxu0 }
 0x244   : > { %7119 = vst [vmem:[#allocation42_spill] sm:$0xff] %v6538_v58  ;;  %v6540_v51 = vpop.f32.mrf.mxu1 }
 0x245   : > { %7120 = vst [vmem:[#allocation43_spill] sm:$0xff] %v6540_v51  ;;  %v6542_v41 = vpop.f32.mrf.mxu0  ;;  %v4513_v51 = vadd.f32 %v4512_v56, %v6439_v54  ;;  %v4577_v56 = vadd.f32 %v6446_v61, %v6442_v55  ;;  %v4580_v55 = vadd.f32 %v6454_v0, %v6450_v15 }
 0x246   : > { %7121 = vst [vmem:[#allocation44_spill] sm:$0xff] %v6542_v41  ;;  %v6544_v32 = vpop.f32.mrf.mxu1 }
 0x247   : > { %7122 = vst [vmem:[#allocation45_spill] sm:$0xff] %v6544_v32  ;;  %v6546_v23 = vpop.f32.mrf.mxu0 }
 0x248   : > { %7123 = vst [vmem:[#allocation46_spill] sm:$0xff] %v6546_v23  ;;  %v6548_v52 = vpop.f32.mrf.mxu1  ;;  %v7065_v23 = vlaneseq }
 0x249   : > { %7124 = vst [vmem:[#allocation47_spill] sm:$0xff] %v6548_v52  ;;  %v6550_v45 = vpop.f32.mrf.mxu0 }
 0x24a   : > { %7125 = vst [vmem:[#allocation48_spill] sm:$0xff] %v6550_v45  ;;  %v6552_v53 = vpop.f32.mrf.mxu1  ;;  %v6577_v54 = vshrl.u32 %v7065_v23, 7 }
 0x24b   : > { %7126 = vst [vmem:[#allocation49_spill] sm:$0xff] %v6552_v53  ;;  %v6554_v5 = vpop.f32.mrf.mxu0  ;;  %v2814_v53 = vadd.f32 %v4513_v51, %v6383_v39 }
 0x24c   : > { %7127 = vst [vmem:[#allocation50_spill] sm:$0xff] %v6554_v5  ;;  %v6557_v2 = vpop.f32.mrf.mxu1  ;;  %v540_v47 = vadd.s32 8, %v6577_v54 }
 0x24d   : > { %7128 = vst [vmem:[#allocation51_spill] sm:$0xff] %v6557_v2  ;;  %v6559_v58 = vpop.f32.mrf.mxu0  ;;  %v4516_v2 = vadd.f32 %v6452_v63, %v6448_v57  ;;  %v2911_v39 = vadd.f32 %v4577_v56, %v2814_v53  ;;  %v4583_v56 = vadd.f32 %v6464_v60, %v6460_v3 }
 0x24e   : > { %7129 = vst [vmem:[#allocation52_spill] sm:$0xff] %v6559_v58  ;;  %v6562_v41 = vpop.f32.mrf.mxu1 }
 0x24f   : > { %7130 = vst [vmem:[#allocation53_spill] sm:$0xff] %v6562_v41  ;;  %v6565_v32 = vpop.f32.mrf.mxu0  ;;  %v2817_v51 = vadd.f32 %v4516_v2, %v6392_v50  ;;  %v4522_v50 = vadd.f32 %v6470_v10, %v6466_v9  ;;  %v4525_v10 = vadd.f32 %v6478_v16, %v6474_v13 }
 0x250   : > { %7131 = vst [vmem:[#allocation54_spill] sm:$0xff] %v6565_v32  ;;  %v6567_v52 = vpop.f32.mrf.mxu1  ;;  %v6581_v32 = vstv %s3925_s26 }
 0x251   : > { %7132 = vst [vmem:[#allocation55_spill] sm:$0xff] %v6567_v52  ;;  %v6569_v45 = vpop.f32.mrf.mxu0  ;;  %v4519_v52 = vadd.f32 %v6462_v4, %v6458_v27  ;;  %v6589_v23 = vadd.s32 %v6581_v32, %v6577_v54  ;;  %v2914_v53 = vadd.f32 %v4580_v55, %v2817_v51  ;;  %v6601_v31 = vadd.s32 %v6581_v32, %v540_v47 }
 0x252   : > { %7133 = vst [vmem:[#allocation56_spill] sm:$0xff] %v6569_v45  ;;  %v6574_v5 = vpop.f32.mrf.mxu1  ;;  %v2825_v3 = vadd.f32 %v4522_v50, %v6404_v7  ;;  %v4586_v7 = vadd.f32 %v6472_v12, %v6468_v8 }
 0x253   : > { %7134 = vst [vmem:[#allocation57_spill] sm:$0xff] %v6574_v5  ;;  %v4639_v58 = vpop.f32.mrf.mxu0  ;;  %v2822_v27 = vadd.f32 %v4519_v52, %v6401_v62  ;;  %vm7069_vm2 = vcmp.lt.s32.totalorder %v6589_v23, 333  ;;  %v541_v62 = vadd.s32 16, %v6577_v54  ;;  %vm573_vm4 = vcmp.lt.s32.totalorder %v6601_v31, 333 }
 0x254   : > { %v4703_v41 = vpop.f32.mrf.mxu1  ;;  %v2922_v50 = vadd.f32 %v4586_v7, %v2825_v3 }
 0x255   : > { %v4640_v45 = vpop.f32.mrf.mxu0  ;;  %v6619_v13 = vadd.s32 %v6581_v32, %v541_v62 }
 0x256   : > { %v4641_v57 = vadd.f32 %v4640_v45, %v4639_v58  ;;  %v4704_v63 = vpop.f32.mrf.mxu1 }
 0x257   : > { %v4642_v5 = vpop.f32.mrf.mxu0  ;;  %v4705_v11 = vadd.f32 %v4704_v63, %v4703_v41  ;;  %vm574_vm5 = vcmp.lt.s32.totalorder %v6619_v13, 333  ;;  %v3457_v13 = vld [vmem:[#allocation2] sm:$0x1] }
 0x258   : > { %v3008_v61 = vadd.f32 %v4641_v57, %v2911_v39  ;;  %v4706_v36 = vpop.f32.mrf.mxu1  ;;  %v542_v57 = vadd.s32 24, %v6577_v54 }
 0x259   : > { %v4643_v4 = vpop.f32.mrf.mxu0 }
 0x25a   : > { %v6596_v58 = vadd.f32 %v4705_v11, %v3008_v61  ;;  %v4644_v2 = vadd.f32 %v4643_v4, %v4642_v5  ;;  %v4707_v45 = vpop.f32.mrf.mxu1  ;;  %v2919_v11 = vadd.f32 %v4583_v56, %v2822_v27  ;;  %v2830_v27 = vadd.f32 %v4525_v10, %v6407_v17 }
 0x25b   : > { %v4645_v15 = vpop.f32.mrf.mxu0  ;;  %v4708_v52 = vadd.f32 %v4707_v45, %v4706_v36  ;;  %v4528_v4 = vadd.f32 %v6486_v24, %v6482_v18  ;;  %v4589_v56 = vadd.f32 %v6480_v20, %v6476_v14  ;;  %v543_v18 = vadd.s32 32, %v6577_v54 }
 0x25c   : > { %v7066_v41 = vmax.f32 %v6596_v58, 0.0  ;;  %v3011_v0 = vadd.f32 %v4644_v2, %v2914_v53  ;;  %v4709_v9 = vpop.f32.mrf.mxu1  ;;  %v4531_v14 = vadd.f32 %v6494_v37, %v6490_v25 }
 0x25d   : > { %v4646_v5 = vpop.f32.mrf.mxu0  ;;  %v6657_v25 = vadd.s32 %v6581_v32, %v543_v18  ;;  %v4537_v18 = vadd.f32 %v6510_v19, %v6506_v35  ;;  %v546_v35 = vadd.s32 56, %v6577_v54 }
 0x25e   : > { %v6609_v60 = vadd.f32 %v4708_v52, %v3011_v0  ;;  %v4647_v47 = vadd.f32 %v4646_v5, %v4645_v15  ;;  %v4710_v39 = vpop.f32.mrf.mxu1  ;;  %v3215_v51 = vsel %vm7069_vm2, %v7066_v41, 0.0  ;;  %v6636_v15 = vadd.s32 %v6581_v32, %v542_v57 }
 0x25f   : > { %v4648_v36 = vpop.f32.mrf.mxu0  ;;  %4825 = vmatprep.mubr.msk.f32.mxu0 %vm3246_vm3, %v3215_v51  ;;  %v4711_v55 = vadd.f32 %v4710_v39, %v4709_v9  ;;  %v2927_v9 = vadd.f32 %v4589_v56, %v2830_v27  ;;  %v4592_v39 = vadd.f32 %v6488_v6, %v6484_v22  ;;  %v2838_v6 = vadd.f32 %v4531_v14, %v6413_v38 }
 0x260   : > { %v7067_v16 = vmax.f32 %v6609_v60, 0.0  ;;  %v3016_v63 = vadd.f32 %v4647_v47, %v2919_v11  ;;  %v4712_v61 = vpop.f32.mrf.mxu1  ;;  %v2833_v11 = vadd.f32 %v4528_v4, %v6410_v28  ;;  %vm575_vm6 = vcmp.lt.s32.totalorder %v6636_v15, 333 }
 0x261   : > { %v4649_v53 = vpop.f32.mrf.mxu0  ;;  %v544_v28 = vadd.s32 40, %v6577_v54  ;;  %vm576_vm7 = vcmp.lt.s32.totalorder %v6657_v25, 333  ;;  %v4595_v38 = vadd.f32 %v6496_v29, %v6492_v26  ;;  %v4598_v29 = vadd.f32 %v6504_v34, %v6500_v33 }
 0x262   : > { %v3216_v2 = vsel %vm573_vm4, %v7067_v16, 0.0  ;;  %v6631_v45 = vadd.f32 %v4711_v55, %v3016_v63  ;;  %v4650_v8 = vadd.f32 %v4649_v53, %v4648_v36  ;;  %v4713_v12 = vpop.f32.mrf.mxu1  ;;  %v2930_v63 = vadd.f32 %v4592_v39, %v2833_v11 }
 0x263   : > { %v4651_v17 = vpop.f32.mrf.mxu0  ;;  %4826 = vmatmul.mubr.msk.f32.vlgmr.msra.gmra.mxu0 %vm3246_vm3, %v3216_v2  ;;  %v4714_v0 = vadd.f32 %v4713_v12, %v4712_v61  ;;  %v4534_v55 = vadd.f32 %v6502_v21, %v6498_v30  ;;  %v545_v30 = vadd.s32 48, %v6577_v54  ;;  %v2846_v39 = vadd.f32 %v4537_v18, %v6419_v46 }
 0x264   : > { %v7068_v24 = vmax.f32 %v6631_v45, 0.0  ;;  %v3019_v62 = vadd.f32 %v4650_v8, %v2922_v50  ;;  %v4715_v52 = vpop.f32.mrf.mxu1  ;;  %v6670_v50 = vadd.s32 %v6581_v32, %v544_v28  ;;  %v4540_v33 = vadd.f32 %v6518_v43, %v6514_v42 }
 0x265   : > { %v4652_v10 = vpop.f32.mrf.mxu0  ;;  %v6693_v19 = vadd.s32 %v6581_v32, %v545_v30  ;;  %v547_v42 = vadd.s32 64, %v6577_v54 }
 0x266   : > { %v6645_v20 = vadd.f32 %v4714_v0, %v3019_v62  ;;  %v4653_v5 = vadd.f32 %v4652_v10, %v4651_v17  ;;  %v4716_v3 = vpop.f32.mrf.mxu1  ;;  %v3217_v47 = vsel %vm574_vm5, %v7068_v24, 0.0  ;;  %v2841_v17 = vadd.f32 %v4534_v55, %v6416_v44 }
 0x267   : > { %v4654_v51 = vpop.f32.mrf.mxu0  ;;  %4828 = vmatprep.mubr.msk.f32.mxu0 %vm3246_vm3, %v3217_v47  ;;  %v4717_v57 = vadd.f32 %v4716_v3, %v4715_v52  ;;  %v2935_v0 = vadd.f32 %v4595_v38, %v2838_v6  ;;  %vm577_vm8 = vcmp.lt.s32.totalorder %v6670_v50, 333  ;;  %vm578_vm9 = vcmp.lt.s32.totalorder %v6693_v19, 333 }
 0x268   : > { %v3170_v37 = vmax.f32 %v6645_v20, 0.0  ;;  %v3024_v36 = vadd.f32 %v4653_v5, %v2927_v9  ;;  %v4718_v7 = vpop.f32.mrf.mxu1  ;;  %v2938_v47 = vadd.f32 %v4598_v29, %v2841_v17  ;;  %v7139_v29 = vld [vmem:[#allocation40_spill] sm:$0xff] }
 0x269   : > { %v4655_v22 = vpop.f32.mrf.mxu0 }
 0x26a   : > { %v3218_v61 = vsel %vm575_vm6, %v3170_v37, 0.0  ;;  %v6667_v27 = vadd.f32 %v4717_v57, %v3024_v36  ;;  %v4656_v4 = vadd.f32 %v4655_v22, %v4654_v51  ;;  %v4719_v53 = vpop.f32.mrf.mxu1 }
 0x26b   : > { %v4657_v2 = vpop.f32.mrf.mxu0  ;;  %4829 = vmatmul.mubr.msk.f32.gmra.mxu0 %vm3246_vm3, %v3218_v61  ;;  %v4720_v12 = vadd.f32 %v4719_v53, %v4718_v7  ;;  %v4601_v7 = vadd.f32 %v6512_v40, %v6508_v48  ;;  %v2849_v40 = vadd.f32 %v4540_v33, %v6422_v1  ;;  %v7135_v1 = vld [vmem:[#allocation34_spill] sm:$0xff]  ;;  %v7141_v33 = vld [vmem:[#allocation37_spill] sm:$0xff] }
 0x26c   : > { %v3171_v21 = vmax.f32 %v6667_v27, 0.0  ;;  %v3027_v8 = vadd.f32 %v4656_v4, %v2930_v63  ;;  %v4721_v56 = vpop.f32.mrf.mxu1  ;;  %v6708_v63 = vadd.s32 %v6581_v32, %v546_v35  ;;  %v4543_v4 = vadd.f32 %v6526_v49, %v6522_v59  ;;  %v7136_v49 = vld [vmem:[#allocation35_spill] sm:$0xff] }
 0x26d   : > { %v4658_v62 = vpop.f32.mrf.mxu0  ;;  %v2943_v61 = vadd.f32 %v4601_v7, %v2846_v39  ;;  %v6727_v59 = vadd.s32 %v6581_v32, %v547_v42  ;;  %v549_v7 = vadd.s32 80, %v6577_v54 }
 0x26e   : > { %v6681_v52 = vadd.f32 %v4720_v12, %v3027_v8  ;;  %v4659_v9 = vadd.f32 %v4658_v62, %v4657_v2  ;;  %v4722_v11 = vpop.f32.mrf.mxu1  ;;  %v3219_v26 = vsel %vm576_vm7, %v3171_v21, 0.0  ;;  %vm579_vm10 = vcmp.lt.s32.totalorder %v6708_v63, 333 }
 0x26f   : > { %v4660_v44 = vpop.f32.mrf.mxu0  ;;  %4831 = vmatprep.mubr.msk.f32.mxu0 %vm3246_vm3, %v3219_v26  ;;  %v4723_v5 = vadd.f32 %v4722_v11, %v4721_v56  ;;  %v548_v12 = vadd.s32 72, %v6577_v54  ;;  %v4604_v56 = vadd.f32 %v7136_v49, %v7135_v1  ;;  %v7138_v26 = vld [vmem:[#allocation38_spill] sm:$0xff]  ;;  %vm580_vm11 = vcmp.lt.s32.totalorder %v6727_v59, 333  ;;  %v7145_v49 = vld [vmem:[#allocation39_spill] sm:$0xff] }
 0x270   : > { %v3172_v10 = vmax.f32 %v6681_v52, 0.0  ;;  %v3032_v14 = vadd.f32 %v4659_v9, %v2935_v0  ;;  %v4724_v3 = vpop.f32.mrf.mxu1  ;;  %v7137_v9 = vld [vmem:[#allocation28_spill] sm:$0xff] }
 0x271   : > { %v4661_v51 = vpop.f32.mrf.mxu0  ;;  %v2854_v11 = vadd.f32 %v4543_v4, %v7137_v9  ;;  %v6765_v9 = vadd.s32 %v6581_v32, %v549_v7 }
 0x272   : > { %v3220_v34 = vsel %vm577_vm8, %v3172_v10, 0.0  ;;  %v6703_v28 = vadd.f32 %v4723_v5, %v3032_v14  ;;  %v4662_v36 = vadd.f32 %v4661_v51, %v4660_v44  ;;  %v4725_v57 = vpop.f32.mrf.mxu1  ;;  %v4546_v44 = vadd.f32 %v7139_v29, %v7138_v26  ;;  %v7140_v51 = vld [vmem:[#allocation36_spill] sm:$0xff] }
 0x273   : > { %v4663_v46 = vpop.f32.mrf.mxu0  ;;  %4832 = vmatmul.mubr.msk.f32.gmra.mxu0 %vm3246_vm3, %v3220_v34  ;;  %v4726_v22 = vadd.f32 %v4725_v57, %v4724_v3  ;;  %v2946_v14 = vadd.f32 %v4604_v56, %v2849_v40  ;;  %v4607_v34 = vadd.f32 %v7141_v33, %v7140_v51  ;;  %v7143_v40 = vld [vmem:[#allocation42_spill] sm:$0xff]  ;;  %v7146_v56 = vld [vmem:[#allocation41_spill] sm:$0xff]  ;;  %vm582_vm13 = vcmp.lt.s32.totalorder %v6765_v9, 333 }
 0x274   : > { %v3173_v43 = vmax.f32 %v6703_v28, 0.0  ;;  %v3035_v55 = vadd.f32 %v4662_v36, %v2938_v47  ;;  %v4727_v6 = vpop.f32.mrf.mxu1  ;;  %v6744_v36 = vadd.s32 %v6581_v32, %v548_v12  ;;  %v7149_v51 = vld [vmem:[#allocation30_spill] sm:$0xff]  ;;  %v6906_v28 = vld [vmem:[#allocation9] ss:$0 sm:$0xff] }
 0x275   : > { %v4664_v48 = vpop.f32.mrf.mxu0 }
 0x276   : > { %v6717_v53 = vadd.f32 %v4726_v22, %v3035_v55  ;;  %v4665_v2 = vadd.f32 %v4664_v48, %v4663_v46  ;;  %v4728_v30 = vpop.f32.mrf.mxu1  ;;  %v3221_v38 = vsel %vm578_vm9, %v3173_v43, 0.0  ;;  %vm581_vm12 = vcmp.lt.s32.totalorder %v6744_v36, 333 }
 0x277   : > { %v4666_v8 = vpop.f32.mrf.mxu0  ;;  %4834 = vmatprep.mubr.msk.f32.mxu0 %vm3246_vm3, %v3221_v38  ;;  %v4729_v62 = vadd.f32 %v4728_v30, %v4727_v6  ;;  %v2951_v6 = vadd.f32 %v4607_v34, %v2854_v11 }
 0x278   : > { %v3174_v17 = vmax.f32 %v6717_v53, 0.0  ;;  %v3040_v18 = vadd.f32 %v4665_v2, %v2943_v61  ;;  %v4730_v0 = vpop.f32.mrf.mxu1  ;;  %v7142_v61 = vld [vmem:[#allocation29_spill] sm:$0xff]  ;;  %v7144_v2 = vld [vmem:[#allocation44_spill] sm:$0xff] }
 0x279   : > { %v4667_v35 = vpop.f32.mrf.mxu0  ;;  %v2857_v4 = vadd.f32 %v4546_v44, %v7142_v61  ;;  %v4549_v30 = vadd.f32 %v7144_v2, %v7143_v40  ;;  %v7150_v61 = vld [vmem:[#allocation43_spill] sm:$0xff] }
 0x27a   : > { %v3222_v5 = vsel %vm579_vm10, %v3174_v17, 0.0  ;;  %v6739_v3 = vadd.f32 %v4729_v62, %v3040_v18  ;;  %v4668_v47 = vadd.f32 %v4667_v35, %v4666_v8  ;;  %v4731_v39 = vpop.f32.mrf.mxu1  ;;  %v4610_v18 = vadd.f32 %v7146_v56, %v7145_v49  ;;  %v7153_v49 = vld [vmem:[#allocation50_spill] sm:$0xff]  ;;  %v7154_v56 = vld [vmem:[#allocation52_spill] sm:$0xff] }
 0x27b   : > { %v4669_v57 = vpop.f32.mrf.mxu0  ;;  %4835 = vmatmul.mubr.msk.f32.gmra.mxu0 %vm3246_vm3, %v3222_v5  ;;  %v4732_v55 = vadd.f32 %v4731_v39, %v4730_v0  ;;  %v550_v0 = vadd.s32 88, %v6577_v54  ;;  %v7148_v5 = vld [vmem:[#allocation48_spill] sm:$0xff]  ;;  %v2862_v33 = vadd.f32 %v4549_v30, %v7149_v51  ;;  %v552_v51 = vadd.s32 104, %v6577_v54 }
 0x27c   : > { %v3175_v46 = vmax.f32 %v6739_v3, 0.0  ;;  %v3043_v42 = vadd.f32 %v4668_v47, %v2946_v14  ;;  %v4733_v22 = vpop.f32.mrf.mxu1  ;;  %v2954_v35 = vadd.f32 %v4610_v18, %v2857_v4  ;;  %v7147_v14 = vld [vmem:[#allocation46_spill] sm:$0xff]  ;;  %v7151_v4 = vld [vmem:[#allocation45_spill] sm:$0xff]  ;;  %v4555_v18 = vadd.f32 %v7154_v56, %v7153_v49 }
 0x27d   : > { %v4670_v48 = vpop.f32.mrf.mxu0  ;;  %v4552_v47 = vadd.f32 %v7148_v5, %v7147_v14 }
 0x27e   : > { %v6753_v38 = vadd.f32 %v4732_v55, %v3043_v42  ;;  %v4671_v8 = vadd.f32 %v4670_v48, %v4669_v57  ;;  %v4734_v12 = vpop.f32.mrf.mxu1  ;;  %v3223_v1 = vsel %vm580_vm11, %v3175_v46, 0.0  ;;  %v6778_v55 = vadd.s32 %v6581_v32, %v550_v0 }
 0x27f   : > { %v4672_v62 = vpop.f32.mrf.mxu0  ;;  %4837 = vmatprep.mubr.msk.f32.mxu0 %vm3246_vm3, %v3223_v1  ;;  %v4735_v29 = vadd.f32 %v4734_v12, %v4733_v22  ;;  %v4613_v48 = vadd.f32 %v7151_v4, %v7150_v61  ;;  %v7152_v12 = vld [vmem:[#allocation31_spill] sm:$0xff]  ;;  %v7157_v4 = vld [vmem:[#allocation32_spill] sm:$0xff] }
 0x280   : > { %v3176_v11 = vmax.f32 %v6753_v38, 0.0  ;;  %v3048_v26 = vadd.f32 %v4671_v8, %v2951_v6  ;;  %v4736_v44 = vpop.f32.mrf.mxu1  ;;  %v551_v6 = vadd.s32 96, %v6577_v54  ;;  %v2865_v1 = vadd.f32 %v4552_v47, %v7152_v12  ;;  %v7159_v12 = vld [vmem:[#allocation56_spill] sm:$0xff] }
 0x281   : > { %v4673_v39 = vpop.f32.mrf.mxu0  ;;  %v2959_v0 = vadd.f32 %v4613_v48, %v2862_v33  ;;  %vm583_vm14 = vcmp.lt.s32.totalorder %v6778_v55, 333  ;;  %v2870_v48 = vadd.f32 %v4555_v18, %v7157_v4  ;;  %v553_v18 = vadd.s32 112, %v6577_v54 }
 0x282   : > { %v3224_v34 = vsel %vm581_vm12, %v3176_v11, 0.0  ;;  %v6775_v57 = vadd.f32 %v4735_v29, %v3048_v26  ;;  %v4674_v7 = vadd.f32 %v4673_v39, %v4672_v62  ;;  %v4737_v42 = vpop.f32.mrf.mxu1  ;;  %v7155_v39 = vld [vmem:[#allocation47_spill] sm:$0xff]  ;;  %v6801_v33 = vadd.s32 %v6581_v32, %v551_v6 }
 0x283   : > { %v4675_v22 = vpop.f32.mrf.mxu0  ;;  %4838 = vmatmul.mubr.msk.f32.gmra.mxu0 %vm3246_vm3, %v3224_v34  ;;  %v4738_v30 = vadd.f32 %v4737_v42, %v4736_v44 }
 0x284   : > { %v3177_v40 = vmax.f32 %v6775_v57, 0.0  ;;  %v3051_v2 = vadd.f32 %v4674_v7, %v2954_v35  ;;  %v4739_v8 = vpop.f32.mrf.mxu1  ;;  %v7156_v35 = vld [vmem:[#allocation49_spill] sm:$0xff]  ;;  %vm584_vm15 = vcmp.lt.s32.totalorder %v6801_v33, 333 }
 0x285   : > { %v4676_v62 = vpop.f32.mrf.mxu0  ;;  %v4616_v44 = vadd.f32 %v7156_v35, %v7155_v39  ;;  %v7160_v39 = vld [vmem:[#allocation51_spill] sm:$0xff]  ;;  %v7161_v35 = vld [vmem:[#allocation53_spill] sm:$0xff] }
 0x286   : > { %v6789_v26 = vadd.f32 %v4738_v30, %v3051_v2  ;;  %v4677_v29 = vadd.f32 %v4676_v62, %v4675_v22  ;;  %v4740_v14 = vpop.f32.mrf.mxu1  ;;  %v3225_v5 = vsel %vm582_vm13, %v3177_v40, 0.0  ;;  %v7158_v30 = vld [vmem:[#allocation54_spill] sm:$0xff] }
 0x287   : > { %v4678_v47 = vpop.f32.mrf.mxu0  ;;  %4840 = vmatprep.mubr.msk.f32.mxu0 %vm3246_vm3, %v3225_v5  ;;  %v4741_v42 = vadd.f32 %v4740_v14, %v4739_v8  ;;  %v2962_v61 = vadd.f32 %v4616_v44, %v2865_v1  ;;  %v4558_v49 = vadd.f32 %v7159_v12, %v7158_v30  ;;  %v569_v8 = vadd.s32 %v6581_v32, %v552_v51 }
 0x288   : > { %v3178_v34 = vmax.f32 %v6789_v26, 0.0  ;;  %v3056_v7 = vadd.f32 %v4677_v29, %v2959_v0  ;;  %v4742_v22 = vpop.f32.mrf.mxu1  ;;  %v4619_v0 = vadd.f32 %v7161_v35, %v7160_v39  ;;  %v554_v35 = vadd.s32 120, %v6577_v54 }
 0x289   : > { %v4679_v2 = vpop.f32.mrf.mxu0  ;;  %vm585_vm0 = vcmp.lt.s32.totalorder %v569_v8, 333 }
 0x28a   : > { %v3226_v56 = vsel %vm583_vm14, %v3178_v34, 0.0  ;;  %v3153_v62 = vadd.f32 %v4741_v42, %v3056_v7  ;;  %v4680_v6 = vadd.f32 %v4679_v2, %v4678_v47  ;;  %v4743_v5 = vpop.f32.mrf.mxu1  ;;  %v2967_v30 = vadd.f32 %v4619_v0, %v2870_v48  ;;  %v7162_v47 = vld [vmem:[#allocation33_spill] sm:$0xff] }
 0x28b   : > { %v4681_v1 = vpop.f32.mrf.mxu0  ;;  %4841 = vmatmul.mubr.msk.f32.gmra.mxu0 %vm3246_vm3, %v3226_v56  ;;  %v4744_v44 = vadd.f32 %v4743_v5, %v4742_v22  ;;  %v2873_v42 = vadd.f32 %v4558_v49, %v7162_v47  ;;  %v7163_v22 = vld [vmem:[#allocation55_spill] sm:$0xff] }
 0x28c   : > { %v3179_v29 = vmax.f32 %v3153_v62, 0.0  ;;  %v3059_v14 = vadd.f32 %v4680_v6, %v2962_v61  ;;  %v4745_v4 = vpop.f32.mrf.mxu1  ;;  %v570_v61 = vadd.s32 %v6581_v32, %v553_v18  ;;  %v7164_v62 = vld [vmem:[#allocation57_spill] sm:$0xff] }
 0x28d   : > { %v4682_v7 = vpop.f32.mrf.mxu0  ;;  %v4622_v48 = vadd.f32 %v7164_v62, %v7163_v22 }
 0x28e   : > { %v3156_v2 = vadd.f32 %v4744_v44, %v3059_v14  ;;  %v4683_v12 = vadd.f32 %v4682_v7, %v4681_v1  ;;  %v4746_v39 = vpop.f32.mrf.mxu1  ;;  %v3227_v51 = vsel %vm584_vm15, %v3179_v29, 0.0  ;;  %vm586_vm1 = vcmp.lt.s32.totalorder %v570_v61, 333 }
 0x28f   : > { %v4684_v56 = vpop.f32.mrf.mxu0  ;;  %4843 = vmatprep.mubr.msk.f32.mxu0 %vm3246_vm3, %v3227_v51  ;;  %v4747_v49 = vadd.f32 %v4746_v39, %v4745_v4  ;;  %v2970_v14 = vadd.f32 %v4622_v48, %v2873_v42  ;;  %v571_v51 = vadd.s32 %v6581_v32, %v554_v35  ;;  %v7165_v42 = vmov 0.0  }
 0x290   : > { %v3180_v6 = vmax.f32 %v3156_v2, 0.0  ;;  %v3064_v5 = vadd.f32 %v4683_v12, %v2967_v30  ;;  %v4748_v0 = vpop.f32.mrf.mxu1 }
 0x291   : > { %v4685_v1 = vpop.f32.mrf.mxu0  ;;  %vm587_vm2 = vcmp.lt.s32.totalorder %v571_v51, 333  ;;  %v3465_v51 = vsub.s32 0, %v6577_v54 }
 0x292   : > { %v3228_v44 = vsel %vm585_vm0, %v3180_v6, 0.0  ;;  %v3161_v7 = vadd.f32 %v4747_v49, %v3064_v5  ;;  %v4686_v47 = vadd.f32 %v4685_v1, %v4684_v56  ;;  %v4749_v41 = vpop.f32.mrf.mxu1 }
 0x293   : > { %4844 = vmatmul.mubr.msk.f32.gmra.mxu0 %vm3246_vm3, %v3228_v44  ;;  %v4750_v24 = vadd.f32 %v4749_v41, %v4748_v0  ;;  %v7166_v41 = vmax.f32 %v6631_v45, 0.0  ;;  %v5496_v45 = vmov 0  }
 0x294   : > { %v3181_v18 = vmax.f32 %v3161_v7, 0.0  ;;  %v3067_v16 = vadd.f32 %v4686_v47, %v2970_v14  ;;  %5055 = vset.pattern.permute.xlu0 %v5496_v45  ;;  %5056 = vset.pattern.permute.xlu1 %v5496_v45  ;;  %v3456_v47 = vld [vmem:[#allocation11] sm:$0x1] }
 0x295   : > { %3460 = vperm.xlu0 %5055, %v3457_v13  }
 0x296   : > { %v3164_v22 = vadd.f32 %v4750_v24, %v3067_v16  ;;  %v3229_v2 = vsel %vm586_vm1, %v3181_v18, 0.0  ;;  %v7167_v16 = vmax.f32 %v6609_v60, 0.0  ;;  %v7168_v24 = vmax.f32 %v6596_v58, 0.0 }
 0x297   : > { %4846 = vmatprep.mubr.msk.f32.mxu0 %vm3246_vm3, %v3229_v2 }
 0x298   : > { %v3182_v4 = vmax.f32 %v3164_v22, 0.0 }
 0x29a   : > { %v3230_v30 = vsel %vm587_vm2, %v3182_v4, 0.0  ;;  %4885 = vmatpush3.msk.msra.mxu0 %vm587_vm2, %v3182_v4  ;;  %vm7169_vm2 = vcmp.lt.s32.totalorder %v6589_v23, 333 }
 0x29b   : > { %4847 = vmatmul.mubr.msk.f32.gmra.mxu0 %vm3246_vm3, %v3230_v30  ;;  %4886 = vmatprep.subr.mxu0 %v7165_v42  ;;  %vm5495_vm3 = vmmov 0  }
 0x29c   : > { %4887 = vmatpush3.msk.msra.mxu0 %vm586_vm1, %v3181_v18  ;;  %4881 = vmatprep.mubr.msk.f32.mxu1 %vm5495_vm3, %v7165_v42  ;;  %v7170_v18 = vlaneseq }
 0x29d   : > { %4888 = vmatprep.subr.mxu0 %v7165_v42  ;;  %4916 = vmatprep.mubr.msk.f32.mxu0 %vm5495_vm3, %v7165_v42 }
 0x29e   : > { %4889 = vmatpush3.msk.msra.mxu0 %vm585_vm0, %v3180_v6  ;;  %v589_v22 = vand.u32 127, %v7170_v18 }
 0x29f   : > { %4890 = vmatprep.subr.mxu0 %v7165_v42 }
 0x2a0   : > { %4891 = vmatpush3.msk.msra.mxu0 %vm584_vm15, %v3179_v29  ;;  %v590_v30 = vadd.s32 %v589_v22, %v6581_v32 }
 0x2a1   : > { %4892 = vmatprep.subr.mxu0 %v7165_v42 }
 0x2a2   : > { %4893 = vmatpush3.msk.msra.mxu0 %vm583_vm14, %v3178_v34 }
 0x2a3   : > { %4894 = vmatprep.subr.mxu0 %v7165_v42 }
 0x2a4   : > { %4895 = vmatpush3.msk.msra.mxu0 %vm582_vm13, %v3177_v40 }
 0x2a5   : > { %4896 = vmatprep.subr.mxu0 %v7165_v42 }
 0x2a6   : > { %4897 = vmatpush3.msk.msra.mxu0 %vm581_vm12, %v3176_v11 }
 0x2a7   : > { %4898 = vmatprep.subr.mxu0 %v7165_v42 }
 0x2a8   : > { %4899 = vmatpush3.msk.msra.mxu0 %vm580_vm11, %v3175_v46 }
 0x2a9   : > { %4900 = vmatprep.subr.mxu0 %v7165_v42 }
 0x2aa   : > { %4901 = vmatpush3.msk.msra.mxu0 %vm579_vm10, %v3174_v17 }
 0x2ab   : > { %4902 = vmatprep.subr.mxu0 %v7165_v42 }
 0x2ac   : > { %4903 = vmatpush3.msk.msra.mxu0 %vm578_vm9, %v3173_v43  ;;  %vm3704_vm9 = vcmask 516096  }
 0x2ad   : > { %4904 = vmatprep.subr.mxu0 %v7165_v42 }
 0x2ae   : > { %4905 = vmatpush3.msk.msra.mxu0 %vm577_vm8, %v3172_v10  ;;  %vm3620_vm8 = vcmask 0  }
 0x2af   : > { %4906 = vmatprep.subr.mxu0 %v7165_v42 }
 0x2b0   : > { %4907 = vmatpush3.msk.msra.mxu0 %vm576_vm7, %v3171_v21  ;;  %vm3594_vm7 = vcmask 1040384  }
 0x2b1   : > { %4908 = vmatprep.subr.mxu0 %v7165_v42 }
 0x2b2   : > { %4909 = vmatpush3.msk.msra.mxu0 %vm575_vm6, %v3170_v37  ;;  %vm591_vm6 = vcmp.lt.s32.totalorder %v590_v30, 333 }
 0x2b3   : > { %4910 = vmatprep.subr.mxu0 %v7165_v42 }
 0x2b4   : > { %4911 = vmatpush3.msk.msra.mxu0 %vm574_vm5, %v7166_v41  ;;  %v3589_v41 = vld [vmem:[%s447_s27] sm:$0x1]  ;;  %s3732_s27 = sshll.u32 %s5802_s25, 4  ;;  %s3733_s27 = int_to_ptr.vmem [resolvable:$true] %s3732_s27 }
 0x2b5   : > { %4912 = vmatprep.subr.mxu0 %v7165_v42  ;;  %vm3590_vm5 = vcmp.gt.f32.partialorder %v3589_v41, 0.5  ;;  %s5351_s17 = scalar_lea.vmem %s3733_s27, 16  ;;  %p5358_p2 = scmp.lt.s32.totalorder %s3733_s27, %s5356_s28 }
 0x2b6   : > { %4913 = vmatpush3.msk.msra.mxu0 %vm573_vm4, %v7167_v16  ;;  %vm3467_vm4 = vcmask 261120   ;;  %p5352_p11 = scmp.ne.s32.totalorder %s3733_s27, %s5351_s17  ;;  %p5359_p3 = scmp.lt.s32.totalorder %s5357_s29, %s5351_s17 }
 0x2b7   : > { %4914 = vmatprep.subr.mxu0 %v7165_v42 }
 0x2b8   : > { %4915 = vmatpush3.msk.msra.mxu0 %vm7169_vm2, %v7168_v24  ;;  %p5353_p4 = pnand %p5352_p11, %p7174_p0  ;;  %p5360_p9 = por %p5359_p3, %p5358_p2 }
 0x2ba   : > { %p5354_p7 = pneg %p5353_p4 }
 0x2bc   : > { %p5361_p8 = pnand %p5360_p9, %p5354_p7 }
 0x310   : > { %v3461_v2 = vpop.permute.xlu0 %3460 }
 0x311   : > { %v3466_v4 = vrot.slane %v3461_v2, %v3465_v51 }
 0x323   : > { %v6898_v60 = vpop.f32.mrf.mxu0 }
 0x324   : > { %v3367_v6 = vadd.f32 %v6898_v60, %v6906_v28  ;;  %v3593_v60 = vld [vmem:[%s5793_s10] sm:$0x1] }
 0x325   : > { %v6900_v31 = vpop.f32.mrf.mxu0 }
 0x326   : > { %v3362_v49 = vadd.f32 %v6906_v28, %v6900_v31 }
 0x32b   : > { %v6902_v15 = vpop.f32.mrf.mxu0 }
 0x32c   : > { %v3377_v35 = vadd.f32 %v6902_v15, %v6906_v28 }
 0x32d   : > { %v6904_v58 = vpop.f32.mrf.mxu0 }
 0x32e   : > { %v3372_v62 = vadd.f32 %v6906_v28, %v6904_v58 }
 0x333   : > { %v4833_v23 = vpop.f32.mrf.mxu0 }
 0x334   : > { %v3387_v29 = vadd.f32 %v4833_v23, %v6906_v28 }
 0x335   : > { %v3381_v20 = vpop.f32.mrf.mxu0 }
 0x336   : > { %v3382_v39 = vadd.f32 %v6906_v28, %v3381_v20 }
 0x33b   : > { %v4836_v25 = vpop.f32.mrf.mxu0 }
 0x33c   : > { %v3397_v26 = vadd.f32 %v4836_v25, %v6906_v28 }
 0x33d   : > { %v3391_v37 = vpop.f32.mrf.mxu0 }
 0x33e   : > { %v3392_v34 = vadd.f32 %v6906_v28, %v3391_v37 }
 0x343   : > { %v4839_v27 = vpop.f32.mrf.mxu0 }
 0x344   : > { %v3407_v11 = vadd.f32 %v4839_v27, %v6906_v28 }
 0x345   : > { %v3401_v50 = vpop.f32.mrf.mxu0 }
 0x346   : > { %v3402_v55 = vadd.f32 %v6906_v28, %v3401_v50 }
 0x34b   : > { %v4842_v21 = vpop.f32.mrf.mxu0 }
 0x34c   : > { %v3417_v36 = vadd.f32 %v4842_v21, %v6906_v28 }
 0x34d   : > { %v3411_v52 = vpop.f32.mrf.mxu0 }
 0x34e   : > { %v3412_v38 = vadd.f32 %v6906_v28, %v3411_v52  ;;  %v3614_v52 = vld [vmem:[%s5798_s5] sm:$0x1] }
 0x353   : > { %v4845_v19 = vpop.f32.mrf.mxu0 }
 0x354   : > { %v3427_v17 = vadd.f32 %v4845_v19, %v6906_v28 }
 0x355   : > { %v3421_v10 = vpop.f32.mrf.mxu0 }
 0x356   : > { %v3422_v3 = vadd.f32 %v6906_v28, %v3421_v10 }
 0x35b   : > { %v4848_v63 = vpop.f32.mrf.mxu0 }
 0x35c   : > { %v3437_v43 = vadd.f32 %v4848_v63, %v6906_v28 }
 0x35d   : > { %v3431_v53 = vpop.f32.mrf.mxu0 }
 0x35e   : > { %5185 = vtanh.f32 %v3437_v43  ;;  %v3432_v59 = vadd.f32 %v6906_v28, %v3431_v53  ;;  %v3622_v53 = vld [vmem:[%s5802_s25] sm:$0x1] }
 0x360   : > { %5187 = vtanh.f32 %v3432_v59 }
 0x361   : > { %5189 = vtanh.f32 %v3427_v17 }
 0x362   : > { %5191 = vtanh.f32 %v3422_v3 }
 0x363   : > { %5193 = vtanh.f32 %v3417_v36 }
 0x364   : > { %5195 = vtanh.f32 %v3412_v38 }
 0x365   : > { %5197 = vtanh.f32 %v3407_v11 }
 0x366   : > { %5199 = vtanh.f32 %v3402_v55 }
 0x367   : > { %5201 = vtanh.f32 %v3397_v26 }
 0x368   : > { %5203 = vtanh.f32 %v3392_v34 }
 0x369   : > { %5205 = vtanh.f32 %v3387_v29 }
 0x36a   : > { %5207 = vtanh.f32 %v3382_v39 }
 0x36b   : > { %v5186_v46 = vpop.eup %5185  ;;  %5209 = vtanh.f32 %v3377_v35 }
 0x36c   : > { %4850 = vmatpush3.xpose.msk.msra.mxu1 %vm3467_vm4, %v5186_v46  ;;  %5211 = vtanh.f32 %v3372_v62 }
 0x36d   : > { %4851 = vmatprep.subr.mxu1 %v7165_v42  ;;  %v5188_v9 = vpop.eup %5187  ;;  %5213 = vtanh.f32 %v3367_v6 }
 0x36e   : > { %v5190_v57 = vpop.eup %5189  ;;  %5215 = vtanh.f32 %v3362_v49 }
 0x36f   : > { %v5192_v40 = vpop.eup %5191 }
 0x370   : > { %4852 = vmatpush3.xpose.msk.msra.mxu1 %vm3467_vm4, %v5188_v9  ;;  %v5194_v33 = vpop.eup %5193 }
 0x371   : > { %4853 = vmatprep.subr.mxu1 %v7165_v42  ;;  %v5196_v8 = vpop.eup %5195 }
 0x372   : > { %v5198_v12 = vpop.eup %5197 }
 0x373   : > { %v5200_v56 = vpop.eup %5199 }
 0x374   : > { %4854 = vmatpush3.xpose.msk.msra.mxu1 %vm3467_vm4, %v5190_v57  ;;  %v5202_v61 = vpop.eup %5201 }
 0x375   : > { %4855 = vmatprep.subr.mxu1 %v7165_v42  ;;  %v5204_v48 = vpop.eup %5203 }
 0x376   : > { %v5206_v5 = vpop.eup %5205 }
 0x377   : > { %v5208_v0 = vpop.eup %5207 }
 0x378   : > { %4856 = vmatpush3.xpose.msk.msra.mxu1 %vm3467_vm4, %v5192_v40  ;;  %v5210_v1 = vpop.eup %5209 }
 0x379   : > { %4857 = vmatprep.subr.mxu1 %v7165_v42  ;;  %v5212_v14 = vpop.eup %5211 }
 0x37a   : > { %v5214_v44 = vpop.eup %5213 }
 0x37b   : > { %v5216_v7 = vpop.eup %5215 }
 0x37c   : > { %4858 = vmatpush3.xpose.msk.msra.mxu1 %vm3467_vm4, %v5194_v33 }
 0x37d   : > { %4859 = vmatprep.subr.mxu1 %v7165_v42 }
 0x380   : > { %4860 = vmatpush3.xpose.msk.msra.mxu1 %vm3467_vm4, %v5196_v8 }
 0x381   : > { %4861 = vmatprep.subr.mxu1 %v7165_v42 }
 0x384   : > { %4862 = vmatpush3.xpose.msk.msra.mxu1 %vm3467_vm4, %v5198_v12 }
 0x385   : > { %4863 = vmatprep.subr.mxu1 %v7165_v42 }
 0x388   : > { %4864 = vmatpush3.xpose.msk.msra.mxu1 %vm3467_vm4, %v5200_v56 }
 0x389   : > { %4865 = vmatprep.subr.mxu1 %v7165_v42 }
 0x38c   : > { %4866 = vmatpush3.xpose.msk.msra.mxu1 %vm3467_vm4, %v5202_v61 }
 0x38d   : > { %4867 = vmatprep.subr.mxu1 %v7165_v42 }
 0x390   : > { %4868 = vmatpush3.xpose.msk.msra.mxu1 %vm3467_vm4, %v5204_v48 }
 0x391   : > { %4869 = vmatprep.subr.mxu1 %v7165_v42 }
 0x394   : > { %4870 = vmatpush3.xpose.msk.msra.mxu1 %vm3467_vm4, %v5206_v5 }
 0x395   : > { %4871 = vmatprep.subr.mxu1 %v7165_v42 }
 0x398   : > { %4872 = vmatpush3.xpose.msk.msra.mxu1 %vm3467_vm4, %v5208_v0 }
 0x399   : > { %4873 = vmatprep.subr.mxu1 %v7165_v42 }
 0x39c   : > { %4874 = vmatpush3.xpose.msk.msra.mxu1 %vm3467_vm4, %v5210_v1 }
 0x39d   : > { %4875 = vmatprep.subr.mxu1 %v7165_v42 }
 0x3a0   : > { %4876 = vmatpush3.xpose.msk.msra.mxu1 %vm3467_vm4, %v5212_v14 }
 0x3a1   : > { %4877 = vmatprep.subr.mxu1 %v7165_v42 }
 0x3a4   : > { %4878 = vmatpush3.xpose.msk.msra.mxu1 %vm3467_vm4, %v5214_v44 }
 0x3a5   : > { %4879 = vmatprep.subr.mxu1 %v7165_v42 }
 0x3a8   : > { %4880 = vmatpush3.xpose.msk.msra.mxu1 %vm3467_vm4, %v5216_v7 }
 0x3ab   : > { %4882 = vmatmul.mubr.msk.f32.vlgmr.msra.gmra.mxu1 %vm3467_vm4, %v3456_v47 }
 0x46b   : > { %v3585_v16 = vpop.f32.mrf.mxu1 }
 0x46c   : > { %v3586_v42 = vadd.f32 %v3585_v16, %v3466_v4 }
 0x46d   : > { %v4883_v24 = vpop.f32.mrf.mxu1 }
 0x46e   : > { %v3591_v13 = vsel %vm3590_vm5, %v3586_v42, -1e+09 }
 0x46f   : > { %v3592_v45 = vsel %vm591_vm6, %v3591_v13, -2e+09 }
 0x470   : > { %v3595_v54 = vsel %vm3594_vm7, %v3592_v45, -inf }
 0x471   : > { %3596 = vmax.xlane.f32.xlu0 %v3595_v54 }
 0x4fa   : > { %v3597_v31 = vpop.xlane.xlu0 %3596 }
 0x4fb   : > { %v3598_v15 = vmax.f32 %v3593_v60, %v3597_v31 }
 0x4fd   : > { %v3599_v58 = vsub.f32 %v3593_v60, %v3598_v15  ;;  %3706 = vst.msk [vmem:[%s5793_s10] sm:$0x1] %vm3620_vm8, %v3598_v15  ;;  %3604 = vperm.xlu1 %5056, %v3598_v15  }
 0x4ff   : > { %v3600_v32 = vmul.f32 1.442695, %v3599_v58 }
 0x501   : > { %5217 = vpow2.f32 %v3600_v32 }
 0x50e   : > { %v5218_v23 = vpop.eup %5217 }
 0x50f   : > { %3625 = vperm.xlu0 %5055, %v5218_v23   ;;  %v3615_v19 = vmul.f32 %v5218_v23, %v3614_v52 }
 0x578   : > { %v3605_v20 = vpop.permute.xlu1 %3604 }
 0x579   : > { %v3610_v25 = vrot.slane %v3605_v20, %v3465_v51 }
 0x57b   : > { %v3611_v37 = vsub.f32 %v3592_v45, %v3610_v25 }
 0x57d   : > { %v3612_v27 = vmul.f32 1.442695, %v3611_v37 }
 0x57f   : > { %5219 = vpow2.f32 %v3612_v27 }
 0x58a   : > { %v3626_v63 = vpop.permute.xlu0 %3625 }
 0x58b   : > { %v3631_v43 = vrot.slane %v3626_v63, %v3465_v51 }
 0x58c   : > { %v5220_v50 = vpop.eup %5219 }
 0x58d   : > { %4917 = vmatmul.mubr.f32.vlgmr.msra.gmra.mxu0 %v5220_v50  ;;  %v3616_v21 = vsel %vm3594_vm7, %v5220_v50, 0.0  ;;  %v3632_v59 = vmul.f32 %v3631_v43, %v3622_v53 }
 0x58e   : > { %3617 = vadd.xlane.f32.xlu1 %v3616_v21 }
 0x617   : > { %v3618_v10 = vpop.xlane.xlu1 %3617 }
 0x618   : > { %v3619_v28 = vadd.f32 %v3618_v10, %v3615_v19 }
 0x61a   : > { %3621 = vst.msk [vmem:[%s5798_s5] sm:$0x1] %vm3620_vm8, %v3619_v28  ;;  %s3714_s5 = scalar_lea.sflag [#allocation5], %s503_s12 }
 0x64d   : > { %v3699_v17 = vpop.f32.mrf.mxu0 }
 0x64e   : > { %v3703_v3 = vadd.f32 %v3699_v17, %v3632_v59 }
 0x64f   : > { %v4918_v36 = vpop.f32.mrf.mxu0 }
 0x650   : > { %3705 = vst.msk [vmem:[%s5802_s25] sm:$0x1] %vm3704_vm9, %v3703_v3 }
 0x651   : > { %5364 = shalt.err (!%p5361_p8)
}
 0x652   : > { %s5365_s25 = scalar_lea.hbm %s6979_s3, 16  ;;  %s5369_s14 = scalar_lea.hbm %s7173_s11, 32 }
 0x653   : > { %p5366_p5 = scmp.ne.s32.totalorder %s6979_s3, %s5365_s25  ;;  %p5370_p10 = scmp.lt.s32.totalorder %s6979_s3, %s7173_s11 }
 0x654   : > { %p5371_p12 = scmp.lt.s32.totalorder %s5369_s14, %s5365_s25 }
 0x655   : > { %p5367_p1 = pnand %p5366_p5, %p7174_p0 }
 0x656   : > { %p5372_p13 = por %p5371_p12, %p5370_p10 }
 0x657   : > { %p5368_p6 = pneg %p5367_p1 }
 0x659   : > { %p5373_p11 = pnand %p5372_p13, %p5368_p6 }
 0x65b   : > { %5376 = shalt.err (!%p5373_p11)
}
 0x65c   : > { %4934 = dma.vmem_to_hbm [thread:$0]  (%p7174_p0), %s3733_s27, 16, %s6979_s3, %s3714_s5  }
 0x65d PF: > { %s7175_s6 = sld [smem:[#allocation18_spill]]  ;;  %p4956_p4 = scmp.ge.s32.totalorder %s5483_s24, 2 }
 0x65e   : > { %s7176_s15 = sld [smem:[#allocation27_spill]] }
 0x663   : > { %s3756_s26 = sand.u32 1, %s7175_s6  }
 0x664   : > { %p7177_p7 = scmp.ne.s32.totalorder %s7176_s15, 0  ;;  %s3757_s0 = scalar_lea.sflag [#allocation5], %s3756_s26 }
 0x666   : > { %p4947_p2 = pnand %p4956_p4, %p7177_p7 }
 0x668   : > { %p4948_p3 = pneg %p4947_p2 }
 0x66a   : > { %5438 = dma.done.wait (%p4948_p3), %s3757_s0, 16  }
 0x66b   : > { %5440 = vsyncadd (%p4948_p3), %s3757_s0, 4294967280  ;;  %s33_s24 = sadd.s32 1, %s5483_s24   ;;  %s7178_s10 = sld [smem:[#allocation19_spill]] }
 0x66c   : > { %p30_p9 = scmp.ge.s32.totalorder %s33_s24, 6   ;;  %s7179_s17 = sld [smem:[#allocation24_spill]] }
 0x66d   : > { %s7180_s7 = sld [smem:[#allocation25_spill]]  ;;  %s7185_s15 = smov %s5447_s16 }
 0x66e   : > { %s7181_s27 = sld [smem:[#allocation20_spill]]  ;;  %s7187_s18 = smov %s5459_s19 }
 0x66f   : > { %s7182_s21 = sld [smem:[#allocation21_spill]]  ;;  %s7188_s19 = smov %s5463_s20 }
 0x670   : > { %s7183_s22 = sld [smem:[#allocation22_spill]]  ;;  %32 = sbr.rel (!%p30_p9) target bundleno = 19 (0x13), region = 150 }
 0x671   : > { %s7184_s23 = sld [smem:[#allocation23_spill]]  ;;  %s7186_s16 = smov %s7178_s10 }
 0x673   : > { %s7189_s20 = smov %s7180_s7 }
 0x674   : > { %s7190_s7 = smov %s7181_s27 }
 0x675   :  { %3761 = vsyncpa [#allocation4], 1 }
 0x676   :  { %3763 = vsyncpa [#allocation4 + $0x1], 1 }
 0x677   :  { %3764 = vsyncpa [#allocation7], 1 }
 0x678   :  { %3766 = vsyncpa [#allocation7 + $0x1], 1 }
 0x679   :  { %3767 = vsyncpa [#allocation10], 1 }
 0x67a   :  { %3768 = vsyncpa [#allocation5], 1 }
 0x67b   :  { %3770 = vsyncpa [#allocation5 + $0x1], 1 }

</bundles_post_ra>
